<compile_context>
chip_gen: v6e
topology: v6e:2x2x1
jax: 0.10.0
libtpu: 0.0.40
codegen_flags: <defaults>
</compile_context>

<pallas_src>
import functools

import jax
import jax.numpy as jnp
from jax.experimental import pallas as pl
from jax.experimental.pallas import tpu as pltpu


def _round_up(x, m):
    return (x + m - 1) // m * m


# ----------------------------------------------------------------------------
# Pallas kernel: full-K matmul + bias (+ optional ReLU).  No reduction axis,
# no accumulator scratch — each grid point computes one finished output tile.
# ----------------------------------------------------------------------------
def _matmul_bias_kernel(x_ref, w_ref, b_ref, o_ref, *, relu):
    out = jnp.dot(x_ref[...], w_ref[...], preferred_element_type=jnp.float32)
    out = out + b_ref[...]                     # bias broadcast over rows
    if relu:
        out = jnp.maximum(out, 0.0)
    o_ref[...] = out.astype(o_ref.dtype)


def pallas_linear(x, w, b_row, *, relu=False):
    """y = x @ w + b (optionally ReLU).  x:(M,K)  w:(K,N)  b_row:(1,N) -> (M,N)."""
    x = x.astype(jnp.float32)
    M, K = x.shape
    K2, N = w.shape
    assert K == K2

    # Pad M only to the sublane multiple (8); cap TM at 128 so conv1's 450 rows
    # still produce several parallel grid blocks for megacore (v7x).
    pM = _round_up(M, 8)
    if pM <= 128:
        TM = pM
    else:
        TM = 128
        pM = _round_up(M, TM)
    if pM != M:
        x = jnp.pad(x, ((0, pM - M), (0, 0)))

    # Lane tile: 256 matches the v6e/v7x 256-wide MXU; otherwise 128 or full N.
    if N % 256 == 0:
        TN = 256
    elif N % 128 == 0:
        TN = 128
    else:
        TN = N                                  # full-dim block (N < 128 here)

    grid = (pM // TM, N // TN)

    out = pl.pallas_call(
        functools.partial(_matmul_bias_kernel, relu=relu),
        out_shape=jax.ShapeDtypeStruct((pM, N), jnp.float32),
        grid_spec=pltpu.PrefetchScalarGridSpec(
            num_scalar_prefetch=0,
            grid=grid,
            in_specs=[
                pl.BlockSpec((TM, K), lambda i, j: (i, 0)),
                pl.BlockSpec((K, TN), lambda i, j: (0, j)),
                pl.BlockSpec((1, TN), lambda i, j: (0, j)),
            ],
            out_specs=pl.BlockSpec((TM, TN), lambda i, j: (i, j)),
        ),
        compiler_params=pltpu.CompilerParams(
            dimension_semantics=("parallel", "parallel")),
    )(x, w, b_row)

    if pM != M:
        out = out[:M]
    return out


# ----------------------------------------------------------------------------
# Pallas kernel: fused fc1 + ReLU + [dof concat] + fc2 in a single call.
# concat is realised as  h @ wf2[:512] + dof @ wf2[512:]  (wf2 pre-split).
# ----------------------------------------------------------------------------
def _fused_tail_kernel(x_ref, w1_ref, b1_ref, dof_ref, w2x_ref, w2d_ref,
                       b2_ref, o_ref):
    h = jnp.dot(x_ref[...], w1_ref[...], preferred_element_type=jnp.float32)
    h = jnp.maximum(h + b1_ref[...], 0.0)
    out = jnp.dot(h, w2x_ref[...], preferred_element_type=jnp.float32)
    out = out + jnp.dot(dof_ref[...], w2d_ref[...],
                        preferred_element_type=jnp.float32)
    o_ref[...] = (out + b2_ref[...]).astype(o_ref.dtype)


def fused_fc_tail(x, dof, w1, b1_row, w2x, w2d, b2_row):
    x = x.astype(jnp.float32)
    dof = dof.astype(jnp.float32)
    M, K1 = x.shape
    Hdim = w1.shape[1]
    Ddof = dof.shape[1]
    N = w2x.shape[1]

    pM = _round_up(M, 8)
    if pM != M:
        x = jnp.pad(x, ((0, pM - M), (0, 0)))
        dof = jnp.pad(dof, ((0, pM - M), (0, 0)))

    out = pl.pallas_call(
        _fused_tail_kernel,
        out_shape=jax.ShapeDtypeStruct((pM, N), jnp.float32),
        grid_spec=pltpu.PrefetchScalarGridSpec(
            num_scalar_prefetch=0,
            grid=(1,),
            in_specs=[
                pl.BlockSpec((pM, K1), lambda i: (0, 0)),
                pl.BlockSpec((K1, Hdim), lambda i: (0, 0)),
                pl.BlockSpec((1, Hdim), lambda i: (0, 0)),
                pl.BlockSpec((pM, Ddof), lambda i: (0, 0)),
                pl.BlockSpec((Hdim, N), lambda i: (0, 0)),
                pl.BlockSpec((Ddof, N), lambda i: (0, 0)),
                pl.BlockSpec((1, N), lambda i: (0, 0)),
            ],
            out_specs=pl.BlockSpec((pM, N), lambda i: (0, 0)),
        ),
        compiler_params=pltpu.CompilerParams(
            dimension_semantics=("arbitrary",)),
    )(x, w1, b1_row, dof, w2x, w2d, b2_row)

    return out[:M] if pM != M else out


# ----------------------------------------------------------------------------
# Conv2d (valid padding) in NHWC: patch extraction via one XLA op, then the
# Pallas matmul+bias+ReLU kernel.  Patch feature order is (c, kh, kw), which
# matches PyTorch's weight.reshape(OC, C*KH*KW).
# ----------------------------------------------------------------------------
def conv2d_relu_nhwc(x_nhwc, wm, b_row, kh, kw, stride):
    N, H, W, C = x_nhwc.shape
    OH = (H - kh) // stride + 1
    OW = (W - kw) // stride + 1
    patches = jax.lax.conv_general_dilated_patches(
        x_nhwc, (kh, kw), (stride, stride), "VALID",
        dimension_numbers=("NHWC", "HWIO", "NHWC"))
    pm = patches.reshape(N * OH * OW, C * kh * kw)
    out = pallas_linear(pm, wm, b_row, relu=True)     # (N*OH*OW, OC)
    return out.reshape(N, OH, OW, -1)


# ----------------------------------------------------------------------------
# ObjectMask module (JAX / Pallas version)
# ----------------------------------------------------------------------------
class ObjectMaskPallas:
    def __init__(self, key, visual_obv_dim=(64, 64, 3), dof_obv_dim=(8,),
                 state_dim=64):
        H, W, C = visual_obv_dim
        self.visual_obv_dim = visual_obv_dim
        self.dof_dim = dof_obv_dim[0]
        self.state_dim = state_dim

        def init_conv(key, oc, ic, kh, kw):
            kw_, kb_ = jax.random.split(key)
            fan_in = ic * kh * kw
            s = 1.0 / jnp.sqrt(fan_in)
            return (jax.random.uniform(kw_, (oc, ic, kh, kw), jnp.float32, -s, s),
                    jax.random.uniform(kb_, (oc,), jnp.float32, -s, s))

        def init_fc(key, fin, fout):
            kw_, kb_ = jax.random.split(key)
            s = 1.0 / jnp.sqrt(fin)
            return (jax.random.uniform(kw_, (fin, fout), jnp.float32, -s, s),
                    jax.random.uniform(kb_, (fout,), jnp.float32, -s, s))

        k1, k2, k3, k4, k5 = jax.random.split(key, 5)
        # PyTorch-layout weights (kept for the pure-JAX reference)
        self.w1, self.b1 = init_conv(k1, 32, C, 8, 8)
        self.w2, self.b2 = init_conv(k2, 64, 32, 4, 4)
        self.w3, self.b3 = init_conv(k3, 64, 64, 3, 3)

        # Pre-reshaped matmul weights / row-biases (done once, not per call).
        self.wm1, self.bm1 = self.w1.reshape(32, -1).T, self.b1.reshape(1, -1)
        self.wm2, self.bm2 = self.w2.reshape(64, -1).T, self.b2.reshape(1, -1)
        self.wm3, self.bm3 = self.w3.reshape(64, -1).T, self.b3.reshape(1, -1)

        # spatial sizes after the conv stack (valid padding)
        oh = (H - 8) // 4 + 1
        oh = (oh - 4) // 2 + 1
        oh = (oh - 3) // 1 + 1
        ow = (W - 8) // 4 + 1
        ow = (ow - 4) // 2 + 1
        ow = (ow - 3) // 1 + 1
        self.oh, self.ow = oh, ow
        self.flat_dim = 64 * oh * ow

        self.wf1, self.bf1 = init_fc(k4, self.flat_dim, 512)
        self.wf2, self.bf2 = init_fc(k5, 512 + self.dof_dim, state_dim)

        # fc1 rows reordered from PyTorch's NCHW flatten (c,oh,ow) to our NHWC
        # flatten (oh,ow,c) — identical math, zero per-call transposes.
        self.wf1_nhwc = (self.wf1.reshape(64, oh, ow, 512)
                         .transpose(1, 2, 0, 3)
                         .reshape(self.flat_dim, 512))
        self.bf1_row = self.bf1.reshape(1, -1)
        # fc2 pre-split so the dof concat happens inside the fused kernel.
        self.wf2_x = self.wf2[:512]
        self.wf2_dof = self.wf2[512:]
        self.bf2_row = self.bf2.reshape(1, -1)

        # jit the full forward so per-layer glue ops fuse / dispatch once.
        self._fwd = jax.jit(self._forward)
        self._fwd_no_dof = jax.jit(self._forward_no_dof)

    # ---- conv trunk in NHWC ----
    def _conv_trunk(self, visual_obv_nchw):
        x = jnp.transpose(visual_obv_nchw, (0, 2, 3, 1))   # NCHW -> NHWC once
        x = conv2d_relu_nhwc(x, self.wm1, self.bm1, 8, 8, 4)
        x = conv2d_relu_nhwc(x, self.wm2, self.bm2, 4, 4, 2)
        x = conv2d_relu_nhwc(x, self.wm3, self.bm3, 3, 3, 1)
        return x.reshape(x.shape[0], -1)                    # NHWC flatten

    def _forward(self, visual_obv, dof_obv):
        # TODO(synk): detectron2 panoptic/instance segmentation (pretrained
        # Mask R-CNN / Panoptic FPN) has no Pallas equivalent; the segmentation
        # callback is an identity placeholder here.
        x = self._conv_trunk(visual_obv)
        return fused_fc_tail(x, dof_obv, self.wf1_nhwc, self.bf1_row,
                             self.wf2_x, self.wf2_dof, self.bf2_row)

    def _forward_no_dof(self, visual_obv):
        # TODO(synk): original module errors if dof_obv is None (fc2 expects
        # 512+dof inputs); here we use only the 512-wide slice of fc2.
        x = self._conv_trunk(visual_obv)
        x = pallas_linear(x, self.wf1_nhwc, self.bf1_row, relu=True)
        return pallas_linear(x, self.wf2_x, self.bf2_row, relu=False)

    def __call__(self, visual_obv, dof_obv=None):
        if dof_obv is None:
            return self._fwd_no_dof(visual_obv)
        return self._fwd(visual_obv, dof_obv.astype(jnp.float32))

    # pure-JAX reference (NCHW, PyTorch-layout weights) for validation
    def reference(self, visual_obv, dof_obv=None):
        def conv(x, w, b, s):
            y = jax.lax.conv_general_dilated(
                x, w, (s, s), "VALID",
                dimension_numbers=("NCHW", "OIHW", "NCHW"))
            return jax.nn.relu(y + b[None, :, None, None])

        x = conv(visual_obv, self.w1, self.b1, 4)
        x = conv(x, self.w2, self.b2, 2)
        x = conv(x, self.w3, self.b3, 1)
        x = x.reshape(x.shape[0], -1)
        x = jax.nn.relu(x @ self.wf1 + self.bf1)
        if dof_obv is not None:
            x = jnp.concatenate([x, dof_obv.astype(jnp.float32)], axis=1)
            return x @ self.wf2 + self.bf2
        return x @ self.wf2_x + self.bf2


if __name__ == "__main__":
    key = jax.random.PRNGKey(0)
    k_model, k_img, k_dof = jax.random.split(key, 3)

    batch, C, H, W = 2, 3, 64, 64     # small shapes consistent with the module
    dof_dim, state_dim = 8, 64

    model = ObjectMaskPallas(k_model, visual_obv_dim=(H, W, C),
                             dof_obv_dim=(dof_dim,), state_dim=state_dim)

    visual_obv = jax.random.normal(k_img, (batch, C, H, W), jnp.float32)
    dof_obv = jax.random.normal(k_dof, (batch, dof_dim), jnp.float32)

    out = jax.block_until_ready(model(visual_obv, dof_obv))
    assert out.shape == (batch, state_dim), out.shape

    ref = jax.block_until_ready(model.reference(visual_obv, dof_obv))
    assert jnp.allclose(out, ref, atol=1e-3, rtol=1e-3), (
        float(jnp.max(jnp.abs(out - ref))))

    print("KERNEL_OK")
</pallas_src>

<mosaic_0001>
module attributes {stable_mosaic.version = 11 : i64} {
  func.func @_matmul_bias_kernel(%arg0: i32, %arg1: i32, %arg2: memref<128x192xf32, #tpu.memory_space<vmem>>, %arg3: memref<192x32xf32, #tpu.memory_space<vmem>>, %arg4: memref<1x32xf32, #tpu.memory_space<vmem>>, %arg5: memref<128x32xf32, #tpu.memory_space<vmem>>) attributes {dimension_semantics = [#tpu.dimension_semantics<parallel>, #tpu.dimension_semantics<parallel>], iteration_bounds = array<i64: 4, 1>, scalar_prefetch = 0 : i64, scratch_operands = 0 : i64, tpu.core_type = #tpu.core_type<tc>, window_params = [{transform_indices = @transform_0, window_bounds = array<i64: 128, 192>}, {transform_indices = @transform_1, window_bounds = array<i64: 192, 32>}, {transform_indices = @transform_2, window_bounds = array<i64: 1, 32>}, {transform_indices = @transform_3, window_bounds = array<i64: 128, 32>}]} {
    %c0 = arith.constant 0 : index
    %c0_0 = arith.constant 0 : index
    %0 = vector.load %arg2[%c0, %c0_0] : memref<128x192xf32, #tpu.memory_space<vmem>>, vector<128x192xf32>
    %c0_1 = arith.constant 0 : index
    %c0_2 = arith.constant 0 : index
    %1 = vector.load %arg3[%c0_1, %c0_2] : memref<192x32xf32, #tpu.memory_space<vmem>>, vector<192x32xf32>
    %cst = arith.constant dense<0.000000e+00> : vector<128x32xf32>
    %2 = tpu.matmul %0, %1, %cst {dimension_numbers = #tpu.dot_dimension_numbers<[1], [0], [0], [1], [0, 0, 1, 1], [], []>} : vector<128x192xf32>, vector<192x32xf32>, vector<128x32xf32> -> vector<128x32xf32>
    %c0_3 = arith.constant 0 : index
    %c0_4 = arith.constant 0 : index
    %3 = vector.load %arg4[%c0_3, %c0_4] : memref<1x32xf32, #tpu.memory_space<vmem>>, vector<1x32xf32>
    %4 = vector.broadcast %3 : vector<1x32xf32> to vector<128x32xf32>
    %5 = arith.addf %2, %4 : vector<128x32xf32>
    %cst_5 = arith.constant 0.000000e+00 : f32
    %6 = vector.broadcast %cst_5 : f32 to vector<128x32xf32>
    %7 = arith.maximumf %5, %6 : vector<128x32xf32>
    %c0_6 = arith.constant 0 : index
    %c0_7 = arith.constant 0 : index
    %8 = vector.load %arg5[%c0_6, %c0_7] : memref<128x32xf32, #tpu.memory_space<vmem>>, vector<128x32xf32>
    tpu.vector_store %arg5[%c0_6, %c0_7], %7 {strides = array<i32>} : memref<128x32xf32, #tpu.memory_space<vmem>>, vector<128x32xf32>,
    return
  }
  func.func @transform_0(%arg0: i32, %arg1: i32) -> (i32, i32) {
    %c0_i32 = arith.constant 0 : i32
    %c0_i32_0 = arith.constant 0 : i32
    return %arg0, %c0_i32 : i32, i32
  }
  func.func @transform_1(%arg0: i32, %arg1: i32) -> (i32, i32) {
    %c0_i32 = arith.constant 0 : i32
    %c0_i32_0 = arith.constant 0 : i32
    return %c0_i32, %arg1 : i32, i32
  }
  func.func @transform_2(%arg0: i32, %arg1: i32) -> (i32, i32) {
    %c0_i32 = arith.constant 0 : i32
    %c0_i32_0 = arith.constant 0 : i32
    return %c0_i32, %arg1 : i32, i32
  }
  func.func @transform_3(%arg0: i32, %arg1: i32) -> (i32, i32) {
    %c0_i32 = arith.constant 0 : i32
    return %arg0, %arg1 : i32, i32
  }
}

module attributes {stable_mosaic.version = 11 : i64} {
  func.func @_matmul_bias_kernel(%arg0: i32, %arg1: i32, %arg2: memref<72x512xf32, #tpu.memory_space<vmem>>, %arg3: memref<512x64xf32, #tpu.memory_space<vmem>>, %arg4: memref<1x64xf32, #tpu.memory_space<vmem>>, %arg5: memref<72x64xf32, #tpu.memory_space<vmem>>) attributes {dimension_semantics = [#tpu.dimension_semantics<parallel>, #tpu.dimension_semantics<parallel>], iteration_bounds = array<i64: 1, 1>, scalar_prefetch = 0 : i64, scratch_operands = 0 : i64, tpu.core_type = #tpu.core_type<tc>, window_params = [{transform_indices = @transform_0, window_bounds = array<i64: 72, 512>}, {transform_indices = @transform_1, window_bounds = array<i64: 512, 64>}, {transform_indices = @transform_2, window_bounds = array<i64: 1, 64>}, {transform_indices = @transform_3, window_bounds = array<i64: 72, 64>}]} {
    %c0 = arith.constant 0 : index
    %c0_0 = arith.constant 0 : index
    %0 = vector.load %arg2[%c0, %c0_0] : memref<72x512xf32, #tpu.memory_space<vmem>>, vector<72x512xf32>
    %c0_1 = arith.constant 0 : index
    %c0_2 = arith.constant 0 : index
    %1 = vector.load %arg3[%c0_1, %c0_2] : memref<512x64xf32, #tpu.memory_space<vmem>>, vector<512x64xf32>
    %cst = arith.constant dense<0.000000e+00> : vector<72x64xf32>
    %2 = tpu.matmul %0, %1, %cst {dimension_numbers = #tpu.dot_dimension_numbers<[1], [0], [0], [1], [0, 0, 1, 1], [], []>} : vector<72x512xf32>, vector<512x64xf32>, vector<72x64xf32> -> vector<72x64xf32>
    %c0_3 = arith.constant 0 : index
    %c0_4 = arith.constant 0 : index
    %3 = vector.load %arg4[%c0_3, %c0_4] : memref<1x64xf32, #tpu.memory_space<vmem>>, vector<1x64xf32>
    %4 = vector.broadcast %3 : vector<1x64xf32> to vector<72x64xf32>
    %5 = arith.addf %2, %4 : vector<72x64xf32>
    %cst_5 = arith.constant 0.000000e+00 : f32
    %6 = vector.broadcast %cst_5 : f32 to vector<72x64xf32>
    %7 = arith.maximumf %5, %6 : vector<72x64xf32>
    %c0_6 = arith.constant 0 : index
    %c0_7 = arith.constant 0 : index
    %8 = vector.load %arg5[%c0_6, %c0_7] : memref<72x64xf32, #tpu.memory_space<vmem>>, vector<72x64xf32>
    tpu.vector_store %arg5[%c0_6, %c0_7], %7 {strides = array<i32>} : memref<72x64xf32, #tpu.memory_space<vmem>>, vector<72x64xf32>,
    return
  }
  func.func @transform_0(%arg0: i32, %arg1: i32) -> (i32, i32) {
    %c0_i32 = arith.constant 0 : i32
    %c0_i32_0 = arith.constant 0 : i32
    return %arg0, %c0_i32 : i32, i32
  }
  func.func @transform_1(%arg0: i32, %arg1: i32) -> (i32, i32) {
    %c0_i32 = arith.constant 0 : i32
    %c0_i32_0 = arith.constant 0 : i32
    return %c0_i32, %arg1 : i32, i32
  }
  func.func @transform_2(%arg0: i32, %arg1: i32) -> (i32, i32) {
    %c0_i32 = arith.constant 0 : i32
    %c0_i32_0 = arith.constant 0 : i32
    return %c0_i32, %arg1 : i32, i32
  }
  func.func @transform_3(%arg0: i32, %arg1: i32) -> (i32, i32) {
    %c0_i32 = arith.constant 0 : i32
    return %arg0, %arg1 : i32, i32
  }
}

module attributes {stable_mosaic.version = 11 : i64} {
  func.func @_matmul_bias_kernel(%arg0: i32, %arg1: i32, %arg2: memref<32x576xf32, #tpu.memory_space<vmem>>, %arg3: memref<576x64xf32, #tpu.memory_space<vmem>>, %arg4: memref<1x64xf32, #tpu.memory_space<vmem>>, %arg5: memref<32x64xf32, #tpu.memory_space<vmem>>) attributes {dimension_semantics = [#tpu.dimension_semantics<parallel>, #tpu.dimension_semantics<parallel>], iteration_bounds = array<i64: 1, 1>, scalar_prefetch = 0 : i64, scratch_operands = 0 : i64, tpu.core_type = #tpu.core_type<tc>, window_params = [{transform_indices = @transform_0, window_bounds = array<i64: 32, 576>}, {transform_indices = @transform_1, window_bounds = array<i64: 576, 64>}, {transform_indices = @transform_2, window_bounds = array<i64: 1, 64>}, {transform_indices = @transform_3, window_bounds = array<i64: 32, 64>}]} {
    %c0 = arith.constant 0 : index
    %c0_0 = arith.constant 0 : index
    %0 = vector.load %arg2[%c0, %c0_0] : memref<32x576xf32, #tpu.memory_space<vmem>>, vector<32x576xf32>
    %c0_1 = arith.constant 0 : index
    %c0_2 = arith.constant 0 : index
    %1 = vector.load %arg3[%c0_1, %c0_2] : memref<576x64xf32, #tpu.memory_space<vmem>>, vector<576x64xf32>
    %cst = arith.constant dense<0.000000e+00> : vector<32x64xf32>
    %2 = tpu.matmul %0, %1, %cst {dimension_numbers = #tpu.dot_dimension_numbers<[1], [0], [0], [1], [0, 0, 1, 1], [], []>} : vector<32x576xf32>, vector<576x64xf32>, vector<32x64xf32> -> vector<32x64xf32>
    %c0_3 = arith.constant 0 : index
    %c0_4 = arith.constant 0 : index
    %3 = vector.load %arg4[%c0_3, %c0_4] : memref<1x64xf32, #tpu.memory_space<vmem>>, vector<1x64xf32>
    %4 = vector.broadcast %3 : vector<1x64xf32> to vector<32x64xf32>
    %5 = arith.addf %2, %4 : vector<32x64xf32>
    %cst_5 = arith.constant 0.000000e+00 : f32
    %6 = vector.broadcast %cst_5 : f32 to vector<32x64xf32>
    %7 = arith.maximumf %5, %6 : vector<32x64xf32>
    %c0_6 = arith.constant 0 : index
    %c0_7 = arith.constant 0 : index
    %8 = vector.load %arg5[%c0_6, %c0_7] : memref<32x64xf32, #tpu.memory_space<vmem>>, vector<32x64xf32>
    tpu.vector_store %arg5[%c0_6, %c0_7], %7 {strides = array<i32>} : memref<32x64xf32, #tpu.memory_space<vmem>>, vector<32x64xf32>,
    return
  }
  func.func @transform_0(%arg0: i32, %arg1: i32) -> (i32, i32) {
    %c0_i32 = arith.constant 0 : i32
    %c0_i32_0 = arith.constant 0 : i32
    return %arg0, %c0_i32 : i32, i32
  }
  func.func @transform_1(%arg0: i32, %arg1: i32) -> (i32, i32) {
    %c0_i32 = arith.constant 0 : i32
    %c0_i32_0 = arith.constant 0 : i32
    return %c0_i32, %arg1 : i32, i32
  }
  func.func @transform_2(%arg0: i32, %arg1: i32) -> (i32, i32) {
    %c0_i32 = arith.constant 0 : i32
    %c0_i32_0 = arith.constant 0 : i32
    return %c0_i32, %arg1 : i32, i32
  }
  func.func @transform_3(%arg0: i32, %arg1: i32) -> (i32, i32) {
    %c0_i32 = arith.constant 0 : i32
    return %arg0, %arg1 : i32, i32
  }
}

module attributes {stable_mosaic.version = 11 : i64} {
  func.func @_fused_tail_kernel(%arg0: i32, %arg1: memref<8x1024xf32, #tpu.memory_space<vmem>>, %arg2: memref<1024x512xf32, #tpu.memory_space<vmem>>, %arg3: memref<1x512xf32, #tpu.memory_space<vmem>>, %arg4: memref<8x8xf32, #tpu.memory_space<vmem>>, %arg5: memref<512x64xf32, #tpu.memory_space<vmem>>, %arg6: memref<8x64xf32, #tpu.memory_space<vmem>>, %arg7: memref<1x64xf32, #tpu.memory_space<vmem>>, %arg8: memref<8x64xf32, #tpu.memory_space<vmem>>) attributes {dimension_semantics = [#tpu.dimension_semantics<arbitrary>], iteration_bounds = array<i64: 1>, scalar_prefetch = 0 : i64, scratch_operands = 0 : i64, tpu.core_type = #tpu.core_type<tc>, window_params = [{pipeline_mode = #tpu.pipeline_mode<synchronous>, transform_indices = @transform_0, window_bounds = array<i64: 8, 1024>}, {pipeline_mode = #tpu.pipeline_mode<synchronous>, transform_indices = @transform_1, window_bounds = array<i64: 1024, 512>}, {pipeline_mode = #tpu.pipeline_mode<synchronous>, transform_indices = @transform_2, window_bounds = array<i64: 1, 512>}, {pipeline_mode = #tpu.pipeline_mode<synchronous>, transform_indices = @transform_3, window_bounds = array<i64: 8, 8>}, {pipeline_mode = #tpu.pipeline_mode<synchronous>, transform_indices = @transform_4, window_bounds = array<i64: 512, 64>}, {pipeline_mode = #tpu.pipeline_mode<synchronous>, transform_indices = @transform_5, window_bounds = array<i64: 8, 64>}, {pipeline_mode = #tpu.pipeline_mode<synchronous>, transform_indices = @transform_6, window_bounds = array<i64: 1, 64>}, {pipeline_mode = #tpu.pipeline_mode<synchronous>, transform_indices = @transform_7, window_bounds = array<i64: 8, 64>}]} {
    %c0 = arith.constant 0 : index
    %c0_0 = arith.constant 0 : index
    %0 = vector.load %arg1[%c0, %c0_0] : memref<8x1024xf32, #tpu.memory_space<vmem>>, vector<8x1024xf32>
    %c0_1 = arith.constant 0 : index
    %c0_2 = arith.constant 0 : index
    %1 = vector.load %arg2[%c0_1, %c0_2] : memref<1024x512xf32, #tpu.memory_space<vmem>>, vector<1024x512xf32>
    %cst = arith.constant dense<0.000000e+00> : vector<8x512xf32>
    %2 = tpu.matmul %0, %1, %cst {dimension_numbers = #tpu.dot_dimension_numbers<[1], [0], [0], [1], [0, 0, 1, 1], [], []>} : vector<8x1024xf32>, vector<1024x512xf32>, vector<8x512xf32> -> vector<8x512xf32>
    %c0_3 = arith.constant 0 : index
    %c0_4 = arith.constant 0 : index
    %3 = vector.load %arg3[%c0_3, %c0_4] : memref<1x512xf32, #tpu.memory_space<vmem>>, vector<1x512xf32>
    %4 = vector.broadcast %3 : vector<1x512xf32> to vector<8x512xf32>
    %5 = arith.addf %2, %4 : vector<8x512xf32>
    %cst_5 = arith.constant 0.000000e+00 : f32
    %6 = vector.broadcast %cst_5 : f32 to vector<8x512xf32>
    %7 = arith.maximumf %5, %6 : vector<8x512xf32>
    %c0_6 = arith.constant 0 : index
    %c0_7 = arith.constant 0 : index
    %8 = vector.load %arg5[%c0_6, %c0_7] : memref<512x64xf32, #tpu.memory_space<vmem>>, vector<512x64xf32>
    %cst_8 = arith.constant dense<0.000000e+00> : vector<8x64xf32>
    %9 = tpu.matmul %7, %8, %cst_8 {dimension_numbers = #tpu.dot_dimension_numbers<[1], [0], [0], [1], [0, 0, 1, 1], [], []>} : vector<8x512xf32>, vector<512x64xf32>, vector<8x64xf32> -> vector<8x64xf32>
    %c0_9 = arith.constant 0 : index
    %c0_10 = arith.constant 0 : index
    %10 = vector.load %arg4[%c0_9, %c0_10] : memref<8x8xf32, #tpu.memory_space<vmem>>, vector<8x8xf32>
    %c0_11 = arith.constant 0 : index
    %c0_12 = arith.constant 0 : index
    %11 = vector.load %arg6[%c0_11, %c0_12] : memref<8x64xf32, #tpu.memory_space<vmem>>, vector<8x64xf32>
    %cst_13 = arith.constant dense<0.000000e+00> : vector<8x64xf32>
    %12 = tpu.matmul %10, %11, %cst_13 {dimension_numbers = #tpu.dot_dimension_numbers<[1], [0], [0], [1], [0, 0, 1, 1], [], []>} : vector<8x8xf32>, vector<8x64xf32>, vector<8x64xf32> -> vector<8x64xf32>
    %13 = arith.addf %9, %12 : vector<8x64xf32>
    %c0_14 = arith.constant 0 : index
    %c0_15 = arith.constant 0 : index
    %14 = vector.load %arg7[%c0_14, %c0_15] : memref<1x64xf32, #tpu.memory_space<vmem>>, vector<1x64xf32>
    %15 = vector.broadcast %14 : vector<1x64xf32> to vector<8x64xf32>
    %16 = arith.addf %13, %15 : vector<8x64xf32>
    %c0_16 = arith.constant 0 : index
    %c0_17 = arith.constant 0 : index
    %17 = vector.load %arg8[%c0_16, %c0_17] : memref<8x64xf32, #tpu.memory_space<vmem>>, vector<8x64xf32>
    tpu.vector_store %arg8[%c0_16, %c0_17], %16 {strides = array<i32>} : memref<8x64xf32, #tpu.memory_space<vmem>>, vector<8x64xf32>,
    return
  }
  func.func @transform_0(%arg0: i32) -> (i32, i32) {
    %c0_i32 = arith.constant 0 : i32
    %c0_i32_0 = arith.constant 0 : i32
    %c0_i32_1 = arith.constant 0 : i32
    return %c0_i32, %c0_i32_0 : i32, i32
  }
  func.func @transform_1(%arg0: i32) -> (i32, i32) {
    %c0_i32 = arith.constant 0 : i32
    %c0_i32_0 = arith.constant 0 : i32
    %c0_i32_1 = arith.constant 0 : i32
    return %c0_i32, %c0_i32_0 : i32, i32
  }
  func.func @transform_2(%arg0: i32) -> (i32, i32) {
    %c0_i32 = arith.constant 0 : i32
    %c0_i32_0 = arith.constant 0 : i32
    %c0_i32_1 = arith.constant 0 : i32
    return %c0_i32, %c0_i32_0 : i32, i32
  }
  func.func @transform_3(%arg0: i32) -> (i32, i32) {
    %c0_i32 = arith.constant 0 : i32
    %c0_i32_0 = arith.constant 0 : i32
    %c0_i32_1 = arith.constant 0 : i32
    return %c0_i32, %c0_i32_0 : i32, i32
  }
  func.func @transform_4(%arg0: i32) -> (i32, i32) {
    %c0_i32 = arith.constant 0 : i32
    %c0_i32_0 = arith.constant 0 : i32
    %c0_i32_1 = arith.constant 0 : i32
    return %c0_i32, %c0_i32_0 : i32, i32
  }
  func.func @transform_5(%arg0: i32) -> (i32, i32) {
    %c0_i32 = arith.constant 0 : i32
    %c0_i32_0 = arith.constant 0 : i32
    %c0_i32_1 = arith.constant 0 : i32
    return %c0_i32, %c0_i32_0 : i32, i32
  }
  func.func @transform_6(%arg0: i32) -> (i32, i32) {
    %c0_i32 = arith.constant 0 : i32
    %c0_i32_0 = arith.constant 0 : i32
    %c0_i32_1 = arith.constant 0 : i32
    return %c0_i32, %c0_i32_0 : i32, i32
  }
  func.func @transform_7(%arg0: i32) -> (i32, i32) {
    %c0_i32 = arith.constant 0 : i32
    %c0_i32_0 = arith.constant 0 : i32
    %c0_i32_1 = arith.constant 0 : i32
    return %c0_i32, %c0_i32_0 : i32, i32
  }
}

</mosaic_0001>

<bundles_post_ra>
// kernel: _forward.4
= control target key start
LH: loop header
LB: loop body
LE: loop exit
PB: predicated region body
PF: predicated region fallthrough
CT: control target
= control target key end

     0   :  { %s770_s12 = smov 0   ;;  %s772_s13 = smov 0   ;;  %s1035_s0 = inlined_call_operand.vmem [shape: f32[512,192], index: 0, kind: input, shape index: {}]   ;;  %s1036_s1 = inlined_call_operand.vmem [shape: f32[192,32], index: 1, kind: input, shape index: {}]   ;;  %s1037_s2 = inlined_call_operand.vmem [shape: f32[1,32], index: 2, kind: input, shape index: {}]   ;;  %s1038_s3 = inlined_call_operand.vmem [shape: f32[512,32], index: 3, kind: output, shape index: {}]  }
   0x1   :  { %s774_s14 = smov 0  }
   0x2 LB: > { %s25_s15 = sadd.s32 1, %s743_s13  ;;  %p626_p0 = scmp.ge.s32.totalorder %s747_s14, 1  ;;  %s747_s14 = sphi %s774_s14, %s13_s14   ;;  %s743_s13 = sphi %s772_s13, %s1040_s13   ;;  %s739_s12 = sphi %s770_s12, %s1039_s12  }
   0x3   : > { %p27_p1 = scmp.ge.s32.totalorder %s25_s15, 4  ;;  %p170_p2 = scmp.lt.s32.totalorder %s747_s14, 5 }
   0x5   : > { %s1042_s15 = smov (%p27_p1, %s25_s15), 0  ;;  %p171_p3 = pnand %p626_p0, %p170_p2 }
   0x6   : > { %s627_s25 = sshll.u32 (!%p171_p3), %s739_s12, 4 }
   0x7   : > { %174 = sbr.rel (%p171_p3) target bundleno = 288 (0x120), region = 32  ;;  %p206_p4 = scmp.lt.s32.totalorder (!%p171_p3), %s627_s25, 63 }
   0xc   : > { %v275_v0 = vld [vmem:[%s1036_s1 + $0x78] sm:$0xff]  ;;  %v749_v1 = vmov 0.0   ;;  %v274_v2 = vld [vmem:[%s1036_s1 + $0x70] sm:$0xff]  ;;  %v273_v3 = vld [vmem:[%s1036_s1 + $0x68] sm:$0xff]  ;;  %s1044_s25 = smov (!%p206_p4, %s627_s25), 63  ;;  %vm291_vm0 = vcmask 523264  }
   0xd   : > { %340 = vmatprep.subr.mxu0 %v749_v1  ;;  %652 = vmatprep.subr.mxu1 %v749_v1  ;;  %v272_v4 = vld [vmem:[%s1036_s1 + $0x60] sm:$0xff]  ;;  %v271_v5 = vld [vmem:[%s1036_s1 + $0x58] sm:$0xff]  ;;  %v270_v6 = vld [vmem:[%s1036_s1 + $0x50] sm:$0xff]  ;;  %s651_s8 = sshll.u32 %s1044_s25, 4  ;;  %s631_s24 = sshll.u32 %s1044_s25, 3  ;;  %vm501_vm1 = vcmask 261120  }
   0xe   : > { %341 = vmatpush1.msra.mxu0 %v275_v0  ;;  %676 = vmatpush1.msra.mxu1 %v275_v0  ;;  %v269_v7 = vld [vmem:[%s1036_s1 + $0x48] sm:$0xff]  ;;  %v268_v8 = vld [vmem:[%s1036_s1 + $0x40] sm:$0xff]  ;;  %v267_v9 = vld [vmem:[%s1036_s1 + $0x38] sm:$0xff]  ;;  %s910_s19 = scalar_lea.vmem %s1035_s0, %s651_s8  ;;  %s978_s28 = scalar_lea.vmem %s1038_s3, %s631_s24 }
   0xf   : > { %342 = vmatprep.subr.mxu0 %v749_v1  ;;  %653 = vmatprep.subr.mxu1 %v749_v1  ;;  %v266_v10 = vld [vmem:[%s1036_s1 + $0x30] sm:$0xff]  ;;  %v265_v11 = vld [vmem:[%s1036_s1 + $0x28] sm:$0xff]  ;;  %v264_v12 = vld [vmem:[%s1036_s1 + $0x20] sm:$0xff] }
  0x10   : > { %343 = vmatpush1.msra.mxu0 %v274_v2  ;;  %677 = vmatpush1.msra.mxu1 %v274_v2  ;;  %v263_v13 = vld [vmem:[%s1036_s1 + $0x18] sm:$0xff]  ;;  %v262_v14 = vld [vmem:[%s1036_s1 + $0x10] sm:$0xff]  ;;  %v261_v15 = vld [vmem:[%s1036_s1 + $0x8] sm:$0xff] }
  0x11   : > { %344 = vmatprep.subr.mxu0 %v749_v1  ;;  %654 = vmatprep.subr.mxu1 %v749_v1  ;;  %v260_v16 = vld [vmem:[%s1036_s1] sm:$0xff]  ;;  %v283_v17 = vld [vmem:[%s1036_s1 + $0xb8] sm:$0xff]  ;;  %v282_v18 = vld [vmem:[%s1036_s1 + $0xb0] sm:$0xff] }
  0x12   : > { %345 = vmatpush1.msra.mxu0 %v273_v3  ;;  %678 = vmatpush1.msra.mxu1 %v273_v3  ;;  %v281_v19 = vld [vmem:[%s1036_s1 + $0xa8] sm:$0xff]  ;;  %v280_v20 = vld [vmem:[%s1036_s1 + $0xa0] sm:$0xff]  ;;  %v279_v21 = vld [vmem:[%s1036_s1 + $0x98] sm:$0xff] }
  0x13   : > { %346 = vmatprep.subr.mxu0 %v749_v1  ;;  %655 = vmatprep.subr.mxu1 %v749_v1  ;;  %v278_v22 = vld [vmem:[%s1036_s1 + $0x90] sm:$0xff]  ;;  %v277_v23 = vld [vmem:[%s1036_s1 + $0x88] sm:$0xff]  ;;  %v276_v24 = vld [vmem:[%s1036_s1 + $0x80] sm:$0xff] }
  0x14   : > { %347 = vmatpush1.msra.mxu0 %v272_v4  ;;  %679 = vmatpush1.msra.mxu1 %v272_v4  ;;  %v229_v25 = vld [vmem:[%s910_s19 + $0x8] sm:$0xff]  ;;  %v228_v27 = vld [vmem:[%s910_s19] sm:$0xff]  ;;  %v231_v29 = vld [vmem:[%s910_s19 + $0x18] sm:$0xff] }
  0x15   : > { %348 = vmatprep.subr.mxu0 %v749_v1  ;;  %656 = vmatprep.subr.mxu1 %v749_v1  ;;  %v245_v26 = vld [vmem:[%s910_s19 + $0x88] sm:$0xff]  ;;  %v244_v28 = vld [vmem:[%s910_s19 + $0x80] sm:$0xff]  ;;  %v247_v30 = vld [vmem:[%s910_s19 + $0x98] sm:$0xff] }
  0x16   : > { %349 = vmatpush1.msra.mxu0 %v271_v5  ;;  %680 = vmatpush1.msra.mxu1 %v271_v5  ;;  %v230_v31 = vld [vmem:[%s910_s19 + $0x10] sm:$0xff]  ;;  %v233_v33 = vld [vmem:[%s910_s19 + $0x28] sm:$0xff]  ;;  %v232_v35 = vld [vmem:[%s910_s19 + $0x20] sm:$0xff] }
  0x17   : > { %350 = vmatprep.subr.mxu0 %v749_v1  ;;  %657 = vmatprep.subr.mxu1 %v749_v1  ;;  %v246_v32 = vld [vmem:[%s910_s19 + $0x90] sm:$0xff]  ;;  %v249_v34 = vld [vmem:[%s910_s19 + $0xa8] sm:$0xff]  ;;  %v248_v36 = vld [vmem:[%s910_s19 + $0xa0] sm:$0xff] }
  0x18   : > { %351 = vmatpush1.msra.mxu0 %v270_v6  ;;  %681 = vmatpush1.msra.mxu1 %v270_v6  ;;  %v235_v37 = vld [vmem:[%s910_s19 + $0x38] sm:$0xff]  ;;  %v234_v39 = vld [vmem:[%s910_s19 + $0x30] sm:$0xff]  ;;  %v237_v41 = vld [vmem:[%s910_s19 + $0x48] sm:$0xff] }
  0x19   : > { %352 = vmatprep.subr.mxu0 %v749_v1  ;;  %658 = vmatprep.subr.mxu1 %v749_v1  ;;  %v251_v38 = vld [vmem:[%s910_s19 + $0xb8] sm:$0xff]  ;;  %v250_v40 = vld [vmem:[%s910_s19 + $0xb0] sm:$0xff]  ;;  %v253_v42 = vld [vmem:[%s910_s19 + $0xc8] sm:$0xff] }
  0x1a   : > { %353 = vmatpush1.msra.mxu0 %v269_v7  ;;  %682 = vmatpush1.msra.mxu1 %v269_v7  ;;  %v236_v43 = vld [vmem:[%s910_s19 + $0x40] sm:$0xff]  ;;  %v239_v45 = vld [vmem:[%s910_s19 + $0x58] sm:$0xff]  ;;  %v238_v47 = vld [vmem:[%s910_s19 + $0x50] sm:$0xff] }
  0x1b   : > { %354 = vmatprep.subr.mxu0 %v749_v1  ;;  %659 = vmatprep.subr.mxu1 %v749_v1  ;;  %v252_v44 = vld [vmem:[%s910_s19 + $0xc0] sm:$0xff]  ;;  %v255_v46 = vld [vmem:[%s910_s19 + $0xd8] sm:$0xff]  ;;  %v254_v48 = vld [vmem:[%s910_s19 + $0xd0] sm:$0xff] }
  0x1c   : > { %355 = vmatpush1.msra.mxu0 %v268_v8  ;;  %683 = vmatpush1.msra.mxu1 %v268_v8  ;;  %v241_v49 = vld [vmem:[%s910_s19 + $0x68] sm:$0xff]  ;;  %v240_v51 = vld [vmem:[%s910_s19 + $0x60] sm:$0xff]  ;;  %v243_v53 = vld [vmem:[%s910_s19 + $0x78] sm:$0xff] }
  0x1d   : > { %356 = vmatprep.subr.mxu0 %v749_v1  ;;  %660 = vmatprep.subr.mxu1 %v749_v1  ;;  %v257_v50 = vld [vmem:[%s910_s19 + $0xe8] sm:$0xff]  ;;  %v256_v52 = vld [vmem:[%s910_s19 + $0xe0] sm:$0xff]  ;;  %v259_v54 = vld [vmem:[%s910_s19 + $0xf8] sm:$0xff] }
  0x1e   : > { %357 = vmatpush1.msra.mxu0 %v267_v9  ;;  %684 = vmatpush1.msra.mxu1 %v267_v9  ;;  %v242_v55 = vld [vmem:[%s910_s19 + $0x70] sm:$0xff]  ;;  %v970_v57 = vld [vmem:[%s1037_s2] ss:$0 sm:$0xff] }
  0x1f   : > { %358 = vmatprep.subr.mxu0 %v749_v1  ;;  %661 = vmatprep.subr.mxu1 %v749_v1  ;;  %v258_v56 = vld [vmem:[%s910_s19 + $0xf0] sm:$0xff] }
  0x20   : > { %359 = vmatpush1.msra.mxu0 %v266_v10  ;;  %685 = vmatpush1.msra.mxu1 %v266_v10 }
  0x21   : > { %360 = vmatprep.subr.mxu0 %v749_v1  ;;  %662 = vmatprep.subr.mxu1 %v749_v1 }
  0x22   : > { %361 = vmatpush1.msra.mxu0 %v265_v11  ;;  %686 = vmatpush1.msra.mxu1 %v265_v11 }
  0x23   : > { %362 = vmatprep.subr.mxu0 %v749_v1  ;;  %663 = vmatprep.subr.mxu1 %v749_v1 }
  0x24   : > { %363 = vmatpush1.msra.mxu0 %v264_v12  ;;  %687 = vmatpush1.msra.mxu1 %v264_v12 }
  0x25   : > { %364 = vmatprep.subr.mxu0 %v749_v1  ;;  %664 = vmatprep.subr.mxu1 %v749_v1 }
  0x26   : > { %365 = vmatpush1.msra.mxu0 %v263_v13  ;;  %688 = vmatpush1.msra.mxu1 %v263_v13 }
  0x27   : > { %366 = vmatprep.subr.mxu0 %v749_v1  ;;  %665 = vmatprep.subr.mxu1 %v749_v1 }
  0x28   : > { %367 = vmatpush1.msra.mxu0 %v262_v14  ;;  %689 = vmatpush1.msra.mxu1 %v262_v14 }
  0x29   : > { %368 = vmatprep.subr.mxu0 %v749_v1  ;;  %666 = vmatprep.subr.mxu1 %v749_v1 }
  0x2a   : > { %369 = vmatpush1.msra.mxu0 %v261_v15  ;;  %690 = vmatpush1.msra.mxu1 %v261_v15 }
  0x2b   : > { %370 = vmatprep.subr.mxu0 %v749_v1  ;;  %667 = vmatprep.subr.mxu1 %v749_v1 }
  0x2c   : > { %371 = vmatpush1.msra.mxu0 %v260_v16  ;;  %691 = vmatpush1.msra.mxu1 %v260_v16 }
  0x2d   : > { %388 = vmatprep.subr.mxu0 %v749_v1  ;;  %668 = vmatprep.subr.mxu1 %v749_v1 }
  0x2e   : > { %389 = vmatpush2.msra.mxu0 %v283_v17  ;;  %692 = vmatpush2.msra.mxu1 %v283_v17 }
  0x2f   : > { %390 = vmatprep.subr.mxu0 %v749_v1  ;;  %669 = vmatprep.subr.mxu1 %v749_v1 }
  0x30   : > { %391 = vmatpush2.msra.mxu0 %v282_v18  ;;  %693 = vmatpush2.msra.mxu1 %v282_v18 }
  0x31   : > { %392 = vmatprep.subr.mxu0 %v749_v1  ;;  %670 = vmatprep.subr.mxu1 %v749_v1 }
  0x32   : > { %393 = vmatpush2.msra.mxu0 %v281_v19  ;;  %694 = vmatpush2.msra.mxu1 %v281_v19 }
  0x33   : > { %394 = vmatprep.subr.mxu0 %v749_v1  ;;  %671 = vmatprep.subr.mxu1 %v749_v1 }
  0x34   : > { %395 = vmatpush2.msra.mxu0 %v280_v20  ;;  %695 = vmatpush2.msra.mxu1 %v280_v20 }
  0x35   : > { %396 = vmatprep.subr.mxu0 %v749_v1  ;;  %672 = vmatprep.subr.mxu1 %v749_v1 }
  0x36   : > { %397 = vmatpush2.msra.mxu0 %v279_v21  ;;  %696 = vmatpush2.msra.mxu1 %v279_v21 }
  0x37   : > { %398 = vmatprep.subr.mxu0 %v749_v1  ;;  %673 = vmatprep.subr.mxu1 %v749_v1 }
  0x38   : > { %399 = vmatpush2.msra.mxu0 %v278_v22  ;;  %697 = vmatpush2.msra.mxu1 %v278_v22 }
  0x39   : > { %400 = vmatprep.subr.mxu0 %v749_v1  ;;  %674 = vmatprep.subr.mxu1 %v749_v1 }
  0x3a   : > { %401 = vmatpush2.msra.mxu0 %v277_v23  ;;  %698 = vmatpush2.msra.mxu1 %v277_v23 }
  0x3b   : > { %402 = vmatprep.subr.mxu0 %v749_v1  ;;  %675 = vmatprep.subr.mxu1 %v749_v1 }
  0x3c   : > { %403 = vmatpush2.msra.mxu0 %v276_v24  ;;  %699 = vmatpush2.msra.mxu1 %v276_v24 }
  0x3d   : > { %633 = vmatprep.mubr.msk.f32.mxu0 %vm291_vm0, %v229_v25  ;;  %641 = vmatprep.mubr.msk.f32.mxu1 %vm291_vm0, %v245_v26 }
  0x3e   : > { %405 = vmatmul.mubr.f32.vlgmr.msra.gmra.mxu0 %v228_v27  ;;  %445 = vmatmul.mubr.f32.vlgmr.msra.gmra.mxu1 %v244_v28 }
  0x3f   : > { %634 = vmatprep.mubr.msk.f32.mxu0 %vm291_vm0, %v231_v29  ;;  %642 = vmatprep.mubr.msk.f32.mxu1 %vm291_vm0, %v247_v30 }
  0x42   : > { %410 = vmatmul.mubr.f32.gmra.mxu0 %v230_v31  ;;  %450 = vmatmul.mubr.f32.gmra.mxu1 %v246_v32 }
  0x43   : > { %635 = vmatprep.mubr.msk.f32.mxu0 %vm291_vm0, %v233_v33  ;;  %643 = vmatprep.mubr.msk.f32.mxu1 %vm291_vm0, %v249_v34 }
  0x46   : > { %415 = vmatmul.mubr.f32.gmra.mxu0 %v232_v35  ;;  %455 = vmatmul.mubr.f32.gmra.mxu1 %v248_v36 }
  0x47   : > { %636 = vmatprep.mubr.msk.f32.mxu0 %vm291_vm0, %v235_v37  ;;  %644 = vmatprep.mubr.msk.f32.mxu1 %vm291_vm0, %v251_v38 }
  0x4a   : > { %420 = vmatmul.mubr.f32.gmra.mxu0 %v234_v39  ;;  %460 = vmatmul.mubr.f32.gmra.mxu1 %v250_v40 }
  0x4b   : > { %637 = vmatprep.mubr.msk.f32.mxu0 %vm291_vm0, %v237_v41  ;;  %645 = vmatprep.mubr.msk.f32.mxu1 %vm291_vm0, %v253_v42 }
  0x4e   : > { %425 = vmatmul.mubr.f32.gmra.mxu0 %v236_v43  ;;  %465 = vmatmul.mubr.f32.gmra.mxu1 %v252_v44 }
  0x4f   : > { %638 = vmatprep.mubr.msk.f32.mxu0 %vm291_vm0, %v239_v45  ;;  %646 = vmatprep.mubr.msk.f32.mxu1 %vm291_vm0, %v255_v46 }
  0x52   : > { %430 = vmatmul.mubr.f32.gmra.mxu0 %v238_v47  ;;  %470 = vmatmul.mubr.f32.gmra.mxu1 %v254_v48 }
  0x53   : > { %639 = vmatprep.mubr.msk.f32.mxu0 %vm291_vm0, %v241_v49  ;;  %647 = vmatprep.mubr.msk.f32.mxu1 %vm291_vm0, %v257_v50 }
  0x56   : > { %435 = vmatmul.mubr.f32.gmra.mxu0 %v240_v51  ;;  %475 = vmatmul.mubr.f32.gmra.mxu1 %v256_v52 }
  0x57   : > { %640 = vmatprep.mubr.msk.f32.mxu0 %vm291_vm0, %v243_v53  ;;  %648 = vmatprep.mubr.msk.f32.mxu1 %vm291_vm0, %v259_v54 }
  0x5a   : > { %440 = vmatmul.mubr.f32.gmra.mxu0 %v242_v55  ;;  %480 = vmatmul.mubr.f32.gmra.mxu1 %v258_v56 }
  0xfe   : > { %v406_v58 = vpop.f32.mrf.mxu0  ;;  %v446_v59 = vpop.f32.mrf.mxu1 }
  0xff   : > { %v407_v60 = vadd.f32 %v970_v57, %v406_v58  ;;  %v447_v61 = vadd.f32 %v970_v57, %v446_v59 }
 0x100   : > { %v408_v62 = vpop.f32.mrf.mxu0  ;;  %v448_v63 = vpop.f32.mrf.mxu1 }
 0x101   : > { %v485_v0 = vmax.f32 %v407_v60, 0.0  ;;  %v493_v1 = vmax.f32 %v447_v61, 0.0 }
 0x102   : > { %v411_v2 = vpop.f32.mrf.mxu0  ;;  %v451_v3 = vpop.f32.mrf.mxu1 }
 0x103   : > { %502 = vst.msk [vmem:[%s978_s28] sm:$0xff] %vm501_vm1, %v485_v0  ;;  %510 = vst.msk [vmem:[%s978_s28 + $0x40] sm:$0xff] %vm501_vm1, %v493_v1  ;;  %v412_v4 = vadd.f32 %v970_v57, %v411_v2  ;;  %v452_v5 = vadd.f32 %v970_v57, %v451_v3 }
 0x104   : > { %v413_v6 = vpop.f32.mrf.mxu0  ;;  %v453_v7 = vpop.f32.mrf.mxu1 }
 0x105   : > { %v486_v8 = vmax.f32 %v412_v4, 0.0  ;;  %v494_v9 = vmax.f32 %v452_v5, 0.0 }
 0x106   : > { %v416_v10 = vpop.f32.mrf.mxu0  ;;  %v456_v11 = vpop.f32.mrf.mxu1 }
 0x107   : > { %503 = vst.msk [vmem:[%s978_s28 + $0x8] sm:$0xff] %vm501_vm1, %v486_v8  ;;  %511 = vst.msk [vmem:[%s978_s28 + $0x48] sm:$0xff] %vm501_vm1, %v494_v9  ;;  %v417_v12 = vadd.f32 %v970_v57, %v416_v10  ;;  %v457_v13 = vadd.f32 %v970_v57, %v456_v11 }
 0x108   : > { %v418_v14 = vpop.f32.mrf.mxu0  ;;  %v458_v15 = vpop.f32.mrf.mxu1 }
 0x109   : > { %v487_v16 = vmax.f32 %v417_v12, 0.0  ;;  %v495_v17 = vmax.f32 %v457_v13, 0.0 }
 0x10a   : > { %v421_v18 = vpop.f32.mrf.mxu0  ;;  %v461_v19 = vpop.f32.mrf.mxu1 }
 0x10b   : > { %504 = vst.msk [vmem:[%s978_s28 + $0x10] sm:$0xff] %vm501_vm1, %v487_v16  ;;  %512 = vst.msk [vmem:[%s978_s28 + $0x50] sm:$0xff] %vm501_vm1, %v495_v17  ;;  %v422_v20 = vadd.f32 %v970_v57, %v421_v18  ;;  %v462_v21 = vadd.f32 %v970_v57, %v461_v19 }
 0x10c   : > { %v423_v22 = vpop.f32.mrf.mxu0  ;;  %v463_v23 = vpop.f32.mrf.mxu1 }
 0x10d   : > { %v488_v24 = vmax.f32 %v422_v20, 0.0  ;;  %v496_v25 = vmax.f32 %v462_v21, 0.0 }
 0x10e   : > { %v426_v26 = vpop.f32.mrf.mxu0  ;;  %v466_v27 = vpop.f32.mrf.mxu1 }
 0x10f   : > { %505 = vst.msk [vmem:[%s978_s28 + $0x18] sm:$0xff] %vm501_vm1, %v488_v24  ;;  %513 = vst.msk [vmem:[%s978_s28 + $0x58] sm:$0xff] %vm501_vm1, %v496_v25  ;;  %v427_v28 = vadd.f32 %v970_v57, %v426_v26  ;;  %v467_v29 = vadd.f32 %v970_v57, %v466_v27 }
 0x110   : > { %v428_v30 = vpop.f32.mrf.mxu0  ;;  %v468_v31 = vpop.f32.mrf.mxu1 }
 0x111   : > { %v489_v32 = vmax.f32 %v427_v28, 0.0  ;;  %v497_v33 = vmax.f32 %v467_v29, 0.0 }
 0x112   : > { %v431_v34 = vpop.f32.mrf.mxu0  ;;  %v471_v35 = vpop.f32.mrf.mxu1 }
 0x113   : > { %506 = vst.msk [vmem:[%s978_s28 + $0x20] sm:$0xff] %vm501_vm1, %v489_v32  ;;  %514 = vst.msk [vmem:[%s978_s28 + $0x60] sm:$0xff] %vm501_vm1, %v497_v33  ;;  %v432_v36 = vadd.f32 %v970_v57, %v431_v34  ;;  %v472_v37 = vadd.f32 %v970_v57, %v471_v35 }
 0x114   : > { %v433_v38 = vpop.f32.mrf.mxu0  ;;  %v473_v39 = vpop.f32.mrf.mxu1 }
 0x115   : > { %v490_v40 = vmax.f32 %v432_v36, 0.0  ;;  %v498_v41 = vmax.f32 %v472_v37, 0.0 }
 0x116   : > { %v436_v42 = vpop.f32.mrf.mxu0  ;;  %v476_v43 = vpop.f32.mrf.mxu1 }
 0x117   : > { %507 = vst.msk [vmem:[%s978_s28 + $0x28] sm:$0xff] %vm501_vm1, %v490_v40  ;;  %515 = vst.msk [vmem:[%s978_s28 + $0x68] sm:$0xff] %vm501_vm1, %v498_v41  ;;  %v437_v44 = vadd.f32 %v970_v57, %v436_v42  ;;  %v477_v45 = vadd.f32 %v970_v57, %v476_v43 }
 0x118   : > { %v438_v46 = vpop.f32.mrf.mxu0  ;;  %v478_v47 = vpop.f32.mrf.mxu1 }
 0x119   : > { %v491_v48 = vmax.f32 %v437_v44, 0.0  ;;  %v499_v49 = vmax.f32 %v477_v45, 0.0 }
 0x11a   : > { %v441_v50 = vpop.f32.mrf.mxu0  ;;  %v481_v51 = vpop.f32.mrf.mxu1 }
 0x11b   : > { %508 = vst.msk [vmem:[%s978_s28 + $0x30] sm:$0xff] %vm501_vm1, %v491_v48  ;;  %516 = vst.msk [vmem:[%s978_s28 + $0x70] sm:$0xff] %vm501_vm1, %v499_v49  ;;  %v442_v52 = vadd.f32 %v970_v57, %v441_v50  ;;  %v482_v53 = vadd.f32 %v970_v57, %v481_v51 }
 0x11c   : > { %v443_v54 = vpop.f32.mrf.mxu0  ;;  %v483_v55 = vpop.f32.mrf.mxu1 }
 0x11d   : > { %v492_v56 = vmax.f32 %v442_v52, 0.0  ;;  %v500_v58 = vmax.f32 %v482_v53, 0.0 }
 0x11f   : > { %509 = vst.msk [vmem:[%s978_s28 + $0x38] sm:$0xff] %vm501_vm1, %v492_v56  ;;  %517 = vst.msk [vmem:[%s978_s28 + $0x78] sm:$0xff] %vm501_vm1, %v500_v58 }
 0x120 PF: > { %s13_s14 = sadd.s32 1, %s747_s14   ;;  %s1039_s12 = smov %s743_s13 }
 0x121   : > { %p10_p5 = scmp.ge.s32.totalorder %s13_s14, 6   ;;  %s1040_s13 = smov %s1042_s15 }
 0x123   :  { %12 = sbr.rel (!%p10_p5) target bundleno = 2 (0x2), region = 68 }

// kernel: _forward.5
= control target key start
LH: loop header
LB: loop body
LE: loop exit
PB: predicated region body
PF: predicated region fallthrough
CT: control target
= control target key end

     0   :  { %vm350_vm0 = vcmask 523264   ;;  %s853_s1 = inlined_call_operand.vmem [shape: f32[512,64], index: 1, kind: input, shape index: {}]   ;;  %s854_s0 = inlined_call_operand.vmem [shape: f32[72,512], index: 0, kind: input, shape index: {}]   ;;  %s855_s2 = inlined_call_operand.vmem [shape: f32[1,64], index: 2, kind: input, shape index: {}]   ;;  %s856_s3 = inlined_call_operand.vmem [shape: f32[72,64], index: 3, kind: output, shape index: {}]  }
   0x1   :  { %v81_v0 = vld [vmem:[%s853_s1 + $0xf8] sm:$0xff]  ;;  %v80_v4 = vld [vmem:[%s853_s1 + $0xf0] sm:$0xff]  ;;  %v79_v8 = vld [vmem:[%s853_s1 + $0xe8] sm:$0xff] }
   0x2   :  { %v113_v1 = vld [vmem:[%s853_s1 + $0x1f8] sm:$0xff]  ;;  %365 = vmatprep.subr.mxu0 %v81_v0  ;;  %v112_v5 = vld [vmem:[%s853_s1 + $0x1f0] sm:$0xff]  ;;  %v111_v9 = vld [vmem:[%s853_s1 + $0x1e8] sm:$0xff] }
   0x3   :  { %v65_v2 = vld [vmem:[%s853_s1 + $0x78] sm:$0xff]  ;;  %424 = vmatprep.subr.mxu1 %v113_v1  ;;  %v64_v6 = vld [vmem:[%s853_s1 + $0x70] sm:$0xff]  ;;  %v63_v10 = vld [vmem:[%s853_s1 + $0x68] sm:$0xff] }
   0x4   :  { %v97_v3 = vld [vmem:[%s853_s1 + $0x178] sm:$0xff]  ;;  %366 = vmatpush3.msra.mxu0 %v65_v2  ;;  %v96_v7 = vld [vmem:[%s853_s1 + $0x170] sm:$0xff]  ;;  %v95_v11 = vld [vmem:[%s853_s1 + $0x168] sm:$0xff] }
   0x5   :  { %425 = vmatpush3.msra.mxu1 %v97_v3  ;;  %367 = vmatprep.subr.mxu0 %v80_v4  ;;  %v78_v12 = vld [vmem:[%s853_s1 + $0xe0] sm:$0xff]  ;;  %v77_v16 = vld [vmem:[%s853_s1 + $0xd8] sm:$0xff]  ;;  %v76_v20 = vld [vmem:[%s853_s1 + $0xd0] sm:$0xff] }
   0x6   :  { %426 = vmatprep.subr.mxu1 %v112_v5  ;;  %368 = vmatpush3.msra.mxu0 %v64_v6  ;;  %v110_v13 = vld [vmem:[%s853_s1 + $0x1e0] sm:$0xff]  ;;  %v109_v17 = vld [vmem:[%s853_s1 + $0x1d8] sm:$0xff]  ;;  %v108_v21 = vld [vmem:[%s853_s1 + $0x1d0] sm:$0xff] }
   0x7   :  { %427 = vmatpush3.msra.mxu1 %v96_v7  ;;  %369 = vmatprep.subr.mxu0 %v79_v8  ;;  %v62_v14 = vld [vmem:[%s853_s1 + $0x60] sm:$0xff]  ;;  %v61_v18 = vld [vmem:[%s853_s1 + $0x58] sm:$0xff]  ;;  %v60_v22 = vld [vmem:[%s853_s1 + $0x50] sm:$0xff] }
   0x8   :  { %428 = vmatprep.subr.mxu1 %v111_v9  ;;  %v94_v15 = vld [vmem:[%s853_s1 + $0x160] sm:$0xff]  ;;  %370 = vmatpush3.msra.mxu0 %v63_v10  ;;  %v93_v19 = vld [vmem:[%s853_s1 + $0x158] sm:$0xff]  ;;  %v92_v23 = vld [vmem:[%s853_s1 + $0x150] sm:$0xff] }
   0x9   :  { %429 = vmatpush3.msra.mxu1 %v95_v11  ;;  %371 = vmatprep.subr.mxu0 %v78_v12  ;;  %v75_v24 = vld [vmem:[%s853_s1 + $0xc8] sm:$0xff]  ;;  %v74_v28 = vld [vmem:[%s853_s1 + $0xc0] sm:$0xff]  ;;  %v73_v32 = vld [vmem:[%s853_s1 + $0xb8] sm:$0xff] }
   0xa   :  { %430 = vmatprep.subr.mxu1 %v110_v13  ;;  %372 = vmatpush3.msra.mxu0 %v62_v14  ;;  %v107_v25 = vld [vmem:[%s853_s1 + $0x1c8] sm:$0xff]  ;;  %v106_v29 = vld [vmem:[%s853_s1 + $0x1c0] sm:$0xff]  ;;  %v105_v33 = vld [vmem:[%s853_s1 + $0x1b8] sm:$0xff] }
   0xb   :  { %431 = vmatpush3.msra.mxu1 %v94_v15  ;;  %373 = vmatprep.subr.mxu0 %v77_v16  ;;  %v59_v26 = vld [vmem:[%s853_s1 + $0x48] sm:$0xff]  ;;  %v58_v30 = vld [vmem:[%s853_s1 + $0x40] sm:$0xff]  ;;  %v57_v34 = vld [vmem:[%s853_s1 + $0x38] sm:$0xff] }
   0xc   :  { %432 = vmatprep.subr.mxu1 %v109_v17  ;;  %374 = vmatpush3.msra.mxu0 %v61_v18  ;;  %v91_v27 = vld [vmem:[%s853_s1 + $0x148] sm:$0xff]  ;;  %v90_v31 = vld [vmem:[%s853_s1 + $0x140] sm:$0xff]  ;;  %v89_v35 = vld [vmem:[%s853_s1 + $0x138] sm:$0xff] }
   0xd   :  { %433 = vmatpush3.msra.mxu1 %v93_v19  ;;  %375 = vmatprep.subr.mxu0 %v76_v20  ;;  %v72_v36 = vld [vmem:[%s853_s1 + $0xb0] sm:$0xff]  ;;  %v71_v40 = vld [vmem:[%s853_s1 + $0xa8] sm:$0xff]  ;;  %v70_v44 = vld [vmem:[%s853_s1 + $0xa0] sm:$0xff] }
   0xe   :  { %434 = vmatprep.subr.mxu1 %v108_v21  ;;  %376 = vmatpush3.msra.mxu0 %v60_v22  ;;  %v104_v37 = vld [vmem:[%s853_s1 + $0x1b0] sm:$0xff]  ;;  %v103_v41 = vld [vmem:[%s853_s1 + $0x1a8] sm:$0xff]  ;;  %v102_v45 = vld [vmem:[%s853_s1 + $0x1a0] sm:$0xff] }
   0xf   :  { %435 = vmatpush3.msra.mxu1 %v92_v23  ;;  %377 = vmatprep.subr.mxu0 %v75_v24  ;;  %v56_v38 = vld [vmem:[%s853_s1 + $0x30] sm:$0xff]  ;;  %v55_v42 = vld [vmem:[%s853_s1 + $0x28] sm:$0xff]  ;;  %v54_v46 = vld [vmem:[%s853_s1 + $0x20] sm:$0xff] }
  0x10   :  { %436 = vmatprep.subr.mxu1 %v107_v25  ;;  %378 = vmatpush3.msra.mxu0 %v59_v26  ;;  %v88_v39 = vld [vmem:[%s853_s1 + $0x130] sm:$0xff]  ;;  %v87_v43 = vld [vmem:[%s853_s1 + $0x128] sm:$0xff]  ;;  %v86_v47 = vld [vmem:[%s853_s1 + $0x120] sm:$0xff] }
  0x11   :  { %437 = vmatpush3.msra.mxu1 %v91_v27  ;;  %379 = vmatprep.subr.mxu0 %v74_v28  ;;  %v69_v48 = vld [vmem:[%s853_s1 + $0x98] sm:$0xff]  ;;  %v68_v52 = vld [vmem:[%s853_s1 + $0x90] sm:$0xff]  ;;  %v67_v56 = vld [vmem:[%s853_s1 + $0x88] sm:$0xff] }
  0x12   :  { %438 = vmatprep.subr.mxu1 %v106_v29  ;;  %380 = vmatpush3.msra.mxu0 %v58_v30  ;;  %v101_v49 = vld [vmem:[%s853_s1 + $0x198] sm:$0xff]  ;;  %v100_v53 = vld [vmem:[%s853_s1 + $0x190] sm:$0xff]  ;;  %v99_v57 = vld [vmem:[%s853_s1 + $0x188] sm:$0xff] }
  0x13   :  { %439 = vmatpush3.msra.mxu1 %v90_v31  ;;  %381 = vmatprep.subr.mxu0 %v73_v32  ;;  %v53_v50 = vld [vmem:[%s853_s1 + $0x18] sm:$0xff]  ;;  %v52_v54 = vld [vmem:[%s853_s1 + $0x10] sm:$0xff]  ;;  %v51_v58 = vld [vmem:[%s853_s1 + $0x8] sm:$0xff] }
  0x14   :  { %440 = vmatprep.subr.mxu1 %v105_v33  ;;  %382 = vmatpush3.msra.mxu0 %v57_v34  ;;  %v85_v51 = vld [vmem:[%s853_s1 + $0x118] sm:$0xff]  ;;  %v84_v55 = vld [vmem:[%s853_s1 + $0x110] sm:$0xff]  ;;  %v83_v59 = vld [vmem:[%s853_s1 + $0x108] sm:$0xff] }
  0x15   :  { %441 = vmatpush3.msra.mxu1 %v89_v35  ;;  %383 = vmatprep.subr.mxu0 %v72_v36  ;;  %v66_v60 = vld [vmem:[%s853_s1 + $0x80] sm:$0xff]  ;;  %v15_v63 = vld [vmem:[%s854_s0 + $0x8] sm:$0xff]  ;;  %v17_v1 = vld [vmem:[%s854_s0 + $0x18] sm:$0xff] }
  0x16   :  { %442 = vmatprep.subr.mxu1 %v104_v37  ;;  %384 = vmatpush3.msra.mxu0 %v56_v38  ;;  %v98_v61 = vld [vmem:[%s853_s1 + $0x180] sm:$0xff]  ;;  %v16_v3 = vld [vmem:[%s854_s0 + $0x10] sm:$0xff]  ;;  %v19_v4 = vld [vmem:[%s854_s0 + $0x28] sm:$0xff] }
  0x17   :  { %443 = vmatpush3.msra.mxu1 %v88_v39  ;;  %385 = vmatprep.subr.mxu0 %v71_v40  ;;  %v50_v62 = vld [vmem:[%s853_s1] sm:$0xff]  ;;  %v21_v5 = vld [vmem:[%s854_s0 + $0x38] sm:$0xff]  ;;  %v20_v7 = vld [vmem:[%s854_s0 + $0x30] sm:$0xff] }
  0x18   :  { %444 = vmatprep.subr.mxu1 %v103_v41  ;;  %386 = vmatpush3.msra.mxu0 %v55_v42  ;;  %v82_v0 = vld [vmem:[%s853_s1 + $0x100] sm:$0xff]  ;;  %v23_v8 = vld [vmem:[%s854_s0 + $0x48] sm:$0xff]  ;;  %v25_v9 = vld [vmem:[%s854_s0 + $0x58] sm:$0xff] }
  0x19   :  { %445 = vmatpush3.msra.mxu1 %v87_v43  ;;  %387 = vmatprep.subr.mxu0 %v70_v44  ;;  %v14_v2 = vld [vmem:[%s854_s0] sm:$0xff]  ;;  %v24_v11 = vld [vmem:[%s854_s0 + $0x50] sm:$0xff]  ;;  %v27_v12 = vld [vmem:[%s854_s0 + $0x68] sm:$0xff] }
  0x1a   :  { %446 = vmatprep.subr.mxu1 %v102_v45  ;;  %388 = vmatpush3.msra.mxu0 %v54_v46  ;;  %v18_v6 = vld [vmem:[%s854_s0 + $0x20] sm:$0xff]  ;;  %v29_v13 = vld [vmem:[%s854_s0 + $0x78] sm:$0xff]  ;;  %v28_v15 = vld [vmem:[%s854_s0 + $0x70] sm:$0xff] }
  0x1b   :  { %447 = vmatpush3.msra.mxu1 %v86_v47  ;;  %389 = vmatprep.subr.mxu0 %v69_v48  ;;  %v22_v10 = vld [vmem:[%s854_s0 + $0x40] sm:$0xff]  ;;  %v31_v16 = vld [vmem:[%s854_s0 + $0x88] sm:$0xff]  ;;  %v33_v17 = vld [vmem:[%s854_s0 + $0x98] sm:$0xff] }
  0x1c   :  { %448 = vmatprep.subr.mxu1 %v101_v49  ;;  %390 = vmatpush3.msra.mxu0 %v53_v50  ;;  %v26_v14 = vld [vmem:[%s854_s0 + $0x60] sm:$0xff]  ;;  %v32_v19 = vld [vmem:[%s854_s0 + $0x90] sm:$0xff]  ;;  %v35_v20 = vld [vmem:[%s854_s0 + $0xa8] sm:$0xff] }
  0x1d   :  { %449 = vmatpush3.msra.mxu1 %v85_v51  ;;  %391 = vmatprep.subr.mxu0 %v68_v52  ;;  %v30_v18 = vld [vmem:[%s854_s0 + $0x80] sm:$0xff]  ;;  %v37_v21 = vld [vmem:[%s854_s0 + $0xb8] sm:$0xff]  ;;  %v36_v23 = vld [vmem:[%s854_s0 + $0xb0] sm:$0xff] }
  0x1e   :  { %450 = vmatprep.subr.mxu1 %v100_v53  ;;  %392 = vmatpush3.msra.mxu0 %v52_v54  ;;  %v34_v22 = vld [vmem:[%s854_s0 + $0xa0] sm:$0xff]  ;;  %v39_v24 = vld [vmem:[%s854_s0 + $0xc8] sm:$0xff]  ;;  %v41_v25 = vld [vmem:[%s854_s0 + $0xd8] sm:$0xff] }
  0x1f   :  { %451 = vmatpush3.msra.mxu1 %v84_v55  ;;  %393 = vmatprep.subr.mxu0 %v67_v56  ;;  %v38_v26 = vld [vmem:[%s854_s0 + $0xc0] sm:$0xff]  ;;  %v40_v27 = vld [vmem:[%s854_s0 + $0xd0] sm:$0xff]  ;;  %v43_v28 = vld [vmem:[%s854_s0 + $0xe8] sm:$0xff] }
  0x20   :  { %452 = vmatprep.subr.mxu1 %v99_v57  ;;  %394 = vmatpush3.msra.mxu0 %v51_v58  ;;  %v45_v29 = vld [vmem:[%s854_s0 + $0xf8] sm:$0xff]  ;;  %v42_v30 = vld [vmem:[%s854_s0 + $0xe0] sm:$0xff]  ;;  %v44_v31 = vld [vmem:[%s854_s0 + $0xf0] sm:$0xff] }
  0x21   :  { %453 = vmatpush3.msra.mxu1 %v83_v59  ;;  %395 = vmatprep.subr.mxu0 %v66_v60  ;;  %v47_v32 = vld [vmem:[%s854_s0 + $0x108] sm:$0xff]  ;;  %v49_v33 = vld [vmem:[%s854_s0 + $0x118] sm:$0xff]  ;;  %v46_v34 = vld [vmem:[%s854_s0 + $0x100] sm:$0xff] }
  0x22   :  { %454 = vmatprep.subr.mxu1 %v98_v61  ;;  %396 = vmatpush3.msra.mxu0 %v50_v62  ;;  %v48_v35 = vld [vmem:[%s854_s0 + $0x110] sm:$0xff]  ;;  %v806_v38 = vld [vmem:[%s855_s2] ss:$0 sm:$0xff] }
  0x23   :  { %185 = vmatprep.mubr.f32.mxu0 %v15_v63  ;;  %455 = vmatpush3.msra.mxu1 %v82_v0 }
  0x24   :  { %295 = vmatprep.mubr.f32.mxu1 %v17_v1  ;;  %186 = vmatmul.mubr.f32.vlgmr.msra.gmra.mxu0 %v14_v2 }
  0x25   :  { %296 = vmatmul.mubr.f32.vlgmr.msra.gmra.mxu1 %v16_v3  ;;  %190 = vmatprep.mubr.f32.mxu0 %v19_v4 }
  0x26   :  { %300 = vmatprep.mubr.f32.mxu1 %v21_v5 }
  0x28   :  { %191 = vmatmul.mubr.f32.gmra.mxu0 %v18_v6 }
  0x29   :  { %301 = vmatmul.mubr.f32.gmra.mxu1 %v20_v7  ;;  %195 = vmatprep.mubr.f32.mxu0 %v23_v8 }
  0x2a   :  { %305 = vmatprep.mubr.f32.mxu1 %v25_v9 }
  0x2c   :  { %196 = vmatmul.mubr.f32.gmra.mxu0 %v22_v10 }
  0x2d   :  { %306 = vmatmul.mubr.f32.gmra.mxu1 %v24_v11  ;;  %200 = vmatprep.mubr.f32.mxu0 %v27_v12 }
  0x2e   :  { %310 = vmatprep.mubr.f32.mxu1 %v29_v13 }
  0x30   :  { %201 = vmatmul.mubr.f32.gmra.mxu0 %v26_v14 }
  0x31   :  { %311 = vmatmul.mubr.f32.gmra.mxu1 %v28_v15  ;;  %205 = vmatprep.mubr.f32.mxu0 %v31_v16 }
  0x32   :  { %315 = vmatprep.mubr.f32.mxu1 %v33_v17 }
  0x34   :  { %206 = vmatmul.mubr.f32.gmra.mxu0 %v30_v18 }
  0x35   :  { %316 = vmatmul.mubr.f32.gmra.mxu1 %v32_v19  ;;  %210 = vmatprep.mubr.f32.mxu0 %v35_v20 }
  0x36   :  { %320 = vmatprep.mubr.f32.mxu1 %v37_v21 }
  0x38   :  { %211 = vmatmul.mubr.f32.gmra.mxu0 %v34_v22 }
  0x39   :  { %321 = vmatmul.mubr.f32.gmra.mxu1 %v36_v23  ;;  %215 = vmatprep.mubr.f32.mxu0 %v39_v24 }
  0x3a   :  { %325 = vmatprep.mubr.f32.mxu1 %v41_v25 }
  0x3c   :  { %216 = vmatmul.mubr.f32.gmra.mxu0 %v38_v26 }
  0x3d   :  { %326 = vmatmul.mubr.f32.gmra.mxu1 %v40_v27  ;;  %220 = vmatprep.mubr.f32.mxu0 %v43_v28 }
  0x3e   :  { %330 = vmatprep.mubr.f32.mxu1 %v45_v29 }
  0x40   :  { %221 = vmatmul.mubr.f32.gmra.mxu0 %v42_v30 }
  0x41   :  { %331 = vmatmul.mubr.f32.gmra.mxu1 %v44_v31  ;;  %225 = vmatprep.mubr.f32.mxu0 %v47_v32 }
  0x42   :  { %335 = vmatprep.mubr.f32.mxu1 %v49_v33 }
  0x44   :  { %226 = vmatmul.mubr.f32.gmra.mxu0 %v46_v34 }
  0x45   :  { %336 = vmatmul.mubr.f32.gmra.mxu1 %v48_v35 }
  0xe4   :  { %v397_v36 = vpop.f32.mrf.mxu0 }
  0xe5   :  { %v456_v37 = vpop.f32.mrf.mxu1 }
  0xe6   :  { %v398_v39 = vpop.f32.mrf.mxu0 }
  0xe7   :  { %v457_v40 = vpop.f32.mrf.mxu1  ;;  %v399_v41 = vadd.f32 %v398_v39, %v397_v36 }
  0xe8   :  { %v400_v42 = vpop.f32.mrf.mxu0  ;;  %v458_v45 = vadd.f32 %v457_v40, %v456_v37 }
  0xe9   :  { %v459_v43 = vpop.f32.mrf.mxu1  ;;  %v188_v44 = vadd.f32 %v399_v41, %v806_v38 }
  0xea   :  { %v401_v46 = vpop.f32.mrf.mxu0 }
  0xeb   :  { %v460_v47 = vpop.f32.mrf.mxu1  ;;  %v298_v48 = vadd.f32 %v458_v45, %v188_v44  ;;  %v402_v49 = vadd.f32 %v401_v46, %v400_v42 }
  0xec   :  { %v403_v50 = vpop.f32.mrf.mxu0  ;;  %v461_v54 = vadd.f32 %v460_v47, %v459_v43 }
  0xed   :  { %v462_v51 = vpop.f32.mrf.mxu1  ;;  %v341_v52 = vmax.f32 %v298_v48, 0.0  ;;  %v193_v53 = vadd.f32 %v402_v49, %v806_v38 }
  0xee   :  { %v404_v55 = vpop.f32.mrf.mxu0 }
  0xef   :  { %v463_v56 = vpop.f32.mrf.mxu1  ;;  %351 = vst.msk [vmem:[%s856_s3] sm:$0xff] %vm350_vm0, %v341_v52  ;;  %v303_v57 = vadd.f32 %v461_v54, %v193_v53  ;;  %v405_v58 = vadd.f32 %v404_v55, %v403_v50 }
  0xf0   :  { %v406_v59 = vpop.f32.mrf.mxu0  ;;  %v464_v63 = vadd.f32 %v463_v56, %v462_v51 }
  0xf1   :  { %v465_v60 = vpop.f32.mrf.mxu1  ;;  %v342_v61 = vmax.f32 %v303_v57, 0.0  ;;  %v198_v62 = vadd.f32 %v405_v58, %v806_v38 }
  0xf2   :  { %v407_v0 = vpop.f32.mrf.mxu0 }
  0xf3   :  { %v466_v1 = vpop.f32.mrf.mxu1  ;;  %352 = vst.msk [vmem:[%s856_s3 + $0x8] sm:$0xff] %vm350_vm0, %v342_v61  ;;  %v308_v2 = vadd.f32 %v464_v63, %v198_v62  ;;  %v408_v3 = vadd.f32 %v407_v0, %v406_v59 }
  0xf4   :  { %v409_v4 = vpop.f32.mrf.mxu0  ;;  %v467_v8 = vadd.f32 %v466_v1, %v465_v60 }
  0xf5   :  { %v468_v5 = vpop.f32.mrf.mxu1  ;;  %v343_v6 = vmax.f32 %v308_v2, 0.0  ;;  %v203_v7 = vadd.f32 %v408_v3, %v806_v38 }
  0xf6   :  { %v410_v9 = vpop.f32.mrf.mxu0 }
  0xf7   :  { %v469_v10 = vpop.f32.mrf.mxu1  ;;  %353 = vst.msk [vmem:[%s856_s3 + $0x10] sm:$0xff] %vm350_vm0, %v343_v6  ;;  %v313_v11 = vadd.f32 %v467_v8, %v203_v7  ;;  %v411_v12 = vadd.f32 %v410_v9, %v409_v4 }
  0xf8   :  { %v412_v13 = vpop.f32.mrf.mxu0  ;;  %v470_v17 = vadd.f32 %v469_v10, %v468_v5 }
  0xf9   :  { %v471_v14 = vpop.f32.mrf.mxu1  ;;  %v344_v15 = vmax.f32 %v313_v11, 0.0  ;;  %v208_v16 = vadd.f32 %v411_v12, %v806_v38 }
  0xfa   :  { %v413_v18 = vpop.f32.mrf.mxu0 }
  0xfb   :  { %v472_v19 = vpop.f32.mrf.mxu1  ;;  %354 = vst.msk [vmem:[%s856_s3 + $0x18] sm:$0xff] %vm350_vm0, %v344_v15  ;;  %v318_v20 = vadd.f32 %v470_v17, %v208_v16  ;;  %v414_v21 = vadd.f32 %v413_v18, %v412_v13 }
  0xfc   :  { %v415_v22 = vpop.f32.mrf.mxu0  ;;  %v473_v26 = vadd.f32 %v472_v19, %v471_v14 }
  0xfd   :  { %v474_v23 = vpop.f32.mrf.mxu1  ;;  %v345_v24 = vmax.f32 %v318_v20, 0.0  ;;  %v213_v25 = vadd.f32 %v414_v21, %v806_v38 }
  0xfe   :  { %v416_v27 = vpop.f32.mrf.mxu0 }
  0xff   :  { %v475_v28 = vpop.f32.mrf.mxu1  ;;  %355 = vst.msk [vmem:[%s856_s3 + $0x20] sm:$0xff] %vm350_vm0, %v345_v24  ;;  %v323_v29 = vadd.f32 %v473_v26, %v213_v25  ;;  %v417_v30 = vadd.f32 %v416_v27, %v415_v22 }
 0x100   :  { %v418_v31 = vpop.f32.mrf.mxu0  ;;  %v476_v35 = vadd.f32 %v475_v28, %v474_v23 }
 0x101   :  { %v477_v32 = vpop.f32.mrf.mxu1  ;;  %v346_v33 = vmax.f32 %v323_v29, 0.0  ;;  %v218_v34 = vadd.f32 %v417_v30, %v806_v38 }
 0x102   :  { %v419_v36 = vpop.f32.mrf.mxu0 }
 0x103   :  { %v478_v37 = vpop.f32.mrf.mxu1  ;;  %356 = vst.msk [vmem:[%s856_s3 + $0x28] sm:$0xff] %vm350_vm0, %v346_v33  ;;  %v328_v39 = vadd.f32 %v476_v35, %v218_v34  ;;  %v420_v40 = vadd.f32 %v419_v36, %v418_v31 }
 0x104   :  { %v421_v41 = vpop.f32.mrf.mxu0  ;;  %v479_v45 = vadd.f32 %v478_v37, %v477_v32 }
 0x105   :  { %v480_v42 = vpop.f32.mrf.mxu1  ;;  %v347_v43 = vmax.f32 %v328_v39, 0.0  ;;  %v223_v44 = vadd.f32 %v420_v40, %v806_v38 }
 0x106   :  { %v422_v46 = vpop.f32.mrf.mxu0 }
 0x107   :  { %v481_v47 = vpop.f32.mrf.mxu1  ;;  %357 = vst.msk [vmem:[%s856_s3 + $0x30] sm:$0xff] %vm350_vm0, %v347_v43  ;;  %v333_v48 = vadd.f32 %v479_v45, %v223_v44  ;;  %v423_v49 = vadd.f32 %v422_v46, %v421_v41 }
 0x108   :  { %v482_v52 = vadd.f32 %v481_v47, %v480_v42 }
 0x109   :  { %v348_v50 = vmax.f32 %v333_v48, 0.0  ;;  %v228_v51 = vadd.f32 %v423_v49, %v806_v38 }
 0x10b   :  { %358 = vst.msk [vmem:[%s856_s3 + $0x38] sm:$0xff] %vm350_vm0, %v348_v50  ;;  %v338_v53 = vadd.f32 %v482_v52, %v228_v51 }
 0x10d   :  { %v349_v54 = vmax.f32 %v338_v53, 0.0 }
 0x10f   :  { %359 = vst.msk [vmem:[%s856_s3 + $0x40] sm:$0xff] %vm350_vm0, %v349_v54 }

// kernel: _forward.6
= control target key start
LH: loop header
LB: loop body
LE: loop exit
PB: predicated region body
PF: predicated region fallthrough
CT: control target
= control target key end

     0   :  { %vm113_vm0 = vcmask 523264   ;;  %s855_s1 = inlined_call_operand.vmem [shape: f32[576,64], index: 1, kind: input, shape index: {}]   ;;  %s856_s0 = inlined_call_operand.vmem [shape: f32[32,576], index: 0, kind: input, shape index: {}]   ;;  %s857_s2 = inlined_call_operand.vmem [shape: f32[1,64], index: 2, kind: input, shape index: {}]   ;;  %s858_s3 = inlined_call_operand.vmem [shape: f32[32,64], index: 3, kind: output, shape index: {}]  }
   0x1   :  { %v65_v0 = vld [vmem:[%s855_s1 + $0xf8] sm:$0xff]  ;;  %v64_v4 = vld [vmem:[%s855_s1 + $0xf0] sm:$0xff]  ;;  %v63_v8 = vld [vmem:[%s855_s1 + $0xe8] sm:$0xff] }
   0x2   :  { %v97_v1 = vld [vmem:[%s855_s1 + $0x1f8] sm:$0xff]  ;;  %398 = vmatprep.subr.mxu0 %v65_v0  ;;  %v96_v5 = vld [vmem:[%s855_s1 + $0x1f0] sm:$0xff]  ;;  %v95_v9 = vld [vmem:[%s855_s1 + $0x1e8] sm:$0xff] }
   0x3   :  { %v49_v2 = vld [vmem:[%s855_s1 + $0x78] sm:$0xff]  ;;  %442 = vmatprep.subr.mxu1 %v97_v1  ;;  %v48_v6 = vld [vmem:[%s855_s1 + $0x70] sm:$0xff]  ;;  %v47_v10 = vld [vmem:[%s855_s1 + $0x68] sm:$0xff] }
   0x4   :  { %v81_v3 = vld [vmem:[%s855_s1 + $0x178] sm:$0xff]  ;;  %399 = vmatpush3.msra.mxu0 %v49_v2  ;;  %v80_v7 = vld [vmem:[%s855_s1 + $0x170] sm:$0xff]  ;;  %v79_v11 = vld [vmem:[%s855_s1 + $0x168] sm:$0xff] }
   0x5   :  { %443 = vmatpush3.msra.mxu1 %v81_v3  ;;  %400 = vmatprep.subr.mxu0 %v64_v4  ;;  %v62_v12 = vld [vmem:[%s855_s1 + $0xe0] sm:$0xff]  ;;  %v61_v16 = vld [vmem:[%s855_s1 + $0xd8] sm:$0xff]  ;;  %v60_v20 = vld [vmem:[%s855_s1 + $0xd0] sm:$0xff] }
   0x6   :  { %444 = vmatprep.subr.mxu1 %v96_v5  ;;  %401 = vmatpush3.msra.mxu0 %v48_v6  ;;  %v94_v13 = vld [vmem:[%s855_s1 + $0x1e0] sm:$0xff]  ;;  %v93_v17 = vld [vmem:[%s855_s1 + $0x1d8] sm:$0xff]  ;;  %v92_v21 = vld [vmem:[%s855_s1 + $0x1d0] sm:$0xff] }
   0x7   :  { %445 = vmatpush3.msra.mxu1 %v80_v7  ;;  %402 = vmatprep.subr.mxu0 %v63_v8  ;;  %v46_v14 = vld [vmem:[%s855_s1 + $0x60] sm:$0xff]  ;;  %v45_v18 = vld [vmem:[%s855_s1 + $0x58] sm:$0xff]  ;;  %v44_v22 = vld [vmem:[%s855_s1 + $0x50] sm:$0xff] }
   0x8   :  { %446 = vmatprep.subr.mxu1 %v95_v9  ;;  %v78_v15 = vld [vmem:[%s855_s1 + $0x160] sm:$0xff]  ;;  %403 = vmatpush3.msra.mxu0 %v47_v10  ;;  %v77_v19 = vld [vmem:[%s855_s1 + $0x158] sm:$0xff]  ;;  %v76_v23 = vld [vmem:[%s855_s1 + $0x150] sm:$0xff] }
   0x9   :  { %447 = vmatpush3.msra.mxu1 %v79_v11  ;;  %404 = vmatprep.subr.mxu0 %v62_v12  ;;  %v59_v24 = vld [vmem:[%s855_s1 + $0xc8] sm:$0xff]  ;;  %v58_v28 = vld [vmem:[%s855_s1 + $0xc0] sm:$0xff]  ;;  %v57_v32 = vld [vmem:[%s855_s1 + $0xb8] sm:$0xff] }
   0xa   :  { %448 = vmatprep.subr.mxu1 %v94_v13  ;;  %405 = vmatpush3.msra.mxu0 %v46_v14  ;;  %v91_v25 = vld [vmem:[%s855_s1 + $0x1c8] sm:$0xff]  ;;  %v90_v29 = vld [vmem:[%s855_s1 + $0x1c0] sm:$0xff]  ;;  %v89_v33 = vld [vmem:[%s855_s1 + $0x1b8] sm:$0xff] }
   0xb   :  { %449 = vmatpush3.msra.mxu1 %v78_v15  ;;  %406 = vmatprep.subr.mxu0 %v61_v16  ;;  %v43_v26 = vld [vmem:[%s855_s1 + $0x48] sm:$0xff]  ;;  %v42_v30 = vld [vmem:[%s855_s1 + $0x40] sm:$0xff]  ;;  %v41_v34 = vld [vmem:[%s855_s1 + $0x38] sm:$0xff] }
   0xc   :  { %450 = vmatprep.subr.mxu1 %v93_v17  ;;  %407 = vmatpush3.msra.mxu0 %v45_v18  ;;  %v75_v27 = vld [vmem:[%s855_s1 + $0x148] sm:$0xff]  ;;  %v74_v31 = vld [vmem:[%s855_s1 + $0x140] sm:$0xff]  ;;  %v73_v35 = vld [vmem:[%s855_s1 + $0x138] sm:$0xff] }
   0xd   :  { %451 = vmatpush3.msra.mxu1 %v77_v19  ;;  %408 = vmatprep.subr.mxu0 %v60_v20  ;;  %v56_v36 = vld [vmem:[%s855_s1 + $0xb0] sm:$0xff]  ;;  %v55_v40 = vld [vmem:[%s855_s1 + $0xa8] sm:$0xff]  ;;  %v54_v44 = vld [vmem:[%s855_s1 + $0xa0] sm:$0xff] }
   0xe   :  { %452 = vmatprep.subr.mxu1 %v92_v21  ;;  %409 = vmatpush3.msra.mxu0 %v44_v22  ;;  %v88_v37 = vld [vmem:[%s855_s1 + $0x1b0] sm:$0xff]  ;;  %v87_v41 = vld [vmem:[%s855_s1 + $0x1a8] sm:$0xff]  ;;  %v86_v45 = vld [vmem:[%s855_s1 + $0x1a0] sm:$0xff] }
   0xf   :  { %453 = vmatpush3.msra.mxu1 %v76_v23  ;;  %410 = vmatprep.subr.mxu0 %v59_v24  ;;  %v40_v38 = vld [vmem:[%s855_s1 + $0x30] sm:$0xff]  ;;  %v39_v42 = vld [vmem:[%s855_s1 + $0x28] sm:$0xff]  ;;  %v38_v46 = vld [vmem:[%s855_s1 + $0x20] sm:$0xff] }
  0x10   :  { %454 = vmatprep.subr.mxu1 %v91_v25  ;;  %411 = vmatpush3.msra.mxu0 %v43_v26  ;;  %v72_v39 = vld [vmem:[%s855_s1 + $0x130] sm:$0xff]  ;;  %v71_v43 = vld [vmem:[%s855_s1 + $0x128] sm:$0xff]  ;;  %v70_v47 = vld [vmem:[%s855_s1 + $0x120] sm:$0xff] }
  0x11   :  { %455 = vmatpush3.msra.mxu1 %v75_v27  ;;  %412 = vmatprep.subr.mxu0 %v58_v28  ;;  %v53_v48 = vld [vmem:[%s855_s1 + $0x98] sm:$0xff]  ;;  %v52_v52 = vld [vmem:[%s855_s1 + $0x90] sm:$0xff]  ;;  %v51_v56 = vld [vmem:[%s855_s1 + $0x88] sm:$0xff] }
  0x12   :  { %456 = vmatprep.subr.mxu1 %v90_v29  ;;  %413 = vmatpush3.msra.mxu0 %v42_v30  ;;  %v85_v49 = vld [vmem:[%s855_s1 + $0x198] sm:$0xff]  ;;  %v84_v53 = vld [vmem:[%s855_s1 + $0x190] sm:$0xff]  ;;  %v83_v57 = vld [vmem:[%s855_s1 + $0x188] sm:$0xff] }
  0x13   :  { %457 = vmatpush3.msra.mxu1 %v74_v31  ;;  %414 = vmatprep.subr.mxu0 %v57_v32  ;;  %v37_v50 = vld [vmem:[%s855_s1 + $0x18] sm:$0xff]  ;;  %v36_v54 = vld [vmem:[%s855_s1 + $0x10] sm:$0xff]  ;;  %v35_v58 = vld [vmem:[%s855_s1 + $0x8] sm:$0xff] }
  0x14   :  { %458 = vmatprep.subr.mxu1 %v89_v33  ;;  %415 = vmatpush3.msra.mxu0 %v41_v34  ;;  %v69_v51 = vld [vmem:[%s855_s1 + $0x118] sm:$0xff]  ;;  %v68_v55 = vld [vmem:[%s855_s1 + $0x110] sm:$0xff]  ;;  %v67_v59 = vld [vmem:[%s855_s1 + $0x108] sm:$0xff] }
  0x15   :  { %459 = vmatpush3.msra.mxu1 %v73_v35  ;;  %416 = vmatprep.subr.mxu0 %v56_v36  ;;  %v50_v60 = vld [vmem:[%s855_s1 + $0x80] sm:$0xff]  ;;  %v15_v63 = vld [vmem:[%s856_s0 + $0x8] sm:$0xff]  ;;  %v17_v1 = vld [vmem:[%s856_s0 + $0x18] sm:$0xff] }
  0x16   :  { %460 = vmatprep.subr.mxu1 %v88_v37  ;;  %417 = vmatpush3.msra.mxu0 %v40_v38  ;;  %v82_v61 = vld [vmem:[%s855_s1 + $0x180] sm:$0xff]  ;;  %v16_v3 = vld [vmem:[%s856_s0 + $0x10] sm:$0xff]  ;;  %v105_v4 = vld [vmem:[%s855_s1 + $0x238] sm:$0xff] }
  0x17   :  { %461 = vmatpush3.msra.mxu1 %v72_v39  ;;  %418 = vmatprep.subr.mxu0 %v55_v40  ;;  %v34_v62 = vld [vmem:[%s855_s1] sm:$0xff]  ;;  %v104_v5 = vld [vmem:[%s855_s1 + $0x230] sm:$0xff]  ;;  %v19_v8 = vld [vmem:[%s856_s0 + $0x28] sm:$0xff] }
  0x18   :  { %462 = vmatprep.subr.mxu1 %v87_v41  ;;  %419 = vmatpush3.msra.mxu0 %v39_v42  ;;  %v66_v0 = vld [vmem:[%s855_s1 + $0x100] sm:$0xff]  ;;  %v20_v6 = vld [vmem:[%s856_s0 + $0x30] sm:$0xff]  ;;  %v21_v9 = vld [vmem:[%s856_s0 + $0x38] sm:$0xff] }
  0x19   :  { %463 = vmatpush3.msra.mxu1 %v71_v43  ;;  %420 = vmatprep.subr.mxu0 %v54_v44  ;;  %v14_v2 = vld [vmem:[%s856_s0] sm:$0xff]  ;;  %v103_v10 = vld [vmem:[%s855_s1 + $0x228] sm:$0xff]  ;;  %v25_v12 = vld [vmem:[%s856_s0 + $0x58] sm:$0xff] }
  0x1a   :  { %464 = vmatprep.subr.mxu1 %v86_v45  ;;  %421 = vmatpush3.msra.mxu0 %v38_v46  ;;  %v22_v7 = vld [vmem:[%s856_s0 + $0x40] sm:$0xff]  ;;  %v27_v13 = vld [vmem:[%s856_s0 + $0x68] sm:$0xff]  ;;  %v24_v14 = vld [vmem:[%s856_s0 + $0x50] sm:$0xff] }
  0x1b   :  { %465 = vmatpush3.msra.mxu1 %v70_v47  ;;  %422 = vmatprep.subr.mxu0 %v53_v48  ;;  %v102_v11 = vld [vmem:[%s855_s1 + $0x220] sm:$0xff]  ;;  %v101_v16 = vld [vmem:[%s855_s1 + $0x218] sm:$0xff]  ;;  %v100_v17 = vld [vmem:[%s855_s1 + $0x210] sm:$0xff] }
  0x1c   :  { %466 = vmatprep.subr.mxu1 %v85_v49  ;;  %423 = vmatpush3.msra.mxu0 %v37_v50  ;;  %v26_v15 = vld [vmem:[%s856_s0 + $0x60] sm:$0xff]  ;;  %v32_v19 = vld [vmem:[%s856_s0 + $0x90] sm:$0xff]  ;;  %v29_v20 = vld [vmem:[%s856_s0 + $0x78] sm:$0xff] }
  0x1d   :  { %467 = vmatpush3.msra.mxu1 %v69_v51  ;;  %424 = vmatprep.subr.mxu0 %v52_v52  ;;  %v30_v18 = vld [vmem:[%s856_s0 + $0x80] sm:$0xff]  ;;  %v31_v21 = vld [vmem:[%s856_s0 + $0x88] sm:$0xff]  ;;  %v28_v25 = vld [vmem:[%s856_s0 + $0x70] sm:$0xff] }
  0x1e   :  { %468 = vmatprep.subr.mxu1 %v84_v53  ;;  %425 = vmatpush3.msra.mxu0 %v36_v54  ;;  %v99_v22 = vld [vmem:[%s855_s1 + $0x208] sm:$0xff]  ;;  %v98_v23 = vld [vmem:[%s855_s1 + $0x200] sm:$0xff]  ;;  %v33_v27 = vld [vmem:[%s856_s0 + $0x98] sm:$0xff] }
  0x1f   :  { %469 = vmatpush3.msra.mxu1 %v68_v55  ;;  %426 = vmatprep.subr.mxu0 %v51_v56  ;;  %v18_v24 = vld [vmem:[%s856_s0 + $0x20] sm:$0xff]  ;;  %v23_v26 = vld [vmem:[%s856_s0 + $0x48] sm:$0xff] }
  0x20   :  { %470 = vmatprep.subr.mxu1 %v83_v57  ;;  %427 = vmatpush3.msra.mxu0 %v35_v58  ;;  %v393_v43 = vld [vmem:[%s857_s2] ss:$0 sm:$0xff] }
  0x21   :  { %471 = vmatpush3.msra.mxu1 %v67_v59  ;;  %428 = vmatprep.subr.mxu0 %v50_v60 }
  0x22   :  { %472 = vmatprep.subr.mxu1 %v82_v61  ;;  %429 = vmatpush3.msra.mxu0 %v34_v62 }
  0x23   :  { %190 = vmatprep.mubr.f32.mxu0 %v15_v63  ;;  %473 = vmatpush3.msra.mxu1 %v66_v0 }
  0x24   :  { %275 = vmatprep.mubr.f32.mxu1 %v17_v1  ;;  %191 = vmatmul.mubr.f32.vlgmr.msra.gmra.mxu0 %v14_v2 }
  0x25   :  { %276 = vmatmul.mubr.f32.vlgmr.msra.gmra.mxu1 %v16_v3  ;;  %498 = vmatprep.subr.mxu0 %v105_v4 }
  0x26   :  { %520 = vmatprep.subr.mxu1 %v105_v4  ;;  %499 = vmatpush3.msra.mxu0 %v105_v4 }
  0x27   :  { %528 = vmatpush3.msra.mxu1 %v105_v4  ;;  %500 = vmatprep.subr.mxu0 %v104_v5 }
  0x28   :  { %521 = vmatprep.subr.mxu1 %v104_v5  ;;  %195 = vmatprep.mubr.f32.mxu0 %v20_v6 }
  0x29   :  { %280 = vmatprep.mubr.f32.mxu1 %v22_v7  ;;  %501 = vmatpush3.msra.mxu0 %v104_v5 }
  0x2a   :  { %529 = vmatpush3.msra.mxu1 %v104_v5  ;;  %196 = vmatmul.mubr.f32.gmra.mxu0 %v19_v8 }
  0x2b   :  { %281 = vmatmul.mubr.f32.gmra.mxu1 %v21_v9  ;;  %502 = vmatprep.subr.mxu0 %v103_v10 }
  0x2c   :  { %522 = vmatprep.subr.mxu1 %v103_v10  ;;  %503 = vmatpush3.msra.mxu0 %v103_v10 }
  0x2d   :  { %530 = vmatpush3.msra.mxu1 %v103_v10  ;;  %504 = vmatprep.subr.mxu0 %v102_v11 }
  0x2e   :  { %523 = vmatprep.subr.mxu1 %v102_v11  ;;  %200 = vmatprep.mubr.f32.mxu0 %v25_v12 }
  0x2f   :  { %285 = vmatprep.mubr.f32.mxu1 %v27_v13  ;;  %505 = vmatpush3.msra.mxu0 %v102_v11 }
  0x30   :  { %531 = vmatpush3.msra.mxu1 %v102_v11  ;;  %201 = vmatmul.mubr.f32.gmra.mxu0 %v24_v14 }
  0x31   :  { %286 = vmatmul.mubr.f32.gmra.mxu1 %v26_v15  ;;  %506 = vmatprep.subr.mxu0 %v101_v16 }
  0x32   :  { %524 = vmatprep.subr.mxu1 %v101_v16  ;;  %507 = vmatpush3.msra.mxu0 %v101_v16 }
  0x33   :  { %532 = vmatpush3.msra.mxu1 %v101_v16  ;;  %508 = vmatprep.subr.mxu0 %v100_v17 }
  0x34   :  { %525 = vmatprep.subr.mxu1 %v100_v17  ;;  %205 = vmatprep.mubr.f32.mxu0 %v30_v18 }
  0x35   :  { %290 = vmatprep.mubr.f32.mxu1 %v32_v19  ;;  %509 = vmatpush3.msra.mxu0 %v100_v17 }
  0x36   :  { %533 = vmatpush3.msra.mxu1 %v100_v17  ;;  %206 = vmatmul.mubr.f32.gmra.mxu0 %v29_v20 }
  0x37   :  { %291 = vmatmul.mubr.f32.gmra.mxu1 %v31_v21  ;;  %510 = vmatprep.subr.mxu0 %v99_v22 }
  0x38   :  { %526 = vmatprep.subr.mxu1 %v99_v22  ;;  %511 = vmatpush3.msra.mxu0 %v99_v22 }
  0x39   :  { %534 = vmatpush3.msra.mxu1 %v99_v22  ;;  %512 = vmatprep.subr.mxu0 %v98_v23 }
  0x3a   :  { %527 = vmatprep.subr.mxu1 %v98_v23  ;;  %513 = vmatpush3.msra.mxu0 %v98_v23 }
  0x3b   :  { %535 = vmatpush3.msra.mxu1 %v98_v23  ;;  %514 = vmatprep.mubr.msk.f32.mxu0 %vm113_vm0, %v18_v24 }
  0x3c   :  { %517 = vmatprep.mubr.msk.f32.mxu1 %vm113_vm0, %v28_v25  ;;  %515 = vmatmul.mubr.msk.f32.vlgmr.msra.gmra.mxu0 %vm113_vm0, %v23_v26 }
  0x3d   :  { %518 = vmatmul.mubr.msk.f32.vlgmr.msra.gmra.mxu1 %vm113_vm0, %v33_v27 }
  0xe4   :  { %v430_v28 = vpop.f32.mrf.mxu0 }
  0xe5   :  { %v474_v29 = vpop.f32.mrf.mxu1 }
  0xe6   :  { %v431_v30 = vpop.f32.mrf.mxu0 }
  0xe7   :  { %v475_v31 = vpop.f32.mrf.mxu1  ;;  %v432_v41 = vadd.f32 %v431_v30, %v430_v28 }
  0xe8   :  { %v476_v53 = vadd.f32 %v475_v31, %v474_v29 }
  0xe9   :  { %v193_v49 = vadd.f32 %v432_v41, %v393_v43 }
  0xea   :  { %v433_v32 = vpop.f32.mrf.mxu0 }
  0xeb   :  { %v477_v33 = vpop.f32.mrf.mxu1  ;;  %v278_v62 = vadd.f32 %v476_v53, %v193_v49 }
  0xec   :  { %v434_v34 = vpop.f32.mrf.mxu0 }
  0xed   :  { %v478_v35 = vpop.f32.mrf.mxu1  ;;  %v435_v40 = vadd.f32 %v434_v34, %v433_v32 }
  0xee   :  { %v479_v50 = vadd.f32 %v478_v35, %v477_v33 }
  0xef   :  { %v198_v46 = vadd.f32 %v435_v40, %v393_v43 }
  0xf0   :  { %v436_v36 = vpop.f32.mrf.mxu0 }
  0xf1   :  { %v480_v37 = vpop.f32.mrf.mxu1  ;;  %v283_v57 = vadd.f32 %v479_v50, %v198_v46 }
  0xf2   :  { %v437_v38 = vpop.f32.mrf.mxu0 }
  0xf3   :  { %v481_v39 = vpop.f32.mrf.mxu1  ;;  %v438_v42 = vadd.f32 %v437_v38, %v436_v36 }
  0xf4   :  { %v482_v54 = vadd.f32 %v481_v39, %v480_v37 }
  0xf5   :  { %v203_v51 = vadd.f32 %v438_v42, %v393_v43 }
  0xf6   :  { %v439_v44 = vpop.f32.mrf.mxu0 }
  0xf7   :  { %v483_v45 = vpop.f32.mrf.mxu1  ;;  %v288_v63 = vadd.f32 %v482_v54, %v203_v51 }
  0xf8   :  { %v440_v47 = vpop.f32.mrf.mxu0 }
  0xf9   :  { %v484_v48 = vpop.f32.mrf.mxu1  ;;  %v441_v52 = vadd.f32 %v440_v47, %v439_v44 }
  0xfa   :  { %v485_v56 = vadd.f32 %v484_v48, %v483_v45 }
  0xfb   :  { %v208_v55 = vadd.f32 %v441_v52, %v393_v43 }
  0xfc   :  { %v516_v58 = vpop.f32.mrf.mxu0 }
  0xfd   :  { %v519_v59 = vpop.f32.mrf.mxu1  ;;  %v368_v60 = vadd.f32 %v516_v58, %v283_v57  ;;  %v293_v61 = vadd.f32 %v485_v56, %v208_v55 }
  0xfe   :  { %v362_v0 = vpop.f32.mrf.mxu0 }
  0xff   :  { %v372_v1 = vpop.f32.mrf.mxu1  ;;  %v382_v2 = vmax.f32 %v368_v60, 0.0  ;;  %v378_v3 = vadd.f32 %v519_v59, %v293_v61  ;;  %v363_v4 = vadd.f32 %v362_v0, %v278_v62 }
 0x100   :  { %v373_v5 = vadd.f32 %v372_v1, %v288_v63 }
 0x101   :  { %386 = vst.msk [vmem:[%s858_s3 + $0x8] sm:$0xff] %vm113_vm0, %v382_v2  ;;  %v384_v6 = vmax.f32 %v378_v3, 0.0  ;;  %v381_v7 = vmax.f32 %v363_v4, 0.0 }
 0x102   :  { %v383_v8 = vmax.f32 %v373_v5, 0.0 }
 0x103   :  { %388 = vst.msk [vmem:[%s858_s3 + $0x18] sm:$0xff] %vm113_vm0, %v384_v6  ;;  %385 = vst.msk [vmem:[%s858_s3] sm:$0xff] %vm113_vm0, %v381_v7 }
 0x104   :  { %387 = vst.msk [vmem:[%s858_s3 + $0x10] sm:$0xff] %vm113_vm0, %v383_v8 }

// kernel: _forward.7
= control target key start
LH: loop header
LB: loop body
LE: loop exit
PB: predicated region body
PF: predicated region fallthrough
CT: control target
= control target key end

     0   :  { %vm1206_vm0 = vcmask 64512   ;;  %vm1524_vm1 = vmmov 0   ;;  %vm1428_vm2 = vcmask 523264   ;;  %s3356_s1 = inlined_call_operand.vmem [shape: f32[1024,512], index: 1, kind: input, shape index: {}]   ;;  %s3357_s0 = inlined_call_operand.vmem [shape: f32[8,1024], index: 0, kind: input, shape index: {}]   ;;  %s3358_s4 = inlined_call_operand.vmem [shape: f32[512,64], index: 4, kind: input, shape index: {}]   ;;  %s3359_s5 = inlined_call_operand.vmem [shape: f32[8,64], index: 5, kind: input, shape index: {}]   ;;  %s3360_s3 = inlined_call_operand.vmem [shape: f32[8,8], index: 3, kind: input, shape index: {}]   ;;  %s3361_s2 = inlined_call_operand.vmem [shape: f32[1,512], index: 2, kind: input, shape index: {}]   ;;  %s3362_s6 = inlined_call_operand.vmem [shape: f32[1,64], index: 6, kind: input, shape index: {}]   ;;  %s3363_s7 = inlined_call_operand.vmem [shape: f32[8,64], index: 7, kind: output, shape index: {}]  }
   0x1   :  { %v95_v0 = vld [vmem:[%s3356_s1 + $0x1e8] sm:$0xff]  ;;  %v94_v2 = vld [vmem:[%s3356_s1 + $0x1e0] sm:$0xff] }
   0x2   :  { %v223_v1 = vld [vmem:[%s3356_s1 + $0x5e8] sm:$0xff]  ;;  %568 = vmatprep.subr.mxu0 %v95_v0  ;;  %v222_v3 = vld [vmem:[%s3356_s1 + $0x5e0] sm:$0xff] }
   0x3   :  { %639 = vmatprep.subr.mxu1 %v223_v1  ;;  %v91_v4 = vld [vmem:[%s3356_s1 + $0x1c8] sm:$0xff]  ;;  %569 = vmatpush1.msra.mxu0 %v94_v2  ;;  %v90_v6 = vld [vmem:[%s3356_s1 + $0x1c0] sm:$0xff] }
   0x4   :  { %v219_v5 = vld [vmem:[%s3356_s1 + $0x5c8] sm:$0xff]  ;;  %640 = vmatpush1.msra.mxu1 %v222_v3  ;;  %v218_v7 = vld [vmem:[%s3356_s1 + $0x5c0] sm:$0xff]  ;;  %570 = vmatprep.subr.mxu0 %v91_v4 }
   0x5   :  { %v87_v8 = vld [vmem:[%s3356_s1 + $0x1a8] sm:$0xff]  ;;  %641 = vmatprep.subr.mxu1 %v219_v5  ;;  %v86_v10 = vld [vmem:[%s3356_s1 + $0x1a0] sm:$0xff]  ;;  %571 = vmatpush1.msra.mxu0 %v90_v6 }
   0x6   :  { %v215_v9 = vld [vmem:[%s3356_s1 + $0x5a8] sm:$0xff]  ;;  %v214_v11 = vld [vmem:[%s3356_s1 + $0x5a0] sm:$0xff]  ;;  %642 = vmatpush1.msra.mxu1 %v218_v7  ;;  %572 = vmatprep.subr.mxu0 %v87_v8 }
   0x7   :  { %v83_v12 = vld [vmem:[%s3356_s1 + $0x188] sm:$0xff]  ;;  %643 = vmatprep.subr.mxu1 %v215_v9  ;;  %v82_v14 = vld [vmem:[%s3356_s1 + $0x180] sm:$0xff]  ;;  %573 = vmatpush1.msra.mxu0 %v86_v10 }
   0x8   :  { %v211_v13 = vld [vmem:[%s3356_s1 + $0x588] sm:$0xff]  ;;  %v210_v15 = vld [vmem:[%s3356_s1 + $0x580] sm:$0xff]  ;;  %644 = vmatpush1.msra.mxu1 %v214_v11  ;;  %574 = vmatprep.subr.mxu0 %v83_v12 }
   0x9   :  { %v79_v16 = vld [vmem:[%s3356_s1 + $0x168] sm:$0xff]  ;;  %645 = vmatprep.subr.mxu1 %v211_v13  ;;  %v78_v18 = vld [vmem:[%s3356_s1 + $0x160] sm:$0xff]  ;;  %575 = vmatpush1.msra.mxu0 %v82_v14 }
   0xa   :  { %v207_v17 = vld [vmem:[%s3356_s1 + $0x568] sm:$0xff]  ;;  %v206_v19 = vld [vmem:[%s3356_s1 + $0x560] sm:$0xff]  ;;  %646 = vmatpush1.msra.mxu1 %v210_v15  ;;  %576 = vmatprep.subr.mxu0 %v79_v16 }
   0xb   :  { %v75_v20 = vld [vmem:[%s3356_s1 + $0x148] sm:$0xff]  ;;  %647 = vmatprep.subr.mxu1 %v207_v17  ;;  %v74_v22 = vld [vmem:[%s3356_s1 + $0x140] sm:$0xff]  ;;  %577 = vmatpush1.msra.mxu0 %v78_v18 }
   0xc   :  { %v203_v21 = vld [vmem:[%s3356_s1 + $0x548] sm:$0xff]  ;;  %v202_v23 = vld [vmem:[%s3356_s1 + $0x540] sm:$0xff]  ;;  %648 = vmatpush1.msra.mxu1 %v206_v19  ;;  %578 = vmatprep.subr.mxu0 %v75_v20 }
   0xd   :  { %v71_v24 = vld [vmem:[%s3356_s1 + $0x128] sm:$0xff]  ;;  %649 = vmatprep.subr.mxu1 %v203_v21  ;;  %v70_v26 = vld [vmem:[%s3356_s1 + $0x120] sm:$0xff]  ;;  %579 = vmatpush1.msra.mxu0 %v74_v22 }
   0xe   :  { %v199_v25 = vld [vmem:[%s3356_s1 + $0x528] sm:$0xff]  ;;  %v198_v27 = vld [vmem:[%s3356_s1 + $0x520] sm:$0xff]  ;;  %650 = vmatpush1.msra.mxu1 %v202_v23  ;;  %580 = vmatprep.subr.mxu0 %v71_v24 }
   0xf   :  { %v67_v28 = vld [vmem:[%s3356_s1 + $0x108] sm:$0xff]  ;;  %651 = vmatprep.subr.mxu1 %v199_v25  ;;  %v66_v30 = vld [vmem:[%s3356_s1 + $0x100] sm:$0xff]  ;;  %581 = vmatpush1.msra.mxu0 %v70_v26 }
  0x10   :  { %v195_v29 = vld [vmem:[%s3356_s1 + $0x508] sm:$0xff]  ;;  %v194_v31 = vld [vmem:[%s3356_s1 + $0x500] sm:$0xff]  ;;  %652 = vmatpush1.msra.mxu1 %v198_v27  ;;  %582 = vmatprep.subr.mxu0 %v67_v28 }
  0x11   :  { %v63_v32 = vld [vmem:[%s3356_s1 + $0xe8] sm:$0xff]  ;;  %653 = vmatprep.subr.mxu1 %v195_v29  ;;  %v62_v34 = vld [vmem:[%s3356_s1 + $0xe0] sm:$0xff]  ;;  %583 = vmatpush1.msra.mxu0 %v66_v30 }
  0x12   :  { %v191_v33 = vld [vmem:[%s3356_s1 + $0x4e8] sm:$0xff]  ;;  %v190_v35 = vld [vmem:[%s3356_s1 + $0x4e0] sm:$0xff]  ;;  %654 = vmatpush1.msra.mxu1 %v194_v31  ;;  %584 = vmatprep.subr.mxu0 %v63_v32 }
  0x13   :  { %v59_v36 = vld [vmem:[%s3356_s1 + $0xc8] sm:$0xff]  ;;  %655 = vmatprep.subr.mxu1 %v191_v33  ;;  %v58_v38 = vld [vmem:[%s3356_s1 + $0xc0] sm:$0xff]  ;;  %585 = vmatpush1.msra.mxu0 %v62_v34 }
  0x14   :  { %v187_v37 = vld [vmem:[%s3356_s1 + $0x4c8] sm:$0xff]  ;;  %v186_v39 = vld [vmem:[%s3356_s1 + $0x4c0] sm:$0xff]  ;;  %656 = vmatpush1.msra.mxu1 %v190_v35  ;;  %586 = vmatprep.subr.mxu0 %v59_v36 }
  0x15   :  { %v55_v40 = vld [vmem:[%s3356_s1 + $0xa8] sm:$0xff]  ;;  %657 = vmatprep.subr.mxu1 %v187_v37  ;;  %v54_v42 = vld [vmem:[%s3356_s1 + $0xa0] sm:$0xff]  ;;  %587 = vmatpush1.msra.mxu0 %v58_v38 }
  0x16   :  { %v183_v41 = vld [vmem:[%s3356_s1 + $0x4a8] sm:$0xff]  ;;  %v182_v43 = vld [vmem:[%s3356_s1 + $0x4a0] sm:$0xff]  ;;  %658 = vmatpush1.msra.mxu1 %v186_v39  ;;  %588 = vmatprep.subr.mxu0 %v55_v40 }
  0x17   :  { %v51_v44 = vld [vmem:[%s3356_s1 + $0x88] sm:$0xff]  ;;  %659 = vmatprep.subr.mxu1 %v183_v41  ;;  %v50_v46 = vld [vmem:[%s3356_s1 + $0x80] sm:$0xff]  ;;  %589 = vmatpush1.msra.mxu0 %v54_v42 }
  0x18   :  { %v179_v45 = vld [vmem:[%s3356_s1 + $0x488] sm:$0xff]  ;;  %v178_v47 = vld [vmem:[%s3356_s1 + $0x480] sm:$0xff]  ;;  %660 = vmatpush1.msra.mxu1 %v182_v43  ;;  %590 = vmatprep.subr.mxu0 %v51_v44 }
  0x19   :  { %v47_v48 = vld [vmem:[%s3356_s1 + $0x68] sm:$0xff]  ;;  %661 = vmatprep.subr.mxu1 %v179_v45  ;;  %v46_v50 = vld [vmem:[%s3356_s1 + $0x60] sm:$0xff]  ;;  %591 = vmatpush1.msra.mxu0 %v50_v46 }
  0x1a   :  { %v175_v49 = vld [vmem:[%s3356_s1 + $0x468] sm:$0xff]  ;;  %v174_v51 = vld [vmem:[%s3356_s1 + $0x460] sm:$0xff]  ;;  %662 = vmatpush1.msra.mxu1 %v178_v47  ;;  %592 = vmatprep.subr.mxu0 %v47_v48 }
  0x1b   :  { %v43_v52 = vld [vmem:[%s3356_s1 + $0x48] sm:$0xff]  ;;  %663 = vmatprep.subr.mxu1 %v175_v49  ;;  %v42_v54 = vld [vmem:[%s3356_s1 + $0x40] sm:$0xff]  ;;  %593 = vmatpush1.msra.mxu0 %v46_v50 }
  0x1c   :  { %v171_v53 = vld [vmem:[%s3356_s1 + $0x448] sm:$0xff]  ;;  %v170_v55 = vld [vmem:[%s3356_s1 + $0x440] sm:$0xff]  ;;  %664 = vmatpush1.msra.mxu1 %v174_v51  ;;  %594 = vmatprep.subr.mxu0 %v43_v52 }
  0x1d   :  { %v39_v56 = vld [vmem:[%s3356_s1 + $0x28] sm:$0xff]  ;;  %665 = vmatprep.subr.mxu1 %v171_v53  ;;  %v38_v58 = vld [vmem:[%s3356_s1 + $0x20] sm:$0xff]  ;;  %595 = vmatpush1.msra.mxu0 %v42_v54 }
  0x1e   :  { %v167_v57 = vld [vmem:[%s3356_s1 + $0x428] sm:$0xff]  ;;  %v166_v59 = vld [vmem:[%s3356_s1 + $0x420] sm:$0xff]  ;;  %666 = vmatpush1.msra.mxu1 %v170_v55  ;;  %596 = vmatprep.subr.mxu0 %v39_v56 }
  0x1f   :  { %v35_v60 = vld [vmem:[%s3356_s1 + $0x8] sm:$0xff]  ;;  %667 = vmatprep.subr.mxu1 %v167_v57  ;;  %v34_v62 = vld [vmem:[%s3356_s1] sm:$0xff]  ;;  %597 = vmatpush1.msra.mxu0 %v38_v58 }
  0x20   :  { %v163_v61 = vld [vmem:[%s3356_s1 + $0x408] sm:$0xff]  ;;  %v162_v63 = vld [vmem:[%s3356_s1 + $0x400] sm:$0xff]  ;;  %668 = vmatpush1.msra.mxu1 %v166_v59  ;;  %598 = vmatprep.subr.mxu0 %v35_v60 }
  0x21   :  { %v159_v0 = vld [vmem:[%s3356_s1 + $0x3e8] sm:$0xff]  ;;  %669 = vmatprep.subr.mxu1 %v163_v61  ;;  %v158_v2 = vld [vmem:[%s3356_s1 + $0x3e0] sm:$0xff]  ;;  %599 = vmatpush1.msra.mxu0 %v34_v62 }
  0x22   :  { %v287_v1 = vld [vmem:[%s3356_s1 + $0x7e8] sm:$0xff]  ;;  %v286_v3 = vld [vmem:[%s3356_s1 + $0x7e0] sm:$0xff]  ;;  %670 = vmatpush1.msra.mxu1 %v162_v63  ;;  %600 = vmatprep.subr.mxu0 %v159_v0 }
  0x23   :  { %v155_v4 = vld [vmem:[%s3356_s1 + $0x3c8] sm:$0xff]  ;;  %671 = vmatprep.subr.mxu1 %v287_v1  ;;  %v154_v6 = vld [vmem:[%s3356_s1 + $0x3c0] sm:$0xff]  ;;  %601 = vmatpush2.msra.mxu0 %v158_v2  ;;  %v29_v2 = vld [vmem:[%s3357_s0 + $0x18] sm:$0xff] }
  0x24   :  { %v283_v5 = vld [vmem:[%s3356_s1 + $0x7c8] sm:$0xff]  ;;  %v282_v7 = vld [vmem:[%s3356_s1 + $0x7c0] sm:$0xff]  ;;  %672 = vmatpush2.msra.mxu1 %v286_v3  ;;  %602 = vmatprep.subr.mxu0 %v155_v4 }
  0x25   :  { %v151_v8 = vld [vmem:[%s3356_s1 + $0x3a8] sm:$0xff]  ;;  %673 = vmatprep.subr.mxu1 %v283_v5  ;;  %v150_v10 = vld [vmem:[%s3356_s1 + $0x3a0] sm:$0xff]  ;;  %603 = vmatpush2.msra.mxu0 %v154_v6  ;;  %v28_v5 = vld [vmem:[%s3357_s0 + $0x10] sm:$0xff] }
  0x26   :  { %v279_v9 = vld [vmem:[%s3356_s1 + $0x7a8] sm:$0xff]  ;;  %v278_v11 = vld [vmem:[%s3356_s1 + $0x7a0] sm:$0xff]  ;;  %674 = vmatpush2.msra.mxu1 %v282_v7  ;;  %604 = vmatprep.subr.mxu0 %v151_v8 }
  0x27   :  { %v147_v12 = vld [vmem:[%s3356_s1 + $0x388] sm:$0xff]  ;;  %675 = vmatprep.subr.mxu1 %v279_v9  ;;  %v146_v14 = vld [vmem:[%s3356_s1 + $0x380] sm:$0xff]  ;;  %605 = vmatpush2.msra.mxu0 %v150_v10 }
  0x28   :  { %v275_v13 = vld [vmem:[%s3356_s1 + $0x788] sm:$0xff]  ;;  %v274_v15 = vld [vmem:[%s3356_s1 + $0x780] sm:$0xff]  ;;  %676 = vmatpush2.msra.mxu1 %v278_v11  ;;  %606 = vmatprep.subr.mxu0 %v147_v12 }
  0x29   :  { %v143_v16 = vld [vmem:[%s3356_s1 + $0x368] sm:$0xff]  ;;  %677 = vmatprep.subr.mxu1 %v275_v13  ;;  %v142_v18 = vld [vmem:[%s3356_s1 + $0x360] sm:$0xff]  ;;  %607 = vmatpush2.msra.mxu0 %v146_v14 }
  0x2a   :  { %v271_v17 = vld [vmem:[%s3356_s1 + $0x768] sm:$0xff]  ;;  %v270_v19 = vld [vmem:[%s3356_s1 + $0x760] sm:$0xff]  ;;  %678 = vmatpush2.msra.mxu1 %v274_v15  ;;  %608 = vmatprep.subr.mxu0 %v143_v16 }
  0x2b   :  { %v139_v20 = vld [vmem:[%s3356_s1 + $0x348] sm:$0xff]  ;;  %679 = vmatprep.subr.mxu1 %v271_v17  ;;  %v138_v22 = vld [vmem:[%s3356_s1 + $0x340] sm:$0xff]  ;;  %609 = vmatpush2.msra.mxu0 %v142_v18 }
  0x2c   :  { %v267_v21 = vld [vmem:[%s3356_s1 + $0x748] sm:$0xff]  ;;  %v266_v23 = vld [vmem:[%s3356_s1 + $0x740] sm:$0xff]  ;;  %680 = vmatpush2.msra.mxu1 %v270_v19  ;;  %610 = vmatprep.subr.mxu0 %v139_v20 }
  0x2d   :  { %v135_v24 = vld [vmem:[%s3356_s1 + $0x328] sm:$0xff]  ;;  %681 = vmatprep.subr.mxu1 %v267_v21  ;;  %v134_v26 = vld [vmem:[%s3356_s1 + $0x320] sm:$0xff]  ;;  %611 = vmatpush2.msra.mxu0 %v138_v22 }
  0x2e   :  { %v263_v25 = vld [vmem:[%s3356_s1 + $0x728] sm:$0xff]  ;;  %v262_v27 = vld [vmem:[%s3356_s1 + $0x720] sm:$0xff]  ;;  %682 = vmatpush2.msra.mxu1 %v266_v23  ;;  %612 = vmatprep.subr.mxu0 %v135_v24 }
  0x2f   :  { %v131_v28 = vld [vmem:[%s3356_s1 + $0x308] sm:$0xff]  ;;  %683 = vmatprep.subr.mxu1 %v263_v25  ;;  %v130_v30 = vld [vmem:[%s3356_s1 + $0x300] sm:$0xff]  ;;  %613 = vmatpush2.msra.mxu0 %v134_v26 }
  0x30   :  { %v259_v29 = vld [vmem:[%s3356_s1 + $0x708] sm:$0xff]  ;;  %v258_v31 = vld [vmem:[%s3356_s1 + $0x700] sm:$0xff]  ;;  %684 = vmatpush2.msra.mxu1 %v262_v27  ;;  %614 = vmatprep.subr.mxu0 %v131_v28 }
  0x31   :  { %v127_v32 = vld [vmem:[%s3356_s1 + $0x2e8] sm:$0xff]  ;;  %685 = vmatprep.subr.mxu1 %v259_v29  ;;  %v126_v34 = vld [vmem:[%s3356_s1 + $0x2e0] sm:$0xff]  ;;  %615 = vmatpush2.msra.mxu0 %v130_v30 }
  0x32   :  { %v255_v33 = vld [vmem:[%s3356_s1 + $0x6e8] sm:$0xff]  ;;  %v254_v35 = vld [vmem:[%s3356_s1 + $0x6e0] sm:$0xff]  ;;  %686 = vmatpush2.msra.mxu1 %v258_v31  ;;  %616 = vmatprep.subr.mxu0 %v127_v32 }
  0x33   :  { %v123_v36 = vld [vmem:[%s3356_s1 + $0x2c8] sm:$0xff]  ;;  %687 = vmatprep.subr.mxu1 %v255_v33  ;;  %v122_v38 = vld [vmem:[%s3356_s1 + $0x2c0] sm:$0xff]  ;;  %617 = vmatpush2.msra.mxu0 %v126_v34 }
  0x34   :  { %v251_v37 = vld [vmem:[%s3356_s1 + $0x6c8] sm:$0xff]  ;;  %v250_v39 = vld [vmem:[%s3356_s1 + $0x6c0] sm:$0xff]  ;;  %688 = vmatpush2.msra.mxu1 %v254_v35  ;;  %618 = vmatprep.subr.mxu0 %v123_v36 }
  0x35   :  { %v119_v40 = vld [vmem:[%s3356_s1 + $0x2a8] sm:$0xff]  ;;  %689 = vmatprep.subr.mxu1 %v251_v37  ;;  %v118_v42 = vld [vmem:[%s3356_s1 + $0x2a0] sm:$0xff]  ;;  %619 = vmatpush2.msra.mxu0 %v122_v38 }
  0x36   :  { %v247_v41 = vld [vmem:[%s3356_s1 + $0x6a8] sm:$0xff]  ;;  %v246_v43 = vld [vmem:[%s3356_s1 + $0x6a0] sm:$0xff]  ;;  %690 = vmatpush2.msra.mxu1 %v250_v39  ;;  %620 = vmatprep.subr.mxu0 %v119_v40 }
  0x37   :  { %v115_v44 = vld [vmem:[%s3356_s1 + $0x288] sm:$0xff]  ;;  %691 = vmatprep.subr.mxu1 %v247_v41  ;;  %v114_v46 = vld [vmem:[%s3356_s1 + $0x280] sm:$0xff]  ;;  %621 = vmatpush2.msra.mxu0 %v118_v42 }
  0x38   :  { %v243_v45 = vld [vmem:[%s3356_s1 + $0x688] sm:$0xff]  ;;  %v242_v47 = vld [vmem:[%s3356_s1 + $0x680] sm:$0xff]  ;;  %692 = vmatpush2.msra.mxu1 %v246_v43  ;;  %622 = vmatprep.subr.mxu0 %v115_v44 }
  0x39   :  { %v111_v48 = vld [vmem:[%s3356_s1 + $0x268] sm:$0xff]  ;;  %693 = vmatprep.subr.mxu1 %v243_v45  ;;  %v110_v50 = vld [vmem:[%s3356_s1 + $0x260] sm:$0xff]  ;;  %623 = vmatpush2.msra.mxu0 %v114_v46 }
  0x3a   :  { %v239_v49 = vld [vmem:[%s3356_s1 + $0x668] sm:$0xff]  ;;  %v238_v51 = vld [vmem:[%s3356_s1 + $0x660] sm:$0xff]  ;;  %694 = vmatpush2.msra.mxu1 %v242_v47  ;;  %624 = vmatprep.subr.mxu0 %v111_v48 }
  0x3b   :  { %v107_v52 = vld [vmem:[%s3356_s1 + $0x248] sm:$0xff]  ;;  %695 = vmatprep.subr.mxu1 %v239_v49  ;;  %v106_v54 = vld [vmem:[%s3356_s1 + $0x240] sm:$0xff]  ;;  %625 = vmatpush2.msra.mxu0 %v110_v50 }
  0x3c   :  { %v235_v53 = vld [vmem:[%s3356_s1 + $0x648] sm:$0xff]  ;;  %v234_v55 = vld [vmem:[%s3356_s1 + $0x640] sm:$0xff]  ;;  %696 = vmatpush2.msra.mxu1 %v238_v51  ;;  %626 = vmatprep.subr.mxu0 %v107_v52 }
  0x3d   :  { %v103_v56 = vld [vmem:[%s3356_s1 + $0x228] sm:$0xff]  ;;  %697 = vmatprep.subr.mxu1 %v235_v53  ;;  %v102_v58 = vld [vmem:[%s3356_s1 + $0x220] sm:$0xff]  ;;  %627 = vmatpush2.msra.mxu0 %v106_v54 }
  0x3e   :  { %v231_v57 = vld [vmem:[%s3356_s1 + $0x628] sm:$0xff]  ;;  %v230_v59 = vld [vmem:[%s3356_s1 + $0x620] sm:$0xff]  ;;  %698 = vmatpush2.msra.mxu1 %v234_v55  ;;  %628 = vmatprep.subr.mxu0 %v103_v56 }
  0x3f   :  { %v99_v60 = vld [vmem:[%s3356_s1 + $0x208] sm:$0xff]  ;;  %699 = vmatprep.subr.mxu1 %v231_v57  ;;  %v98_v62 = vld [vmem:[%s3356_s1 + $0x200] sm:$0xff]  ;;  %629 = vmatpush2.msra.mxu0 %v102_v58 }
  0x40   :  { %v227_v61 = vld [vmem:[%s3356_s1 + $0x608] sm:$0xff]  ;;  %700 = vmatpush2.msra.mxu1 %v230_v59  ;;  %v226_v0 = vld [vmem:[%s3356_s1 + $0x600] sm:$0xff]  ;;  %630 = vmatprep.subr.mxu0 %v99_v60 }
  0x41   :  { %v27_v63 = vld [vmem:[%s3357_s0 + $0x8] sm:$0xff]  ;;  %v26_v1 = vld [vmem:[%s3357_s0] sm:$0xff]  ;;  %701 = vmatprep.subr.mxu1 %v227_v61  ;;  %631 = vmatpush2.msra.mxu0 %v98_v62 }
  0x42   :  { %v351_v3 = vld [vmem:[%s3356_s1 + $0x9e8] sm:$0xff]  ;;  %632 = vmatprep.mubr.f32.mxu0 %v27_v63  ;;  %702 = vmatpush2.msra.mxu1 %v226_v0  ;;  %v350_v6 = vld [vmem:[%s3356_s1 + $0x9e0] sm:$0xff] }
  0x43   :  { %v479_v4 = vld [vmem:[%s3356_s1 + $0xde8] sm:$0xff]  ;;  %633 = vmatmul.mubr.f32.vlgmr.msra.gmra.mxu0 %v26_v1  ;;  %v478_v7 = vld [vmem:[%s3356_s1 + $0xde0] sm:$0xff]  ;;  %703 = vmatprep.mubr.f32.mxu1 %v29_v2 }
  0x44   :  { %710 = vmatprep.subr.mxu0 %v351_v3  ;;  %v347_v8 = vld [vmem:[%s3356_s1 + $0x9c8] sm:$0xff]  ;;  %781 = vmatprep.subr.mxu1 %v479_v4  ;;  %v346_v10 = vld [vmem:[%s3356_s1 + $0x9c0] sm:$0xff] }
  0x45   :  { %v475_v9 = vld [vmem:[%s3356_s1 + $0xdc8] sm:$0xff]  ;;  %704 = vmatmul.mubr.f32.vlgmr.msra.gmra.mxu1 %v28_v5  ;;  %v474_v11 = vld [vmem:[%s3356_s1 + $0xdc0] sm:$0xff]  ;;  %711 = vmatpush1.msra.mxu0 %v350_v6 }
  0x46   :  { %782 = vmatpush1.msra.mxu1 %v478_v7  ;;  %v343_v12 = vld [vmem:[%s3356_s1 + $0x9a8] sm:$0xff]  ;;  %712 = vmatprep.subr.mxu0 %v347_v8  ;;  %v342_v14 = vld [vmem:[%s3356_s1 + $0x9a0] sm:$0xff] }
  0x47   :  { %v471_v13 = vld [vmem:[%s3356_s1 + $0xda8] sm:$0xff]  ;;  %783 = vmatprep.subr.mxu1 %v475_v9  ;;  %v470_v15 = vld [vmem:[%s3356_s1 + $0xda0] sm:$0xff]  ;;  %713 = vmatpush1.msra.mxu0 %v346_v10 }
  0x48   :  { %784 = vmatpush1.msra.mxu1 %v474_v11  ;;  %v339_v16 = vld [vmem:[%s3356_s1 + $0x988] sm:$0xff]  ;;  %714 = vmatprep.subr.mxu0 %v343_v12  ;;  %v338_v18 = vld [vmem:[%s3356_s1 + $0x980] sm:$0xff] }
  0x49   :  { %v467_v17 = vld [vmem:[%s3356_s1 + $0xd88] sm:$0xff]  ;;  %785 = vmatprep.subr.mxu1 %v471_v13  ;;  %v466_v19 = vld [vmem:[%s3356_s1 + $0xd80] sm:$0xff]  ;;  %715 = vmatpush1.msra.mxu0 %v342_v14 }
  0x4a   :  { %786 = vmatpush1.msra.mxu1 %v470_v15  ;;  %v335_v20 = vld [vmem:[%s3356_s1 + $0x968] sm:$0xff]  ;;  %716 = vmatprep.subr.mxu0 %v339_v16  ;;  %v334_v22 = vld [vmem:[%s3356_s1 + $0x960] sm:$0xff] }
  0x4b   :  { %v463_v21 = vld [vmem:[%s3356_s1 + $0xd68] sm:$0xff]  ;;  %787 = vmatprep.subr.mxu1 %v467_v17  ;;  %v462_v23 = vld [vmem:[%s3356_s1 + $0xd60] sm:$0xff]  ;;  %717 = vmatpush1.msra.mxu0 %v338_v18 }
  0x4c   :  { %788 = vmatpush1.msra.mxu1 %v466_v19  ;;  %v331_v24 = vld [vmem:[%s3356_s1 + $0x948] sm:$0xff]  ;;  %718 = vmatprep.subr.mxu0 %v335_v20  ;;  %v330_v26 = vld [vmem:[%s3356_s1 + $0x940] sm:$0xff] }
  0x4d   :  { %v459_v25 = vld [vmem:[%s3356_s1 + $0xd48] sm:$0xff]  ;;  %789 = vmatprep.subr.mxu1 %v463_v21  ;;  %v458_v27 = vld [vmem:[%s3356_s1 + $0xd40] sm:$0xff]  ;;  %719 = vmatpush1.msra.mxu0 %v334_v22 }
  0x4e   :  { %790 = vmatpush1.msra.mxu1 %v462_v23  ;;  %v327_v28 = vld [vmem:[%s3356_s1 + $0x928] sm:$0xff]  ;;  %720 = vmatprep.subr.mxu0 %v331_v24  ;;  %v326_v30 = vld [vmem:[%s3356_s1 + $0x920] sm:$0xff] }
  0x4f   :  { %v455_v29 = vld [vmem:[%s3356_s1 + $0xd28] sm:$0xff]  ;;  %791 = vmatprep.subr.mxu1 %v459_v25  ;;  %v454_v31 = vld [vmem:[%s3356_s1 + $0xd20] sm:$0xff]  ;;  %721 = vmatpush1.msra.mxu0 %v330_v26 }
  0x50   :  { %792 = vmatpush1.msra.mxu1 %v458_v27  ;;  %v323_v32 = vld [vmem:[%s3356_s1 + $0x908] sm:$0xff]  ;;  %722 = vmatprep.subr.mxu0 %v327_v28  ;;  %v322_v34 = vld [vmem:[%s3356_s1 + $0x900] sm:$0xff] }
  0x51   :  { %v451_v33 = vld [vmem:[%s3356_s1 + $0xd08] sm:$0xff]  ;;  %793 = vmatprep.subr.mxu1 %v455_v29  ;;  %v450_v35 = vld [vmem:[%s3356_s1 + $0xd00] sm:$0xff]  ;;  %723 = vmatpush1.msra.mxu0 %v326_v30 }
  0x52   :  { %794 = vmatpush1.msra.mxu1 %v454_v31  ;;  %v319_v36 = vld [vmem:[%s3356_s1 + $0x8e8] sm:$0xff]  ;;  %724 = vmatprep.subr.mxu0 %v323_v32  ;;  %v318_v38 = vld [vmem:[%s3356_s1 + $0x8e0] sm:$0xff] }
  0x53   :  { %v447_v37 = vld [vmem:[%s3356_s1 + $0xce8] sm:$0xff]  ;;  %795 = vmatprep.subr.mxu1 %v451_v33  ;;  %v446_v39 = vld [vmem:[%s3356_s1 + $0xce0] sm:$0xff]  ;;  %725 = vmatpush1.msra.mxu0 %v322_v34 }
  0x54   :  { %796 = vmatpush1.msra.mxu1 %v450_v35  ;;  %v315_v40 = vld [vmem:[%s3356_s1 + $0x8c8] sm:$0xff]  ;;  %726 = vmatprep.subr.mxu0 %v319_v36  ;;  %v314_v42 = vld [vmem:[%s3356_s1 + $0x8c0] sm:$0xff] }
  0x55   :  { %v443_v41 = vld [vmem:[%s3356_s1 + $0xcc8] sm:$0xff]  ;;  %797 = vmatprep.subr.mxu1 %v447_v37  ;;  %v442_v43 = vld [vmem:[%s3356_s1 + $0xcc0] sm:$0xff]  ;;  %727 = vmatpush1.msra.mxu0 %v318_v38 }
  0x56   :  { %798 = vmatpush1.msra.mxu1 %v446_v39  ;;  %v311_v44 = vld [vmem:[%s3356_s1 + $0x8a8] sm:$0xff]  ;;  %728 = vmatprep.subr.mxu0 %v315_v40  ;;  %v310_v46 = vld [vmem:[%s3356_s1 + $0x8a0] sm:$0xff] }
  0x57   :  { %v439_v45 = vld [vmem:[%s3356_s1 + $0xca8] sm:$0xff]  ;;  %799 = vmatprep.subr.mxu1 %v443_v41  ;;  %v438_v47 = vld [vmem:[%s3356_s1 + $0xca0] sm:$0xff]  ;;  %729 = vmatpush1.msra.mxu0 %v314_v42 }
  0x58   :  { %800 = vmatpush1.msra.mxu1 %v442_v43  ;;  %v307_v48 = vld [vmem:[%s3356_s1 + $0x888] sm:$0xff]  ;;  %730 = vmatprep.subr.mxu0 %v311_v44  ;;  %v306_v50 = vld [vmem:[%s3356_s1 + $0x880] sm:$0xff] }
  0x59   :  { %v435_v49 = vld [vmem:[%s3356_s1 + $0xc88] sm:$0xff]  ;;  %801 = vmatprep.subr.mxu1 %v439_v45  ;;  %v434_v51 = vld [vmem:[%s3356_s1 + $0xc80] sm:$0xff]  ;;  %731 = vmatpush1.msra.mxu0 %v310_v46 }
  0x5a   :  { %802 = vmatpush1.msra.mxu1 %v438_v47  ;;  %v303_v52 = vld [vmem:[%s3356_s1 + $0x868] sm:$0xff]  ;;  %732 = vmatprep.subr.mxu0 %v307_v48  ;;  %v302_v54 = vld [vmem:[%s3356_s1 + $0x860] sm:$0xff] }
  0x5b   :  { %v431_v53 = vld [vmem:[%s3356_s1 + $0xc68] sm:$0xff]  ;;  %803 = vmatprep.subr.mxu1 %v435_v49  ;;  %v430_v55 = vld [vmem:[%s3356_s1 + $0xc60] sm:$0xff]  ;;  %733 = vmatpush1.msra.mxu0 %v306_v50 }
  0x5c   :  { %804 = vmatpush1.msra.mxu1 %v434_v51  ;;  %v299_v56 = vld [vmem:[%s3356_s1 + $0x848] sm:$0xff]  ;;  %734 = vmatprep.subr.mxu0 %v303_v52  ;;  %v298_v58 = vld [vmem:[%s3356_s1 + $0x840] sm:$0xff] }
  0x5d   :  { %v427_v57 = vld [vmem:[%s3356_s1 + $0xc48] sm:$0xff]  ;;  %805 = vmatprep.subr.mxu1 %v431_v53  ;;  %v426_v59 = vld [vmem:[%s3356_s1 + $0xc40] sm:$0xff]  ;;  %735 = vmatpush1.msra.mxu0 %v302_v54 }
  0x5e   :  { %806 = vmatpush1.msra.mxu1 %v430_v55  ;;  %v295_v60 = vld [vmem:[%s3356_s1 + $0x828] sm:$0xff]  ;;  %736 = vmatprep.subr.mxu0 %v299_v56  ;;  %v294_v62 = vld [vmem:[%s3356_s1 + $0x820] sm:$0xff] }
  0x5f   :  { %v423_v61 = vld [vmem:[%s3356_s1 + $0xc28] sm:$0xff]  ;;  %807 = vmatprep.subr.mxu1 %v427_v57  ;;  %v422_v63 = vld [vmem:[%s3356_s1 + $0xc20] sm:$0xff]  ;;  %737 = vmatpush1.msra.mxu0 %v298_v58 }
  0x60   :  { %808 = vmatpush1.msra.mxu1 %v426_v59  ;;  %v291_v0 = vld [vmem:[%s3356_s1 + $0x808] sm:$0xff]  ;;  %738 = vmatprep.subr.mxu0 %v295_v60  ;;  %v290_v2 = vld [vmem:[%s3356_s1 + $0x800] sm:$0xff] }
  0x61   :  { %v419_v1 = vld [vmem:[%s3356_s1 + $0xc08] sm:$0xff]  ;;  %809 = vmatprep.subr.mxu1 %v423_v61  ;;  %v418_v3 = vld [vmem:[%s3356_s1 + $0xc00] sm:$0xff]  ;;  %739 = vmatpush1.msra.mxu0 %v294_v62 }
  0x62   :  { %810 = vmatpush1.msra.mxu1 %v422_v63  ;;  %v415_v4 = vld [vmem:[%s3356_s1 + $0xbe8] sm:$0xff]  ;;  %740 = vmatprep.subr.mxu0 %v291_v0  ;;  %v414_v6 = vld [vmem:[%s3356_s1 + $0xbe0] sm:$0xff] }
  0x63   :  { %v543_v5 = vld [vmem:[%s3356_s1 + $0xfe8] sm:$0xff]  ;;  %811 = vmatprep.subr.mxu1 %v419_v1  ;;  %v542_v7 = vld [vmem:[%s3356_s1 + $0xfe0] sm:$0xff]  ;;  %741 = vmatpush1.msra.mxu0 %v290_v2 }
  0x64   :  { %812 = vmatpush1.msra.mxu1 %v418_v3  ;;  %v411_v8 = vld [vmem:[%s3356_s1 + $0xbc8] sm:$0xff]  ;;  %742 = vmatprep.subr.mxu0 %v415_v4  ;;  %v410_v10 = vld [vmem:[%s3356_s1 + $0xbc0] sm:$0xff] }
  0x65   :  { %v539_v9 = vld [vmem:[%s3356_s1 + $0xfc8] sm:$0xff]  ;;  %813 = vmatprep.subr.mxu1 %v543_v5  ;;  %v538_v11 = vld [vmem:[%s3356_s1 + $0xfc0] sm:$0xff]  ;;  %743 = vmatpush2.msra.mxu0 %v414_v6  ;;  %v33_v6 = vld [vmem:[%s3357_s0 + $0x38] sm:$0xff] }
  0x66   :  { %814 = vmatpush2.msra.mxu1 %v542_v7  ;;  %v407_v12 = vld [vmem:[%s3356_s1 + $0xba8] sm:$0xff]  ;;  %744 = vmatprep.subr.mxu0 %v411_v8  ;;  %v406_v14 = vld [vmem:[%s3356_s1 + $0xba0] sm:$0xff]  ;;  %v97_v7 = vld [vmem:[%s3356_s1 + $0x1f8] sm:$0xff] }
  0x67   :  { %v535_v13 = vld [vmem:[%s3356_s1 + $0xfa8] sm:$0xff]  ;;  %815 = vmatprep.subr.mxu1 %v539_v9  ;;  %v534_v15 = vld [vmem:[%s3356_s1 + $0xfa0] sm:$0xff]  ;;  %745 = vmatpush2.msra.mxu0 %v410_v10  ;;  %v225_v8 = vld [vmem:[%s3356_s1 + $0x5f8] sm:$0xff] }
  0x68   :  { %816 = vmatpush2.msra.mxu1 %v538_v11  ;;  %v403_v16 = vld [vmem:[%s3356_s1 + $0xb88] sm:$0xff]  ;;  %746 = vmatprep.subr.mxu0 %v407_v12  ;;  %v402_v18 = vld [vmem:[%s3356_s1 + $0xb80] sm:$0xff]  ;;  %v32_v9 = vld [vmem:[%s3357_s0 + $0x30] sm:$0xff] }
  0x69   :  { %v531_v17 = vld [vmem:[%s3356_s1 + $0xf88] sm:$0xff]  ;;  %817 = vmatprep.subr.mxu1 %v535_v13  ;;  %v530_v19 = vld [vmem:[%s3356_s1 + $0xf80] sm:$0xff]  ;;  %747 = vmatpush2.msra.mxu0 %v406_v14  ;;  %v96_v10 = vld [vmem:[%s3356_s1 + $0x1f0] sm:$0xff] }
  0x6a   :  { %818 = vmatpush2.msra.mxu1 %v534_v15  ;;  %v399_v20 = vld [vmem:[%s3356_s1 + $0xb68] sm:$0xff]  ;;  %748 = vmatprep.subr.mxu0 %v403_v16  ;;  %v398_v22 = vld [vmem:[%s3356_s1 + $0xb60] sm:$0xff]  ;;  %v224_v11 = vld [vmem:[%s3356_s1 + $0x5f0] sm:$0xff] }
  0x6b   :  { %v527_v21 = vld [vmem:[%s3356_s1 + $0xf68] sm:$0xff]  ;;  %819 = vmatprep.subr.mxu1 %v531_v17  ;;  %v526_v23 = vld [vmem:[%s3356_s1 + $0xf60] sm:$0xff]  ;;  %749 = vmatpush2.msra.mxu0 %v402_v18  ;;  %v93_v12 = vld [vmem:[%s3356_s1 + $0x1d8] sm:$0xff] }
  0x6c   :  { %820 = vmatpush2.msra.mxu1 %v530_v19  ;;  %v395_v24 = vld [vmem:[%s3356_s1 + $0xb48] sm:$0xff]  ;;  %750 = vmatprep.subr.mxu0 %v399_v20  ;;  %v394_v26 = vld [vmem:[%s3356_s1 + $0xb40] sm:$0xff]  ;;  %v221_v13 = vld [vmem:[%s3356_s1 + $0x5d8] sm:$0xff] }
  0x6d   :  { %v523_v25 = vld [vmem:[%s3356_s1 + $0xf48] sm:$0xff]  ;;  %821 = vmatprep.subr.mxu1 %v527_v21  ;;  %v522_v27 = vld [vmem:[%s3356_s1 + $0xf40] sm:$0xff]  ;;  %751 = vmatpush2.msra.mxu0 %v398_v22  ;;  %v92_v14 = vld [vmem:[%s3356_s1 + $0x1d0] sm:$0xff] }
  0x6e   :  { %822 = vmatpush2.msra.mxu1 %v526_v23  ;;  %v391_v28 = vld [vmem:[%s3356_s1 + $0xb28] sm:$0xff]  ;;  %752 = vmatprep.subr.mxu0 %v395_v24  ;;  %v390_v30 = vld [vmem:[%s3356_s1 + $0xb20] sm:$0xff]  ;;  %v220_v15 = vld [vmem:[%s3356_s1 + $0x5d0] sm:$0xff] }
  0x6f   :  { %v519_v29 = vld [vmem:[%s3356_s1 + $0xf28] sm:$0xff]  ;;  %823 = vmatprep.subr.mxu1 %v523_v25  ;;  %v518_v31 = vld [vmem:[%s3356_s1 + $0xf20] sm:$0xff]  ;;  %753 = vmatpush2.msra.mxu0 %v394_v26  ;;  %v89_v16 = vld [vmem:[%s3356_s1 + $0x1b8] sm:$0xff] }
  0x70   :  { %824 = vmatpush2.msra.mxu1 %v522_v27  ;;  %v387_v32 = vld [vmem:[%s3356_s1 + $0xb08] sm:$0xff]  ;;  %754 = vmatprep.subr.mxu0 %v391_v28  ;;  %v386_v34 = vld [vmem:[%s3356_s1 + $0xb00] sm:$0xff]  ;;  %v217_v17 = vld [vmem:[%s3356_s1 + $0x5b8] sm:$0xff] }
  0x71   :  { %v515_v33 = vld [vmem:[%s3356_s1 + $0xf08] sm:$0xff]  ;;  %825 = vmatprep.subr.mxu1 %v519_v29  ;;  %v514_v35 = vld [vmem:[%s3356_s1 + $0xf00] sm:$0xff]  ;;  %755 = vmatpush2.msra.mxu0 %v390_v30  ;;  %v88_v18 = vld [vmem:[%s3356_s1 + $0x1b0] sm:$0xff] }
  0x72   :  { %826 = vmatpush2.msra.mxu1 %v518_v31  ;;  %v383_v36 = vld [vmem:[%s3356_s1 + $0xae8] sm:$0xff]  ;;  %756 = vmatprep.subr.mxu0 %v387_v32  ;;  %v382_v38 = vld [vmem:[%s3356_s1 + $0xae0] sm:$0xff]  ;;  %v216_v19 = vld [vmem:[%s3356_s1 + $0x5b0] sm:$0xff] }
  0x73   :  { %v511_v37 = vld [vmem:[%s3356_s1 + $0xee8] sm:$0xff]  ;;  %827 = vmatprep.subr.mxu1 %v515_v33  ;;  %v510_v39 = vld [vmem:[%s3356_s1 + $0xee0] sm:$0xff]  ;;  %757 = vmatpush2.msra.mxu0 %v386_v34  ;;  %v85_v20 = vld [vmem:[%s3356_s1 + $0x198] sm:$0xff] }
  0x74   :  { %828 = vmatpush2.msra.mxu1 %v514_v35  ;;  %v379_v40 = vld [vmem:[%s3356_s1 + $0xac8] sm:$0xff]  ;;  %758 = vmatprep.subr.mxu0 %v383_v36  ;;  %v378_v42 = vld [vmem:[%s3356_s1 + $0xac0] sm:$0xff]  ;;  %v213_v21 = vld [vmem:[%s3356_s1 + $0x598] sm:$0xff] }
  0x75   :  { %v507_v41 = vld [vmem:[%s3356_s1 + $0xec8] sm:$0xff]  ;;  %829 = vmatprep.subr.mxu1 %v511_v37  ;;  %v506_v43 = vld [vmem:[%s3356_s1 + $0xec0] sm:$0xff]  ;;  %759 = vmatpush2.msra.mxu0 %v382_v38  ;;  %v84_v22 = vld [vmem:[%s3356_s1 + $0x190] sm:$0xff] }
  0x76   :  { %830 = vmatpush2.msra.mxu1 %v510_v39  ;;  %v375_v44 = vld [vmem:[%s3356_s1 + $0xaa8] sm:$0xff]  ;;  %760 = vmatprep.subr.mxu0 %v379_v40  ;;  %v374_v46 = vld [vmem:[%s3356_s1 + $0xaa0] sm:$0xff]  ;;  %v212_v23 = vld [vmem:[%s3356_s1 + $0x590] sm:$0xff] }
  0x77   :  { %v503_v45 = vld [vmem:[%s3356_s1 + $0xea8] sm:$0xff]  ;;  %831 = vmatprep.subr.mxu1 %v507_v41  ;;  %v502_v47 = vld [vmem:[%s3356_s1 + $0xea0] sm:$0xff]  ;;  %761 = vmatpush2.msra.mxu0 %v378_v42  ;;  %v81_v24 = vld [vmem:[%s3356_s1 + $0x178] sm:$0xff] }
  0x78   :  { %832 = vmatpush2.msra.mxu1 %v506_v43  ;;  %v371_v48 = vld [vmem:[%s3356_s1 + $0xa88] sm:$0xff]  ;;  %762 = vmatprep.subr.mxu0 %v375_v44  ;;  %v370_v50 = vld [vmem:[%s3356_s1 + $0xa80] sm:$0xff]  ;;  %v209_v25 = vld [vmem:[%s3356_s1 + $0x578] sm:$0xff] }
  0x79   :  { %v499_v49 = vld [vmem:[%s3356_s1 + $0xe88] sm:$0xff]  ;;  %833 = vmatprep.subr.mxu1 %v503_v45  ;;  %v498_v51 = vld [vmem:[%s3356_s1 + $0xe80] sm:$0xff]  ;;  %763 = vmatpush2.msra.mxu0 %v374_v46  ;;  %v80_v26 = vld [vmem:[%s3356_s1 + $0x170] sm:$0xff] }
  0x7a   :  { %834 = vmatpush2.msra.mxu1 %v502_v47  ;;  %v367_v52 = vld [vmem:[%s3356_s1 + $0xa68] sm:$0xff]  ;;  %764 = vmatprep.subr.mxu0 %v371_v48  ;;  %v366_v54 = vld [vmem:[%s3356_s1 + $0xa60] sm:$0xff]  ;;  %v208_v27 = vld [vmem:[%s3356_s1 + $0x570] sm:$0xff] }
  0x7b   :  { %v495_v53 = vld [vmem:[%s3356_s1 + $0xe68] sm:$0xff]  ;;  %835 = vmatprep.subr.mxu1 %v499_v49  ;;  %v494_v55 = vld [vmem:[%s3356_s1 + $0xe60] sm:$0xff]  ;;  %765 = vmatpush2.msra.mxu0 %v370_v50  ;;  %v77_v28 = vld [vmem:[%s3356_s1 + $0x158] sm:$0xff] }
  0x7c   :  { %836 = vmatpush2.msra.mxu1 %v498_v51  ;;  %v363_v56 = vld [vmem:[%s3356_s1 + $0xa48] sm:$0xff]  ;;  %766 = vmatprep.subr.mxu0 %v367_v52  ;;  %v362_v58 = vld [vmem:[%s3356_s1 + $0xa40] sm:$0xff]  ;;  %v205_v29 = vld [vmem:[%s3356_s1 + $0x558] sm:$0xff] }
  0x7d   :  { %v491_v57 = vld [vmem:[%s3356_s1 + $0xe48] sm:$0xff]  ;;  %837 = vmatprep.subr.mxu1 %v495_v53  ;;  %v490_v59 = vld [vmem:[%s3356_s1 + $0xe40] sm:$0xff]  ;;  %767 = vmatpush2.msra.mxu0 %v366_v54  ;;  %v76_v30 = vld [vmem:[%s3356_s1 + $0x150] sm:$0xff] }
  0x7e   :  { %838 = vmatpush2.msra.mxu1 %v494_v55  ;;  %v359_v60 = vld [vmem:[%s3356_s1 + $0xa28] sm:$0xff]  ;;  %768 = vmatprep.subr.mxu0 %v363_v56  ;;  %v358_v62 = vld [vmem:[%s3356_s1 + $0xa20] sm:$0xff]  ;;  %v204_v31 = vld [vmem:[%s3356_s1 + $0x550] sm:$0xff] }
  0x7f   :  { %v487_v61 = vld [vmem:[%s3356_s1 + $0xe28] sm:$0xff]  ;;  %839 = vmatprep.subr.mxu1 %v491_v57  ;;  %v486_v63 = vld [vmem:[%s3356_s1 + $0xe20] sm:$0xff]  ;;  %769 = vmatpush2.msra.mxu0 %v362_v58  ;;  %v73_v32 = vld [vmem:[%s3356_s1 + $0x138] sm:$0xff] }
  0x80   :  { %840 = vmatpush2.msra.mxu1 %v490_v59  ;;  %v355_v0 = vld [vmem:[%s3356_s1 + $0xa08] sm:$0xff]  ;;  %770 = vmatprep.subr.mxu0 %v359_v60  ;;  %v354_v2 = vld [vmem:[%s3356_s1 + $0xa00] sm:$0xff]  ;;  %v201_v33 = vld [vmem:[%s3356_s1 + $0x538] sm:$0xff] }
  0x81   :  { %v483_v1 = vld [vmem:[%s3356_s1 + $0xe08] sm:$0xff]  ;;  %841 = vmatprep.subr.mxu1 %v487_v61  ;;  %771 = vmatpush2.msra.mxu0 %v358_v62  ;;  %v482_v4 = vld [vmem:[%s3356_s1 + $0xe00] sm:$0xff]  ;;  %v72_v34 = vld [vmem:[%s3356_s1 + $0x130] sm:$0xff] }
  0x82   :  { %v31_v3 = vld [vmem:[%s3357_s0 + $0x28] sm:$0xff]  ;;  %842 = vmatpush2.msra.mxu1 %v486_v63  ;;  %v30_v5 = vld [vmem:[%s3357_s0 + $0x20] sm:$0xff]  ;;  %772 = vmatprep.subr.mxu0 %v355_v0  ;;  %v200_v35 = vld [vmem:[%s3356_s1 + $0x530] sm:$0xff] }
  0x83   :  { %843 = vmatprep.subr.mxu1 %v483_v1  ;;  %773 = vmatpush2.msra.mxu0 %v354_v2  ;;  %v69_v36 = vld [vmem:[%s3356_s1 + $0x118] sm:$0xff]  ;;  %v68_v38 = vld [vmem:[%s3356_s1 + $0x110] sm:$0xff] }
  0x84   :  { %774 = vmatprep.mubr.f32.mxu0 %v31_v3  ;;  %844 = vmatpush2.msra.mxu1 %v482_v4  ;;  %v197_v37 = vld [vmem:[%s3356_s1 + $0x518] sm:$0xff]  ;;  %v196_v39 = vld [vmem:[%s3356_s1 + $0x510] sm:$0xff] }
  0x85   :  { %775 = vmatmul.mubr.f32.vlgmr.msra.gmra.mxu0 %v30_v5  ;;  %845 = vmatprep.mubr.f32.mxu1 %v33_v6  ;;  %v65_v40 = vld [vmem:[%s3356_s1 + $0xf8] sm:$0xff]  ;;  %v64_v42 = vld [vmem:[%s3356_s1 + $0xf0] sm:$0xff] }
  0x86   :  { %852 = vmatprep.subr.mxu0 %v97_v7  ;;  %923 = vmatprep.subr.mxu1 %v225_v8  ;;  %v193_v41 = vld [vmem:[%s3356_s1 + $0x4f8] sm:$0xff]  ;;  %v192_v43 = vld [vmem:[%s3356_s1 + $0x4f0] sm:$0xff] }
  0x87   :  { %846 = vmatmul.mubr.f32.vlgmr.msra.gmra.mxu1 %v32_v9  ;;  %853 = vmatpush1.msra.mxu0 %v96_v10  ;;  %v61_v44 = vld [vmem:[%s3356_s1 + $0xd8] sm:$0xff]  ;;  %v60_v46 = vld [vmem:[%s3356_s1 + $0xd0] sm:$0xff] }
  0x88   :  { %924 = vmatpush1.msra.mxu1 %v224_v11  ;;  %854 = vmatprep.subr.mxu0 %v93_v12  ;;  %v189_v45 = vld [vmem:[%s3356_s1 + $0x4d8] sm:$0xff]  ;;  %v188_v47 = vld [vmem:[%s3356_s1 + $0x4d0] sm:$0xff] }
  0x89   :  { %925 = vmatprep.subr.mxu1 %v221_v13  ;;  %855 = vmatpush1.msra.mxu0 %v92_v14  ;;  %v57_v48 = vld [vmem:[%s3356_s1 + $0xb8] sm:$0xff]  ;;  %v56_v50 = vld [vmem:[%s3356_s1 + $0xb0] sm:$0xff] }
  0x8a   :  { %926 = vmatpush1.msra.mxu1 %v220_v15  ;;  %856 = vmatprep.subr.mxu0 %v89_v16  ;;  %v185_v49 = vld [vmem:[%s3356_s1 + $0x4b8] sm:$0xff]  ;;  %v184_v51 = vld [vmem:[%s3356_s1 + $0x4b0] sm:$0xff] }
  0x8b   :  { %927 = vmatprep.subr.mxu1 %v217_v17  ;;  %857 = vmatpush1.msra.mxu0 %v88_v18  ;;  %v53_v52 = vld [vmem:[%s3356_s1 + $0x98] sm:$0xff]  ;;  %v52_v54 = vld [vmem:[%s3356_s1 + $0x90] sm:$0xff] }
  0x8c   :  { %928 = vmatpush1.msra.mxu1 %v216_v19  ;;  %858 = vmatprep.subr.mxu0 %v85_v20  ;;  %v181_v53 = vld [vmem:[%s3356_s1 + $0x498] sm:$0xff]  ;;  %v180_v55 = vld [vmem:[%s3356_s1 + $0x490] sm:$0xff] }
  0x8d   :  { %929 = vmatprep.subr.mxu1 %v213_v21  ;;  %859 = vmatpush1.msra.mxu0 %v84_v22  ;;  %v49_v56 = vld [vmem:[%s3356_s1 + $0x78] sm:$0xff]  ;;  %v48_v58 = vld [vmem:[%s3356_s1 + $0x70] sm:$0xff] }
  0x8e   :  { %930 = vmatpush1.msra.mxu1 %v212_v23  ;;  %860 = vmatprep.subr.mxu0 %v81_v24  ;;  %v177_v57 = vld [vmem:[%s3356_s1 + $0x478] sm:$0xff]  ;;  %v176_v59 = vld [vmem:[%s3356_s1 + $0x470] sm:$0xff] }
  0x8f   :  { %931 = vmatprep.subr.mxu1 %v209_v25  ;;  %861 = vmatpush1.msra.mxu0 %v80_v26  ;;  %v45_v60 = vld [vmem:[%s3356_s1 + $0x58] sm:$0xff]  ;;  %v44_v62 = vld [vmem:[%s3356_s1 + $0x50] sm:$0xff] }
  0x90   :  { %932 = vmatpush1.msra.mxu1 %v208_v27  ;;  %862 = vmatprep.subr.mxu0 %v77_v28  ;;  %v173_v61 = vld [vmem:[%s3356_s1 + $0x458] sm:$0xff]  ;;  %v172_v63 = vld [vmem:[%s3356_s1 + $0x450] sm:$0xff] }
  0x91   :  { %933 = vmatprep.subr.mxu1 %v205_v29  ;;  %863 = vmatpush1.msra.mxu0 %v76_v30  ;;  %v41_v0 = vld [vmem:[%s3356_s1 + $0x38] sm:$0xff]  ;;  %v40_v2 = vld [vmem:[%s3356_s1 + $0x30] sm:$0xff] }
  0x92   :  { %934 = vmatpush1.msra.mxu1 %v204_v31  ;;  %864 = vmatprep.subr.mxu0 %v73_v32  ;;  %v169_v1 = vld [vmem:[%s3356_s1 + $0x438] sm:$0xff]  ;;  %v168_v3 = vld [vmem:[%s3356_s1 + $0x430] sm:$0xff] }
  0x93   :  { %935 = vmatprep.subr.mxu1 %v201_v33  ;;  %865 = vmatpush1.msra.mxu0 %v72_v34  ;;  %v37_v4 = vld [vmem:[%s3356_s1 + $0x18] sm:$0xff]  ;;  %v36_v6 = vld [vmem:[%s3356_s1 + $0x10] sm:$0xff] }
  0x94   :  { %936 = vmatpush1.msra.mxu1 %v200_v35  ;;  %866 = vmatprep.subr.mxu0 %v69_v36  ;;  %v165_v5 = vld [vmem:[%s3356_s1 + $0x418] sm:$0xff]  ;;  %v164_v7 = vld [vmem:[%s3356_s1 + $0x410] sm:$0xff] }
  0x95   :  { %937 = vmatprep.subr.mxu1 %v197_v37  ;;  %867 = vmatpush1.msra.mxu0 %v68_v38  ;;  %v161_v8 = vld [vmem:[%s3356_s1 + $0x3f8] sm:$0xff]  ;;  %v160_v10 = vld [vmem:[%s3356_s1 + $0x3f0] sm:$0xff] }
  0x96   :  { %938 = vmatpush1.msra.mxu1 %v196_v39  ;;  %868 = vmatprep.subr.mxu0 %v65_v40  ;;  %v289_v9 = vld [vmem:[%s3356_s1 + $0x7f8] sm:$0xff]  ;;  %v288_v11 = vld [vmem:[%s3356_s1 + $0x7f0] sm:$0xff] }
  0x97   :  { %939 = vmatprep.subr.mxu1 %v193_v41  ;;  %869 = vmatpush1.msra.mxu0 %v64_v42  ;;  %v157_v12 = vld [vmem:[%s3356_s1 + $0x3d8] sm:$0xff]  ;;  %v156_v14 = vld [vmem:[%s3356_s1 + $0x3d0] sm:$0xff] }
  0x98   :  { %940 = vmatpush1.msra.mxu1 %v192_v43  ;;  %870 = vmatprep.subr.mxu0 %v61_v44  ;;  %v285_v13 = vld [vmem:[%s3356_s1 + $0x7d8] sm:$0xff]  ;;  %v284_v15 = vld [vmem:[%s3356_s1 + $0x7d0] sm:$0xff] }
  0x99   :  { %941 = vmatprep.subr.mxu1 %v189_v45  ;;  %871 = vmatpush1.msra.mxu0 %v60_v46  ;;  %v153_v16 = vld [vmem:[%s3356_s1 + $0x3b8] sm:$0xff]  ;;  %v152_v18 = vld [vmem:[%s3356_s1 + $0x3b0] sm:$0xff] }
  0x9a   :  { %942 = vmatpush1.msra.mxu1 %v188_v47  ;;  %872 = vmatprep.subr.mxu0 %v57_v48  ;;  %v281_v17 = vld [vmem:[%s3356_s1 + $0x7b8] sm:$0xff]  ;;  %v280_v19 = vld [vmem:[%s3356_s1 + $0x7b0] sm:$0xff] }
  0x9b   :  { %943 = vmatprep.subr.mxu1 %v185_v49  ;;  %873 = vmatpush1.msra.mxu0 %v56_v50  ;;  %v149_v20 = vld [vmem:[%s3356_s1 + $0x398] sm:$0xff]  ;;  %v148_v22 = vld [vmem:[%s3356_s1 + $0x390] sm:$0xff] }
  0x9c   :  { %944 = vmatpush1.msra.mxu1 %v184_v51  ;;  %874 = vmatprep.subr.mxu0 %v53_v52  ;;  %v277_v21 = vld [vmem:[%s3356_s1 + $0x798] sm:$0xff]  ;;  %v276_v23 = vld [vmem:[%s3356_s1 + $0x790] sm:$0xff] }
  0x9d   :  { %945 = vmatprep.subr.mxu1 %v181_v53  ;;  %875 = vmatpush1.msra.mxu0 %v52_v54  ;;  %v145_v24 = vld [vmem:[%s3356_s1 + $0x378] sm:$0xff]  ;;  %v144_v26 = vld [vmem:[%s3356_s1 + $0x370] sm:$0xff] }
  0x9e   :  { %946 = vmatpush1.msra.mxu1 %v180_v55  ;;  %876 = vmatprep.subr.mxu0 %v49_v56  ;;  %v273_v25 = vld [vmem:[%s3356_s1 + $0x778] sm:$0xff]  ;;  %v272_v27 = vld [vmem:[%s3356_s1 + $0x770] sm:$0xff] }
  0x9f   :  { %947 = vmatprep.subr.mxu1 %v177_v57  ;;  %877 = vmatpush1.msra.mxu0 %v48_v58  ;;  %v141_v28 = vld [vmem:[%s3356_s1 + $0x358] sm:$0xff]  ;;  %v140_v30 = vld [vmem:[%s3356_s1 + $0x350] sm:$0xff] }
  0xa0   :  { %948 = vmatpush1.msra.mxu1 %v176_v59  ;;  %878 = vmatprep.subr.mxu0 %v45_v60  ;;  %v269_v29 = vld [vmem:[%s3356_s1 + $0x758] sm:$0xff]  ;;  %v268_v31 = vld [vmem:[%s3356_s1 + $0x750] sm:$0xff] }
  0xa1   :  { %949 = vmatprep.subr.mxu1 %v173_v61  ;;  %879 = vmatpush1.msra.mxu0 %v44_v62  ;;  %v137_v32 = vld [vmem:[%s3356_s1 + $0x338] sm:$0xff]  ;;  %v136_v34 = vld [vmem:[%s3356_s1 + $0x330] sm:$0xff] }
  0xa2   :  { %950 = vmatpush1.msra.mxu1 %v172_v63  ;;  %880 = vmatprep.subr.mxu0 %v41_v0  ;;  %v265_v33 = vld [vmem:[%s3356_s1 + $0x738] sm:$0xff]  ;;  %v264_v35 = vld [vmem:[%s3356_s1 + $0x730] sm:$0xff] }
  0xa3   :  { %951 = vmatprep.subr.mxu1 %v169_v1  ;;  %881 = vmatpush1.msra.mxu0 %v40_v2  ;;  %v133_v36 = vld [vmem:[%s3356_s1 + $0x318] sm:$0xff]  ;;  %v132_v38 = vld [vmem:[%s3356_s1 + $0x310] sm:$0xff] }
  0xa4   :  { %952 = vmatpush1.msra.mxu1 %v168_v3  ;;  %882 = vmatprep.subr.mxu0 %v37_v4  ;;  %v261_v37 = vld [vmem:[%s3356_s1 + $0x718] sm:$0xff]  ;;  %v260_v39 = vld [vmem:[%s3356_s1 + $0x710] sm:$0xff] }
  0xa5   :  { %953 = vmatprep.subr.mxu1 %v165_v5  ;;  %883 = vmatpush1.msra.mxu0 %v36_v6  ;;  %v129_v40 = vld [vmem:[%s3356_s1 + $0x2f8] sm:$0xff]  ;;  %v128_v42 = vld [vmem:[%s3356_s1 + $0x2f0] sm:$0xff] }
  0xa6   :  { %954 = vmatpush1.msra.mxu1 %v164_v7  ;;  %884 = vmatprep.subr.mxu0 %v161_v8  ;;  %v257_v41 = vld [vmem:[%s3356_s1 + $0x6f8] sm:$0xff]  ;;  %v256_v43 = vld [vmem:[%s3356_s1 + $0x6f0] sm:$0xff] }
  0xa7   :  { %955 = vmatprep.subr.mxu1 %v289_v9  ;;  %885 = vmatpush2.msra.mxu0 %v160_v10  ;;  %v125_v44 = vld [vmem:[%s3356_s1 + $0x2d8] sm:$0xff]  ;;  %v124_v46 = vld [vmem:[%s3356_s1 + $0x2d0] sm:$0xff]  ;;  %v1515_v9 = vld [vmem:[%s3357_s0 + $0x8] sm:$0xff] }
  0xa8   :  { %956 = vmatpush2.msra.mxu1 %v288_v11  ;;  %886 = vmatprep.subr.mxu0 %v157_v12  ;;  %v253_v45 = vld [vmem:[%s3356_s1 + $0x6d8] sm:$0xff]  ;;  %v252_v47 = vld [vmem:[%s3356_s1 + $0x6d0] sm:$0xff]  ;;  %v1516_v11 = vld [vmem:[%s3357_s0] sm:$0xff] }
  0xa9   :  { %957 = vmatprep.subr.mxu1 %v285_v13  ;;  %887 = vmatpush2.msra.mxu0 %v156_v14  ;;  %v121_v48 = vld [vmem:[%s3356_s1 + $0x2b8] sm:$0xff]  ;;  %v120_v50 = vld [vmem:[%s3356_s1 + $0x2b0] sm:$0xff] }
  0xaa   :  { %958 = vmatpush2.msra.mxu1 %v284_v15  ;;  %888 = vmatprep.subr.mxu0 %v153_v16  ;;  %v249_v49 = vld [vmem:[%s3356_s1 + $0x6b8] sm:$0xff]  ;;  %v248_v51 = vld [vmem:[%s3356_s1 + $0x6b0] sm:$0xff] }
  0xab   :  { %959 = vmatprep.subr.mxu1 %v281_v17  ;;  %889 = vmatpush2.msra.mxu0 %v152_v18  ;;  %v117_v52 = vld [vmem:[%s3356_s1 + $0x298] sm:$0xff]  ;;  %v116_v54 = vld [vmem:[%s3356_s1 + $0x290] sm:$0xff] }
  0xac   :  { %960 = vmatpush2.msra.mxu1 %v280_v19  ;;  %890 = vmatprep.subr.mxu0 %v149_v20  ;;  %v245_v53 = vld [vmem:[%s3356_s1 + $0x698] sm:$0xff]  ;;  %v244_v55 = vld [vmem:[%s3356_s1 + $0x690] sm:$0xff] }
  0xad   :  { %961 = vmatprep.subr.mxu1 %v277_v21  ;;  %891 = vmatpush2.msra.mxu0 %v148_v22  ;;  %v113_v56 = vld [vmem:[%s3356_s1 + $0x278] sm:$0xff]  ;;  %v112_v58 = vld [vmem:[%s3356_s1 + $0x270] sm:$0xff] }
  0xae   :  { %962 = vmatpush2.msra.mxu1 %v276_v23  ;;  %892 = vmatprep.subr.mxu0 %v145_v24  ;;  %v241_v57 = vld [vmem:[%s3356_s1 + $0x678] sm:$0xff]  ;;  %v240_v59 = vld [vmem:[%s3356_s1 + $0x670] sm:$0xff] }
  0xaf   :  { %963 = vmatprep.subr.mxu1 %v273_v25  ;;  %893 = vmatpush2.msra.mxu0 %v144_v26  ;;  %v109_v60 = vld [vmem:[%s3356_s1 + $0x258] sm:$0xff]  ;;  %v108_v62 = vld [vmem:[%s3356_s1 + $0x250] sm:$0xff] }
  0xb0   :  { %964 = vmatpush2.msra.mxu1 %v272_v27  ;;  %894 = vmatprep.subr.mxu0 %v141_v28  ;;  %v237_v61 = vld [vmem:[%s3356_s1 + $0x658] sm:$0xff]  ;;  %v236_v63 = vld [vmem:[%s3356_s1 + $0x650] sm:$0xff] }
  0xb1   :  { %965 = vmatprep.subr.mxu1 %v269_v29  ;;  %895 = vmatpush2.msra.mxu0 %v140_v30  ;;  %v105_v0 = vld [vmem:[%s3356_s1 + $0x238] sm:$0xff]  ;;  %v104_v2 = vld [vmem:[%s3356_s1 + $0x230] sm:$0xff] }
  0xb2   :  { %966 = vmatpush2.msra.mxu1 %v268_v31  ;;  %896 = vmatprep.subr.mxu0 %v137_v32  ;;  %v233_v1 = vld [vmem:[%s3356_s1 + $0x638] sm:$0xff]  ;;  %v232_v3 = vld [vmem:[%s3356_s1 + $0x630] sm:$0xff] }
  0xb3   :  { %967 = vmatprep.subr.mxu1 %v265_v33  ;;  %897 = vmatpush2.msra.mxu0 %v136_v34  ;;  %v101_v4 = vld [vmem:[%s3356_s1 + $0x218] sm:$0xff]  ;;  %v100_v6 = vld [vmem:[%s3356_s1 + $0x210] sm:$0xff] }
  0xb4   :  { %968 = vmatpush2.msra.mxu1 %v264_v35  ;;  %898 = vmatprep.subr.mxu0 %v133_v36  ;;  %v229_v5 = vld [vmem:[%s3356_s1 + $0x618] sm:$0xff]  ;;  %v228_v7 = vld [vmem:[%s3356_s1 + $0x610] sm:$0xff] }
  0xb5   :  { %969 = vmatprep.subr.mxu1 %v261_v37  ;;  %899 = vmatpush2.msra.mxu0 %v132_v38  ;;  %v353_v8 = vld [vmem:[%s3356_s1 + $0x9f8] sm:$0xff]  ;;  %v352_v12 = vld [vmem:[%s3356_s1 + $0x9f0] sm:$0xff] }
  0xb6   :  { %970 = vmatpush2.msra.mxu1 %v260_v39  ;;  %900 = vmatprep.subr.mxu0 %v129_v40  ;;  %v481_v10 = vld [vmem:[%s3356_s1 + $0xdf8] sm:$0xff]  ;;  %v480_v13 = vld [vmem:[%s3356_s1 + $0xdf0] sm:$0xff] }
  0xb7   :  { %971 = vmatprep.subr.mxu1 %v257_v41  ;;  %901 = vmatpush2.msra.mxu0 %v128_v42  ;;  %v1517_v14 = vld [vmem:[%s3357_s0 + $0x18] sm:$0xff]  ;;  %v1518_v17 = vld [vmem:[%s3357_s0 + $0x10] sm:$0xff] }
  0xb8   :  { %972 = vmatpush2.msra.mxu1 %v256_v43  ;;  %902 = vmatprep.subr.mxu0 %v125_v44  ;;  %v349_v15 = vld [vmem:[%s3356_s1 + $0x9d8] sm:$0xff]  ;;  %v348_v18 = vld [vmem:[%s3356_s1 + $0x9d0] sm:$0xff] }
  0xb9   :  { %973 = vmatprep.subr.mxu1 %v253_v45  ;;  %903 = vmatpush2.msra.mxu0 %v124_v46  ;;  %v477_v16 = vld [vmem:[%s3356_s1 + $0xdd8] sm:$0xff]  ;;  %v476_v19 = vld [vmem:[%s3356_s1 + $0xdd0] sm:$0xff] }
  0xba   :  { %974 = vmatpush2.msra.mxu1 %v252_v47  ;;  %904 = vmatprep.subr.mxu0 %v121_v48  ;;  %v345_v20 = vld [vmem:[%s3356_s1 + $0x9b8] sm:$0xff]  ;;  %v344_v22 = vld [vmem:[%s3356_s1 + $0x9b0] sm:$0xff] }
  0xbb   :  { %975 = vmatprep.subr.mxu1 %v249_v49  ;;  %905 = vmatpush2.msra.mxu0 %v120_v50  ;;  %v473_v21 = vld [vmem:[%s3356_s1 + $0xdb8] sm:$0xff]  ;;  %v472_v23 = vld [vmem:[%s3356_s1 + $0xdb0] sm:$0xff] }
  0xbc   :  { %976 = vmatpush2.msra.mxu1 %v248_v51  ;;  %906 = vmatprep.subr.mxu0 %v117_v52  ;;  %v341_v24 = vld [vmem:[%s3356_s1 + $0x998] sm:$0xff]  ;;  %v340_v26 = vld [vmem:[%s3356_s1 + $0x990] sm:$0xff] }
  0xbd   :  { %977 = vmatprep.subr.mxu1 %v245_v53  ;;  %907 = vmatpush2.msra.mxu0 %v116_v54  ;;  %v469_v25 = vld [vmem:[%s3356_s1 + $0xd98] sm:$0xff]  ;;  %v468_v27 = vld [vmem:[%s3356_s1 + $0xd90] sm:$0xff] }
  0xbe   :  { %978 = vmatpush2.msra.mxu1 %v244_v55  ;;  %908 = vmatprep.subr.mxu0 %v113_v56  ;;  %v337_v28 = vld [vmem:[%s3356_s1 + $0x978] sm:$0xff]  ;;  %v336_v30 = vld [vmem:[%s3356_s1 + $0x970] sm:$0xff] }
  0xbf   :  { %979 = vmatprep.subr.mxu1 %v241_v57  ;;  %909 = vmatpush2.msra.mxu0 %v112_v58  ;;  %v465_v29 = vld [vmem:[%s3356_s1 + $0xd78] sm:$0xff]  ;;  %v464_v31 = vld [vmem:[%s3356_s1 + $0xd70] sm:$0xff] }
  0xc0   :  { %980 = vmatpush2.msra.mxu1 %v240_v59  ;;  %910 = vmatprep.subr.mxu0 %v109_v60  ;;  %v333_v32 = vld [vmem:[%s3356_s1 + $0x958] sm:$0xff]  ;;  %v332_v34 = vld [vmem:[%s3356_s1 + $0x950] sm:$0xff] }
  0xc1   :  { %981 = vmatprep.subr.mxu1 %v237_v61  ;;  %911 = vmatpush2.msra.mxu0 %v108_v62  ;;  %v461_v33 = vld [vmem:[%s3356_s1 + $0xd58] sm:$0xff]  ;;  %v460_v35 = vld [vmem:[%s3356_s1 + $0xd50] sm:$0xff] }
  0xc2   :  { %982 = vmatpush2.msra.mxu1 %v236_v63  ;;  %912 = vmatprep.subr.mxu0 %v105_v0  ;;  %v329_v36 = vld [vmem:[%s3356_s1 + $0x938] sm:$0xff]  ;;  %v328_v38 = vld [vmem:[%s3356_s1 + $0x930] sm:$0xff] }
  0xc3   :  { %983 = vmatprep.subr.mxu1 %v233_v1  ;;  %913 = vmatpush2.msra.mxu0 %v104_v2  ;;  %v457_v37 = vld [vmem:[%s3356_s1 + $0xd38] sm:$0xff]  ;;  %v456_v39 = vld [vmem:[%s3356_s1 + $0xd30] sm:$0xff] }
  0xc4   :  { %984 = vmatpush2.msra.mxu1 %v232_v3  ;;  %914 = vmatprep.subr.mxu0 %v101_v4  ;;  %v325_v40 = vld [vmem:[%s3356_s1 + $0x918] sm:$0xff]  ;;  %v324_v42 = vld [vmem:[%s3356_s1 + $0x910] sm:$0xff] }
  0xc5   :  { %985 = vmatprep.subr.mxu1 %v229_v5  ;;  %915 = vmatpush2.msra.mxu0 %v100_v6  ;;  %v453_v41 = vld [vmem:[%s3356_s1 + $0xd18] sm:$0xff]  ;;  %v452_v43 = vld [vmem:[%s3356_s1 + $0xd10] sm:$0xff] }
  0xc6   :  { %916 = vmatprep.mubr.f32.mxu0 %v1515_v9  ;;  %986 = vmatpush2.msra.mxu1 %v228_v7  ;;  %v321_v44 = vld [vmem:[%s3356_s1 + $0x8f8] sm:$0xff]  ;;  %v320_v46 = vld [vmem:[%s3356_s1 + $0x8f0] sm:$0xff] }
  0xc7   :  { %917 = vmatmul.mubr.f32.vlgmr.msra.gmra.mxu0 %v1516_v11  ;;  %987 = vmatprep.mubr.f32.mxu1 %v1517_v14  ;;  %v449_v45 = vld [vmem:[%s3356_s1 + $0xcf8] sm:$0xff]  ;;  %v448_v47 = vld [vmem:[%s3356_s1 + $0xcf0] sm:$0xff] }
  0xc8   :  { %994 = vmatprep.subr.mxu0 %v353_v8  ;;  %1065 = vmatprep.subr.mxu1 %v481_v10  ;;  %v317_v48 = vld [vmem:[%s3356_s1 + $0x8d8] sm:$0xff]  ;;  %v316_v50 = vld [vmem:[%s3356_s1 + $0x8d0] sm:$0xff] }
  0xc9   :  { %988 = vmatmul.mubr.f32.vlgmr.msra.gmra.mxu1 %v1518_v17  ;;  %995 = vmatpush1.msra.mxu0 %v352_v12  ;;  %v445_v49 = vld [vmem:[%s3356_s1 + $0xcd8] sm:$0xff]  ;;  %v444_v51 = vld [vmem:[%s3356_s1 + $0xcd0] sm:$0xff] }
  0xca   :  { %1066 = vmatpush1.msra.mxu1 %v480_v13  ;;  %996 = vmatprep.subr.mxu0 %v349_v15  ;;  %v313_v52 = vld [vmem:[%s3356_s1 + $0x8b8] sm:$0xff]  ;;  %v312_v54 = vld [vmem:[%s3356_s1 + $0x8b0] sm:$0xff] }
  0xcb   :  { %1067 = vmatprep.subr.mxu1 %v477_v16  ;;  %997 = vmatpush1.msra.mxu0 %v348_v18  ;;  %v441_v53 = vld [vmem:[%s3356_s1 + $0xcb8] sm:$0xff]  ;;  %v440_v55 = vld [vmem:[%s3356_s1 + $0xcb0] sm:$0xff] }
  0xcc   :  { %1068 = vmatpush1.msra.mxu1 %v476_v19  ;;  %998 = vmatprep.subr.mxu0 %v345_v20  ;;  %v309_v56 = vld [vmem:[%s3356_s1 + $0x898] sm:$0xff]  ;;  %v308_v58 = vld [vmem:[%s3356_s1 + $0x890] sm:$0xff] }
  0xcd   :  { %1069 = vmatprep.subr.mxu1 %v473_v21  ;;  %999 = vmatpush1.msra.mxu0 %v344_v22  ;;  %v437_v57 = vld [vmem:[%s3356_s1 + $0xc98] sm:$0xff]  ;;  %v436_v59 = vld [vmem:[%s3356_s1 + $0xc90] sm:$0xff] }
  0xce   :  { %1070 = vmatpush1.msra.mxu1 %v472_v23  ;;  %1000 = vmatprep.subr.mxu0 %v341_v24  ;;  %v305_v60 = vld [vmem:[%s3356_s1 + $0x878] sm:$0xff]  ;;  %v304_v62 = vld [vmem:[%s3356_s1 + $0x870] sm:$0xff] }
  0xcf   :  { %1071 = vmatprep.subr.mxu1 %v469_v25  ;;  %1001 = vmatpush1.msra.mxu0 %v340_v26  ;;  %v433_v61 = vld [vmem:[%s3356_s1 + $0xc78] sm:$0xff]  ;;  %v432_v63 = vld [vmem:[%s3356_s1 + $0xc70] sm:$0xff] }
  0xd0   :  { %1072 = vmatpush1.msra.mxu1 %v468_v27  ;;  %1002 = vmatprep.subr.mxu0 %v337_v28  ;;  %v301_v0 = vld [vmem:[%s3356_s1 + $0x858] sm:$0xff]  ;;  %v300_v2 = vld [vmem:[%s3356_s1 + $0x850] sm:$0xff] }
  0xd1   :  { %1073 = vmatprep.subr.mxu1 %v465_v29  ;;  %1003 = vmatpush1.msra.mxu0 %v336_v30  ;;  %v429_v1 = vld [vmem:[%s3356_s1 + $0xc58] sm:$0xff]  ;;  %v428_v3 = vld [vmem:[%s3356_s1 + $0xc50] sm:$0xff] }
  0xd2   :  { %1074 = vmatpush1.msra.mxu1 %v464_v31  ;;  %1004 = vmatprep.subr.mxu0 %v333_v32  ;;  %v297_v4 = vld [vmem:[%s3356_s1 + $0x838] sm:$0xff]  ;;  %v296_v6 = vld [vmem:[%s3356_s1 + $0x830] sm:$0xff] }
  0xd3   :  { %1075 = vmatprep.subr.mxu1 %v461_v33  ;;  %1005 = vmatpush1.msra.mxu0 %v332_v34  ;;  %v425_v5 = vld [vmem:[%s3356_s1 + $0xc38] sm:$0xff]  ;;  %v424_v7 = vld [vmem:[%s3356_s1 + $0xc30] sm:$0xff] }
  0xd4   :  { %1076 = vmatpush1.msra.mxu1 %v460_v35  ;;  %1006 = vmatprep.subr.mxu0 %v329_v36  ;;  %v293_v8 = vld [vmem:[%s3356_s1 + $0x818] sm:$0xff]  ;;  %v292_v10 = vld [vmem:[%s3356_s1 + $0x810] sm:$0xff] }
  0xd5   :  { %1077 = vmatprep.subr.mxu1 %v457_v37  ;;  %1007 = vmatpush1.msra.mxu0 %v328_v38  ;;  %v421_v9 = vld [vmem:[%s3356_s1 + $0xc18] sm:$0xff]  ;;  %v420_v11 = vld [vmem:[%s3356_s1 + $0xc10] sm:$0xff] }
  0xd6   :  { %1078 = vmatpush1.msra.mxu1 %v456_v39  ;;  %1008 = vmatprep.subr.mxu0 %v325_v40  ;;  %v417_v12 = vld [vmem:[%s3356_s1 + $0xbf8] sm:$0xff]  ;;  %v416_v14 = vld [vmem:[%s3356_s1 + $0xbf0] sm:$0xff] }
  0xd7   :  { %1079 = vmatprep.subr.mxu1 %v453_v41  ;;  %1009 = vmatpush1.msra.mxu0 %v324_v42  ;;  %v545_v13 = vld [vmem:[%s3356_s1 + $0xff8] sm:$0xff]  ;;  %v544_v15 = vld [vmem:[%s3356_s1 + $0xff0] sm:$0xff] }
  0xd8   :  { %1080 = vmatpush1.msra.mxu1 %v452_v43  ;;  %1010 = vmatprep.subr.mxu0 %v321_v44  ;;  %v413_v16 = vld [vmem:[%s3356_s1 + $0xbd8] sm:$0xff]  ;;  %v412_v18 = vld [vmem:[%s3356_s1 + $0xbd0] sm:$0xff] }
  0xd9   :  { %1081 = vmatprep.subr.mxu1 %v449_v45  ;;  %1011 = vmatpush1.msra.mxu0 %v320_v46  ;;  %v541_v17 = vld [vmem:[%s3356_s1 + $0xfd8] sm:$0xff]  ;;  %v540_v19 = vld [vmem:[%s3356_s1 + $0xfd0] sm:$0xff] }
  0xda   :  { %1082 = vmatpush1.msra.mxu1 %v448_v47  ;;  %1012 = vmatprep.subr.mxu0 %v317_v48  ;;  %v409_v20 = vld [vmem:[%s3356_s1 + $0xbb8] sm:$0xff]  ;;  %v408_v22 = vld [vmem:[%s3356_s1 + $0xbb0] sm:$0xff] }
  0xdb   :  { %1083 = vmatprep.subr.mxu1 %v445_v49  ;;  %1013 = vmatpush1.msra.mxu0 %v316_v50  ;;  %v537_v21 = vld [vmem:[%s3356_s1 + $0xfb8] sm:$0xff]  ;;  %v536_v23 = vld [vmem:[%s3356_s1 + $0xfb0] sm:$0xff] }
  0xdc   :  { %1084 = vmatpush1.msra.mxu1 %v444_v51  ;;  %1014 = vmatprep.subr.mxu0 %v313_v52  ;;  %v405_v24 = vld [vmem:[%s3356_s1 + $0xb98] sm:$0xff]  ;;  %v404_v26 = vld [vmem:[%s3356_s1 + $0xb90] sm:$0xff] }
  0xdd   :  { %1085 = vmatprep.subr.mxu1 %v441_v53  ;;  %1015 = vmatpush1.msra.mxu0 %v312_v54  ;;  %v533_v25 = vld [vmem:[%s3356_s1 + $0xf98] sm:$0xff]  ;;  %v532_v27 = vld [vmem:[%s3356_s1 + $0xf90] sm:$0xff] }
  0xde   :  { %1086 = vmatpush1.msra.mxu1 %v440_v55  ;;  %1016 = vmatprep.subr.mxu0 %v309_v56  ;;  %v401_v28 = vld [vmem:[%s3356_s1 + $0xb78] sm:$0xff]  ;;  %v400_v30 = vld [vmem:[%s3356_s1 + $0xb70] sm:$0xff] }
  0xdf   :  { %1087 = vmatprep.subr.mxu1 %v437_v57  ;;  %1017 = vmatpush1.msra.mxu0 %v308_v58  ;;  %v529_v29 = vld [vmem:[%s3356_s1 + $0xf78] sm:$0xff]  ;;  %v528_v31 = vld [vmem:[%s3356_s1 + $0xf70] sm:$0xff] }
  0xe0   :  { %1088 = vmatpush1.msra.mxu1 %v436_v59  ;;  %1018 = vmatprep.subr.mxu0 %v305_v60  ;;  %v397_v32 = vld [vmem:[%s3356_s1 + $0xb58] sm:$0xff]  ;;  %v396_v34 = vld [vmem:[%s3356_s1 + $0xb50] sm:$0xff] }
  0xe1   :  { %1089 = vmatprep.subr.mxu1 %v433_v61  ;;  %1019 = vmatpush1.msra.mxu0 %v304_v62  ;;  %v525_v33 = vld [vmem:[%s3356_s1 + $0xf58] sm:$0xff]  ;;  %v524_v35 = vld [vmem:[%s3356_s1 + $0xf50] sm:$0xff] }
  0xe2   :  { %1090 = vmatpush1.msra.mxu1 %v432_v63  ;;  %1020 = vmatprep.subr.mxu0 %v301_v0  ;;  %v393_v36 = vld [vmem:[%s3356_s1 + $0xb38] sm:$0xff]  ;;  %v392_v38 = vld [vmem:[%s3356_s1 + $0xb30] sm:$0xff] }
  0xe3   :  { %1091 = vmatprep.subr.mxu1 %v429_v1  ;;  %1021 = vmatpush1.msra.mxu0 %v300_v2  ;;  %v521_v37 = vld [vmem:[%s3356_s1 + $0xf38] sm:$0xff]  ;;  %v520_v39 = vld [vmem:[%s3356_s1 + $0xf30] sm:$0xff] }
  0xe4   :  { %1092 = vmatpush1.msra.mxu1 %v428_v3  ;;  %1022 = vmatprep.subr.mxu0 %v297_v4  ;;  %v389_v40 = vld [vmem:[%s3356_s1 + $0xb18] sm:$0xff]  ;;  %v388_v42 = vld [vmem:[%s3356_s1 + $0xb10] sm:$0xff] }
  0xe5   :  { %1093 = vmatprep.subr.mxu1 %v425_v5  ;;  %1023 = vmatpush1.msra.mxu0 %v296_v6  ;;  %v517_v41 = vld [vmem:[%s3356_s1 + $0xf18] sm:$0xff]  ;;  %v516_v43 = vld [vmem:[%s3356_s1 + $0xf10] sm:$0xff] }
  0xe6   :  { %1094 = vmatpush1.msra.mxu1 %v424_v7  ;;  %1024 = vmatprep.subr.mxu0 %v293_v8  ;;  %v385_v44 = vld [vmem:[%s3356_s1 + $0xaf8] sm:$0xff]  ;;  %v384_v46 = vld [vmem:[%s3356_s1 + $0xaf0] sm:$0xff] }
  0xe7   :  { %1095 = vmatprep.subr.mxu1 %v421_v9  ;;  %1025 = vmatpush1.msra.mxu0 %v292_v10  ;;  %v513_v45 = vld [vmem:[%s3356_s1 + $0xef8] sm:$0xff]  ;;  %v512_v47 = vld [vmem:[%s3356_s1 + $0xef0] sm:$0xff] }
  0xe8   :  { %1096 = vmatpush1.msra.mxu1 %v420_v11  ;;  %1026 = vmatprep.subr.mxu0 %v417_v12  ;;  %v381_v48 = vld [vmem:[%s3356_s1 + $0xad8] sm:$0xff]  ;;  %v380_v50 = vld [vmem:[%s3356_s1 + $0xad0] sm:$0xff]  ;;  %v1519_v12 = vld [vmem:[%s3357_s0 + $0x28] sm:$0xff] }
  0xe9   :  { %1097 = vmatprep.subr.mxu1 %v545_v13  ;;  %1027 = vmatpush2.msra.mxu0 %v416_v14  ;;  %v509_v49 = vld [vmem:[%s3356_s1 + $0xed8] sm:$0xff]  ;;  %v508_v51 = vld [vmem:[%s3356_s1 + $0xed0] sm:$0xff] }
  0xea   :  { %1098 = vmatpush2.msra.mxu1 %v544_v15  ;;  %1028 = vmatprep.subr.mxu0 %v413_v16  ;;  %v377_v52 = vld [vmem:[%s3356_s1 + $0xab8] sm:$0xff]  ;;  %v376_v54 = vld [vmem:[%s3356_s1 + $0xab0] sm:$0xff]  ;;  %v1205_v16 = vld [vmem:[%s3359_s5] sm:$0xff] }
  0xeb   :  { %1099 = vmatprep.subr.mxu1 %v541_v17  ;;  %1029 = vmatpush2.msra.mxu0 %v412_v18  ;;  %v505_v53 = vld [vmem:[%s3356_s1 + $0xeb8] sm:$0xff]  ;;  %v504_v55 = vld [vmem:[%s3356_s1 + $0xeb0] sm:$0xff]  ;;  %v1521_v17 = vld [vmem:[%s3357_s0 + $0x20] sm:$0xff] }
  0xec   :  { %1100 = vmatpush2.msra.mxu1 %v540_v19  ;;  %1030 = vmatprep.subr.mxu0 %v409_v20  ;;  %v373_v56 = vld [vmem:[%s3356_s1 + $0xa98] sm:$0xff]  ;;  %v372_v58 = vld [vmem:[%s3356_s1 + $0xa90] sm:$0xff] }
  0xed   :  { %1101 = vmatprep.subr.mxu1 %v537_v21  ;;  %1031 = vmatpush2.msra.mxu0 %v408_v22  ;;  %v501_v57 = vld [vmem:[%s3356_s1 + $0xe98] sm:$0xff]  ;;  %v500_v59 = vld [vmem:[%s3356_s1 + $0xe90] sm:$0xff]  ;;  %v1523_v21 = vmov 0.0   ;;  %v1204_v22 = vld [vmem:[%s3360_s3] sm:$0xff] }
  0xee   :  { %1102 = vmatpush2.msra.mxu1 %v536_v23  ;;  %1032 = vmatprep.subr.mxu0 %v405_v24  ;;  %v369_v60 = vld [vmem:[%s3356_s1 + $0xa78] sm:$0xff]  ;;  %v368_v62 = vld [vmem:[%s3356_s1 + $0xa70] sm:$0xff]  ;;  %v1169_v23 = vld [vmem:[%s3358_s4 + $0xe8] sm:$0xff] }
  0xef   :  { %1103 = vmatprep.subr.mxu1 %v533_v25  ;;  %1033 = vmatpush2.msra.mxu0 %v404_v26  ;;  %v497_v61 = vld [vmem:[%s3356_s1 + $0xe78] sm:$0xff]  ;;  %v496_v63 = vld [vmem:[%s3356_s1 + $0xe70] sm:$0xff]  ;;  %v1153_v25 = vld [vmem:[%s3358_s4 + $0x68] sm:$0xff] }
  0xf0   :  { %1104 = vmatpush2.msra.mxu1 %v532_v27  ;;  %1034 = vmatprep.subr.mxu0 %v401_v28  ;;  %v365_v0 = vld [vmem:[%s3356_s1 + $0xa58] sm:$0xff]  ;;  %v364_v2 = vld [vmem:[%s3356_s1 + $0xa50] sm:$0xff]  ;;  %v1168_v27 = vld [vmem:[%s3358_s4 + $0xe0] sm:$0xff] }
  0xf1   :  { %1105 = vmatprep.subr.mxu1 %v529_v29  ;;  %1035 = vmatpush2.msra.mxu0 %v400_v30  ;;  %v493_v1 = vld [vmem:[%s3356_s1 + $0xe58] sm:$0xff]  ;;  %v492_v3 = vld [vmem:[%s3356_s1 + $0xe50] sm:$0xff]  ;;  %v1152_v29 = vld [vmem:[%s3358_s4 + $0x60] sm:$0xff] }
  0xf2   :  { %1106 = vmatpush2.msra.mxu1 %v528_v31  ;;  %1036 = vmatprep.subr.mxu0 %v397_v32  ;;  %v361_v4 = vld [vmem:[%s3356_s1 + $0xa38] sm:$0xff]  ;;  %v360_v6 = vld [vmem:[%s3356_s1 + $0xa30] sm:$0xff]  ;;  %v1201_v32 = vld [vmem:[%s3358_s4 + $0x1e8] sm:$0xff] }
  0xf3   :  { %1107 = vmatprep.subr.mxu1 %v525_v33  ;;  %1037 = vmatpush2.msra.mxu0 %v396_v34  ;;  %v489_v5 = vld [vmem:[%s3356_s1 + $0xe38] sm:$0xff]  ;;  %v488_v7 = vld [vmem:[%s3356_s1 + $0xe30] sm:$0xff]  ;;  %v1185_v34 = vld [vmem:[%s3358_s4 + $0x168] sm:$0xff] }
  0xf4   :  { %1108 = vmatpush2.msra.mxu1 %v524_v35  ;;  %1038 = vmatprep.subr.mxu0 %v393_v36  ;;  %v357_v8 = vld [vmem:[%s3356_s1 + $0xa18] sm:$0xff]  ;;  %v356_v10 = vld [vmem:[%s3356_s1 + $0xa10] sm:$0xff]  ;;  %v1200_v36 = vld [vmem:[%s3358_s4 + $0x1e0] sm:$0xff] }
  0xf5   :  { %1109 = vmatprep.subr.mxu1 %v521_v37  ;;  %1039 = vmatpush2.msra.mxu0 %v392_v38  ;;  %v485_v9 = vld [vmem:[%s3356_s1 + $0xe18] sm:$0xff]  ;;  %v484_v11 = vld [vmem:[%s3356_s1 + $0xe10] sm:$0xff]  ;;  %v1184_v38 = vld [vmem:[%s3358_s4 + $0x160] sm:$0xff] }
  0xf6   :  { %1110 = vmatpush2.msra.mxu1 %v520_v39  ;;  %1040 = vmatprep.subr.mxu0 %v389_v40  ;;  %v1171_v13 = vld [vmem:[%s3358_s4 + $0xf8] sm:$0xff]  ;;  %v1522_v18 = vld [vmem:[%s3357_s0 + $0x30] sm:$0xff]  ;;  %v1165_v39 = vld [vmem:[%s3358_s4 + $0xc8] sm:$0xff] }
  0xf7   :  { %1111 = vmatprep.subr.mxu1 %v517_v41  ;;  %1041 = vmatpush2.msra.mxu0 %v388_v42  ;;  %v1520_v14 = vld [vmem:[%s3357_s0 + $0x38] sm:$0xff]  ;;  %v1170_v19 = vld [vmem:[%s3358_s4 + $0xf0] sm:$0xff]  ;;  %v1149_v41 = vld [vmem:[%s3358_s4 + $0x48] sm:$0xff] }
  0xf8   :  { %1112 = vmatpush2.msra.mxu1 %v516_v43  ;;  %1042 = vmatprep.subr.mxu0 %v385_v44  ;;  %v1155_v15 = vld [vmem:[%s3358_s4 + $0x78] sm:$0xff]  ;;  %v1154_v20 = vld [vmem:[%s3358_s4 + $0x70] sm:$0xff]  ;;  %v1164_v43 = vld [vmem:[%s3358_s4 + $0xc0] sm:$0xff] }
  0xf9   :  { %1113 = vmatprep.subr.mxu1 %v513_v45  ;;  %1043 = vmatpush2.msra.mxu0 %v384_v46  ;;  %v1203_v24 = vld [vmem:[%s3358_s4 + $0x1f8] sm:$0xff]  ;;  %v1202_v28 = vld [vmem:[%s3358_s4 + $0x1f0] sm:$0xff]  ;;  %v1148_v45 = vld [vmem:[%s3358_s4 + $0x40] sm:$0xff] }
  0xfa   :  { %1114 = vmatpush2.msra.mxu1 %v512_v47  ;;  %1044 = vmatprep.subr.mxu0 %v381_v48  ;;  %v1187_v26 = vld [vmem:[%s3358_s4 + $0x178] sm:$0xff]  ;;  %v1186_v30 = vld [vmem:[%s3358_s4 + $0x170] sm:$0xff]  ;;  %v1197_v48 = vld [vmem:[%s3358_s4 + $0x1c8] sm:$0xff] }
  0xfb   :  { %1115 = vmatprep.subr.mxu1 %v509_v49  ;;  %1045 = vmatpush2.msra.mxu0 %v380_v50  ;;  %v1167_v31 = vld [vmem:[%s3358_s4 + $0xd8] sm:$0xff]  ;;  %v1166_v35 = vld [vmem:[%s3358_s4 + $0xd0] sm:$0xff]  ;;  %v1181_v50 = vld [vmem:[%s3358_s4 + $0x148] sm:$0xff] }
  0xfc   :  { %1116 = vmatpush2.msra.mxu1 %v508_v51  ;;  %1046 = vmatprep.subr.mxu0 %v377_v52  ;;  %v1151_v33 = vld [vmem:[%s3358_s4 + $0x58] sm:$0xff]  ;;  %v1150_v37 = vld [vmem:[%s3358_s4 + $0x50] sm:$0xff]  ;;  %v1196_v52 = vld [vmem:[%s3358_s4 + $0x1c0] sm:$0xff] }
  0xfd   :  { %1117 = vmatprep.subr.mxu1 %v505_v53  ;;  %1047 = vmatpush2.msra.mxu0 %v376_v54  ;;  %v1199_v40 = vld [vmem:[%s3358_s4 + $0x1d8] sm:$0xff]  ;;  %v1198_v44 = vld [vmem:[%s3358_s4 + $0x1d0] sm:$0xff]  ;;  %v1180_v54 = vld [vmem:[%s3358_s4 + $0x140] sm:$0xff] }
  0xfe   :  { %1118 = vmatpush2.msra.mxu1 %v504_v55  ;;  %1048 = vmatprep.subr.mxu0 %v373_v56  ;;  %v1183_v42 = vld [vmem:[%s3358_s4 + $0x158] sm:$0xff]  ;;  %v1182_v46 = vld [vmem:[%s3358_s4 + $0x150] sm:$0xff]  ;;  %v1161_v55 = vld [vmem:[%s3358_s4 + $0xa8] sm:$0xff] }
  0xff   :  { %1119 = vmatprep.subr.mxu1 %v501_v57  ;;  %1049 = vmatpush2.msra.mxu0 %v372_v58  ;;  %v1163_v47 = vld [vmem:[%s3358_s4 + $0xb8] sm:$0xff]  ;;  %v1162_v51 = vld [vmem:[%s3358_s4 + $0xb0] sm:$0xff]  ;;  %v1145_v57 = vld [vmem:[%s3358_s4 + $0x28] sm:$0xff] }
 0x100   :  { %1120 = vmatpush2.msra.mxu1 %v500_v59  ;;  %1050 = vmatprep.subr.mxu0 %v369_v60  ;;  %v1147_v49 = vld [vmem:[%s3358_s4 + $0x38] sm:$0xff]  ;;  %v1146_v53 = vld [vmem:[%s3358_s4 + $0x30] sm:$0xff]  ;;  %v1160_v59 = vld [vmem:[%s3358_s4 + $0xa0] sm:$0xff] }
 0x101   :  { %1121 = vmatprep.subr.mxu1 %v497_v61  ;;  %1051 = vmatpush2.msra.mxu0 %v368_v62  ;;  %v1195_v56 = vld [vmem:[%s3358_s4 + $0x1b8] sm:$0xff]  ;;  %v1194_v60 = vld [vmem:[%s3358_s4 + $0x1b0] sm:$0xff]  ;;  %v1144_v61 = vld [vmem:[%s3358_s4 + $0x20] sm:$0xff] }
 0x102   :  { %1122 = vmatpush2.msra.mxu1 %v496_v63  ;;  %1052 = vmatprep.subr.mxu0 %v365_v0  ;;  %v1179_v58 = vld [vmem:[%s3358_s4 + $0x138] sm:$0xff]  ;;  %v1178_v62 = vld [vmem:[%s3358_s4 + $0x130] sm:$0xff]  ;;  %v1193_v0 = vld [vmem:[%s3358_s4 + $0x1a8] sm:$0xff] }
 0x103   :  { %1123 = vmatprep.subr.mxu1 %v493_v1  ;;  %1053 = vmatpush2.msra.mxu0 %v364_v2  ;;  %v1159_v63 = vld [vmem:[%s3358_s4 + $0x98] sm:$0xff]  ;;  %v1177_v2 = vld [vmem:[%s3358_s4 + $0x128] sm:$0xff] }
 0x104   :  { %1124 = vmatpush2.msra.mxu1 %v492_v3  ;;  %1054 = vmatprep.subr.mxu0 %v361_v4  ;;  %v1143_v1 = vld [vmem:[%s3358_s4 + $0x18] sm:$0xff]  ;;  %v1158_v3 = vld [vmem:[%s3358_s4 + $0x90] sm:$0xff] }
 0x105   :  { %1125 = vmatprep.subr.mxu1 %v489_v5  ;;  %1055 = vmatpush2.msra.mxu0 %v360_v6  ;;  %v1142_v4 = vld [vmem:[%s3358_s4 + $0x10] sm:$0xff]  ;;  %v1157_v5 = vld [vmem:[%s3358_s4 + $0x88] sm:$0xff] }
 0x106   :  { %1126 = vmatpush2.msra.mxu1 %v488_v7  ;;  %1056 = vmatprep.subr.mxu0 %v357_v8  ;;  %v1141_v6 = vld [vmem:[%s3358_s4 + $0x8] sm:$0xff]  ;;  %v1156_v7 = vld [vmem:[%s3358_s4 + $0x80] sm:$0xff] }
 0x107   :  { %1127 = vmatprep.subr.mxu1 %v485_v9  ;;  %1057 = vmatpush2.msra.mxu0 %v356_v10  ;;  %v1140_v8 = vld [vmem:[%s3358_s4] sm:$0xff]  ;;  %v548_v9 = vlaneseq }
 0x108   :  { %1058 = vmatprep.mubr.f32.mxu0 %v1519_v12  ;;  %1128 = vmatpush2.msra.mxu1 %v484_v11  ;;  %v546_v12 = vld [vmem:[%s3361_s2] sm:$0xf] }
 0x109   :  { %1129 = vmatprep.mubr.f32.mxu1 %v1520_v14  ;;  %1059 = vmatmul.mubr.f32.vlgmr.msra.gmra.mxu0 %v1521_v17  ;;  %v549_v10 = vshrl.u32 %v548_v9, 7  ;;  %v634_v14 = vpop.f32.mrf.mxu0  ;;  %v705_v17 = vpop.f32.mrf.mxu1 }
 0x10a   :  { %1130 = vmatmul.mubr.f32.vlgmr.msra.gmra.mxu1 %v1522_v18  ;;  %1438 = vmatprep.subr.mxu1 %v1171_v13 }
 0x10b   :  { %1508 = vmatprep.subr.mxu0 %v1523_v21  ;;  %1439 = vmatpush3.msra.mxu1 %v1155_v15  ;;  %v550_v11 = vsub.s32 0, %v549_v10  ;;  %v554_v13 = vsub.s32 1, %v549_v10  ;;  %v636_v18 = vpop.f32.mrf.mxu0 }
 0x10c   :  { %1509 = vmatpush3.msra.mxu0 %v1205_v16  ;;  %1440 = vmatprep.subr.mxu1 %v1170_v19 }
 0x10d   :  { %1510 = vmatprep.mubr.msk.f32.mxu0 %vm1524_vm1, %v1523_v21  ;;  %1441 = vmatpush3.msra.mxu1 %v1154_v20  ;;  %v551_v15 = vrot.slane %v546_v12, %v550_v11  ;;  %v555_v16 = vrot.slane %v546_v12, %v554_v13  ;;  %v707_v21 = vpop.f32.mrf.mxu1  ;;  %v1435_v11 = vld [vmem:[%s3362_s6] ss:$0 sm:$0xff] }
 0x10e   :  { %1511 = vmatmul.mubr.msk.f32.vlgmr.msra.gmra.mxu0 %vm1206_vm0, %v1204_v22  ;;  %1442 = vmatprep.subr.mxu1 %v1169_v23 }
 0x10f   :  { %1473 = vmatprep.subr.mxu0 %v1203_v24  ;;  %1443 = vmatpush3.msra.mxu1 %v1153_v25  ;;  %v635_v19 = vadd.f32 %v634_v14, %v551_v15  ;;  %v637_v20 = vadd.f32 %v636_v18, %v555_v16 }
 0x110   :  { %1474 = vmatpush3.msra.mxu0 %v1187_v26  ;;  %1444 = vmatprep.subr.mxu1 %v1168_v27 }
 0x111   :  { %1475 = vmatprep.subr.mxu0 %v1202_v28  ;;  %1445 = vmatpush3.msra.mxu1 %v1152_v29  ;;  %v706_v22 = vadd.f32 %v705_v17, %v635_v19  ;;  %v708_v24 = vadd.f32 %v707_v21, %v637_v20 }
 0x112   :  { %1476 = vmatpush3.msra.mxu0 %v1186_v30  ;;  %1446 = vmatprep.subr.mxu1 %v1167_v31  ;;  %v1192_v31 = vld [vmem:[%s3358_s4 + $0x1a0] sm:$0xff] }
 0x113   :  { %1477 = vmatprep.subr.mxu0 %v1201_v32  ;;  %1447 = vmatpush3.msra.mxu1 %v1151_v33  ;;  %v1176_v33 = vld [vmem:[%s3358_s4 + $0x120] sm:$0xff] }
 0x114   :  { %1478 = vmatpush3.msra.mxu0 %v1185_v34  ;;  %1448 = vmatprep.subr.mxu1 %v1166_v35  ;;  %v1191_v34 = vld [vmem:[%s3358_s4 + $0x198] sm:$0xff] }
 0x115   :  { %1479 = vmatprep.subr.mxu0 %v1200_v36  ;;  %1449 = vmatpush3.msra.mxu1 %v1150_v37  ;;  %v1175_v36 = vld [vmem:[%s3358_s4 + $0x118] sm:$0xff] }
 0x116   :  { %1480 = vmatpush3.msra.mxu0 %v1184_v38  ;;  %1450 = vmatprep.subr.mxu1 %v1165_v39  ;;  %v1190_v38 = vld [vmem:[%s3358_s4 + $0x190] sm:$0xff] }
 0x117   :  { %1481 = vmatprep.subr.mxu0 %v1199_v40  ;;  %1451 = vmatpush3.msra.mxu1 %v1149_v41  ;;  %v1174_v39 = vld [vmem:[%s3358_s4 + $0x110] sm:$0xff]  ;;  %v1189_v40 = vld [vmem:[%s3358_s4 + $0x188] sm:$0xff] }
 0x118   :  { %1482 = vmatpush3.msra.mxu0 %v1183_v42  ;;  %1452 = vmatprep.subr.mxu1 %v1164_v43  ;;  %v1173_v41 = vld [vmem:[%s3358_s4 + $0x108] sm:$0xff]  ;;  %v1188_v42 = vld [vmem:[%s3358_s4 + $0x180] sm:$0xff] }
 0x119   :  { %1483 = vmatprep.subr.mxu0 %v1198_v44  ;;  %1453 = vmatpush3.msra.mxu1 %v1148_v45  ;;  %v1172_v43 = vld [vmem:[%s3358_s4 + $0x100] sm:$0xff]  ;;  %v558_v44 = vsub.s32 2, %v549_v10  ;;  %v562_v45 = vsub.s32 3, %v549_v10 }
 0x11a   :  { %1484 = vmatpush3.msra.mxu0 %v1182_v46  ;;  %1454 = vmatprep.subr.mxu1 %v1163_v47 }
 0x11b   :  { %1485 = vmatprep.subr.mxu0 %v1197_v48  ;;  %1455 = vmatpush3.msra.mxu1 %v1147_v49  ;;  %v559_v47 = vrot.slane %v546_v12, %v558_v44  ;;  %v563_v48 = vrot.slane %v546_v12, %v562_v45 }
 0x11c   :  { %1486 = vmatpush3.msra.mxu0 %v1181_v50  ;;  %1456 = vmatprep.subr.mxu1 %v1162_v51 }
 0x11d   :  { %1487 = vmatprep.subr.mxu0 %v1196_v52  ;;  %1457 = vmatpush3.msra.mxu1 %v1146_v53 }
 0x11e   :  { %1488 = vmatpush3.msra.mxu0 %v1180_v54  ;;  %1458 = vmatprep.subr.mxu1 %v1161_v55 }
 0x11f   :  { %1489 = vmatprep.subr.mxu0 %v1195_v56  ;;  %1459 = vmatpush3.msra.mxu1 %v1145_v57 }
 0x120   :  { %1490 = vmatpush3.msra.mxu0 %v1179_v58  ;;  %1460 = vmatprep.subr.mxu1 %v1160_v59 }
 0x121   :  { %1491 = vmatprep.subr.mxu0 %v1194_v60  ;;  %1461 = vmatpush3.msra.mxu1 %v1144_v61 }
 0x122   :  { %1492 = vmatpush3.msra.mxu0 %v1178_v62  ;;  %1462 = vmatprep.subr.mxu1 %v1159_v63 }
 0x123   :  { %1493 = vmatprep.subr.mxu0 %v1193_v0  ;;  %1463 = vmatpush3.msra.mxu1 %v1143_v1 }
 0x124   :  { %1494 = vmatpush3.msra.mxu0 %v1177_v2  ;;  %1464 = vmatprep.subr.mxu1 %v1158_v3 }
 0x125   :  { %1465 = vmatpush3.msra.mxu1 %v1142_v4  ;;  %1495 = vmatprep.subr.mxu0 %v1192_v31 }
 0x126   :  { %1466 = vmatprep.subr.mxu1 %v1157_v5  ;;  %1496 = vmatpush3.msra.mxu0 %v1176_v33 }
 0x127   :  { %1467 = vmatpush3.msra.mxu1 %v1141_v6  ;;  %1497 = vmatprep.subr.mxu0 %v1191_v34 }
 0x128   :  { %1468 = vmatprep.subr.mxu1 %v1156_v7  ;;  %1498 = vmatpush3.msra.mxu0 %v1175_v36 }
 0x129   :  { %1469 = vmatpush3.msra.mxu1 %v1140_v8  ;;  %1499 = vmatprep.subr.mxu0 %v1190_v38 }
 0x12a   :  { %1500 = vmatpush3.msra.mxu0 %v1174_v39 }
 0x12b   :  { %1501 = vmatprep.subr.mxu0 %v1189_v40 }
 0x12c   :  { %1502 = vmatpush3.msra.mxu0 %v1173_v41 }
 0x12d   :  { %1503 = vmatprep.subr.mxu0 %v1188_v42 }
 0x12e   :  { %1504 = vmatpush3.msra.mxu0 %v1172_v43 }
 0x145   :  { %v776_v23 = vpop.f32.mrf.mxu0 }
 0x146   :  { %v777_v25 = vadd.f32 %v776_v23, %v706_v22 }
 0x147   :  { %v847_v26 = vpop.f32.mrf.mxu1  ;;  %v778_v27 = vpop.f32.mrf.mxu0 }
 0x148   :  { %v779_v28 = vadd.f32 %v778_v27, %v708_v24  ;;  %v848_v29 = vadd.f32 %v847_v26, %v777_v25 }
 0x149   :  { %v849_v30 = vpop.f32.mrf.mxu1 }
 0x14a   :  { %v850_v32 = vadd.f32 %v849_v30, %v779_v28  ;;  %v1136_v37 = vmax.f32 %v848_v29, 0.0 }
 0x14c   :  { %v1137_v35 = vmax.f32 %v850_v32, 0.0 }
 0x14e   :  { %1344 = vmatprep.mubr.f32.mxu1 %v1137_v35 }
 0x14f   :  { %1345 = vmatmul.mubr.f32.vlgmr.msra.gmra.mxu1 %v1136_v37 }
 0x187   :  { %v918_v46 = vpop.f32.mrf.mxu0 }
 0x188   :  { %v919_v51 = vadd.f32 %v918_v46, %v559_v47 }
 0x189   :  { %v989_v49 = vpop.f32.mrf.mxu1  ;;  %v920_v50 = vpop.f32.mrf.mxu0 }
 0x18a   :  { %v921_v52 = vadd.f32 %v920_v50, %v563_v48  ;;  %v990_v54 = vadd.f32 %v989_v49, %v919_v51 }
 0x18b   :  { %v991_v53 = vpop.f32.mrf.mxu1 }
 0x18c   :  { %v992_v57 = vadd.f32 %v991_v53, %v921_v52 }
 0x1c9   :  { %v1060_v55 = vpop.f32.mrf.mxu0 }
 0x1ca   :  { %v1131_v56 = vpop.f32.mrf.mxu1  ;;  %v1061_v58 = vadd.f32 %v1060_v55, %v990_v54 }
 0x1cb   :  { %v1062_v59 = vpop.f32.mrf.mxu0 }
 0x1cc   :  { %v1063_v60 = vadd.f32 %v1062_v59, %v992_v57  ;;  %v1132_v61 = vadd.f32 %v1131_v56, %v1061_v58  ;;  %v1133_v62 = vpop.f32.mrf.mxu1 }
 0x1ce   :  { %v1276_v63 = vpop.f32.mrf.mxu0  ;;  %v1134_v0 = vadd.f32 %v1133_v62, %v1063_v60  ;;  %v1138_v3 = vmax.f32 %v1132_v61, 0.0 }
 0x1d0   :  { %v1512_v1 = vpop.f32.mrf.mxu0  ;;  %v1139_v2 = vmax.f32 %v1134_v0, 0.0 }
 0x1d2   :  { %1414 = vmatprep.mubr.f32.mxu0 %v1139_v2 }
 0x1d3   :  { %1415 = vmatmul.mubr.f32.vlgmr.msra.gmra.mxu0 %v1138_v3 }
 0x20f   :  { %v1470_v4 = vpop.f32.mrf.mxu1 }
 0x211   :  { %v1471_v5 = vpop.f32.mrf.mxu1 }
 0x212   :  { %v1472_v6 = vadd.f32 %v1471_v5, %v1470_v4 }
 0x214   :  { %v1347_v9 = vadd.f32 %v1472_v6, %v1276_v63 }
 0x293   :  { %v1505_v7 = vpop.f32.mrf.mxu0 }
 0x295   :  { %v1506_v8 = vpop.f32.mrf.mxu0 }
 0x296   :  { %v1507_v10 = vadd.f32 %v1506_v8, %v1505_v7 }
 0x298   :  { %v1417_v12 = vadd.f32 %v1507_v10, %v1347_v9 }
 0x29a   :  { %v1427_v13 = vadd.f32 %v1435_v11, %v1417_v12 }
 0x29c   :  { %1429 = vst.msk [vmem:[%s3363_s7] sm:$0xff] %vm1428_vm2, %v1427_v13 }

</bundles_post_ra>
